<compile_context>
chip_gen: v7x
topology: tpu7x:2x2x1
jax: 0.10.0
libtpu: 0.0.40
codegen_flags: <defaults>
</compile_context>

<pallas_src>
import math

import jax
import jax.numpy as jnp
from jax import lax
from jax.experimental import pallas as pl
from jax.experimental.pallas import tpu as pltpu

# Hyper-parameters from the PyTorch spec.
D_K = D_V = 64
D_MODEL = 30
N_HEADS = 8
D_FF = 1024
N_LAYERS = 6
TGT_VOCAB = 11
LN_EPS = 1e-5
NEG_INF = -10000.0


# ------------------------------ kernel helpers -------------------------------

def _layer_norm(y):
    mu = jnp.mean(y, axis=-1, keepdims=True)
    var = jnp.mean((y - mu) * (y - mu), axis=-1, keepdims=True)
    return (y - mu) * lax.rsqrt(var + LN_EPS)


def _mha(xq, xkv, mask_bool, wq, wk, wv, wo, attn_ref):
    """Multi-head attention + residual + LayerNorm.

    Writes the lane-dense (Lq, H*Lk) attention map into attn_ref[0, 0] with a
    single store and returns the normalized output (Lq, Dm).
    """
    scale = 1.0 / math.sqrt(D_K)
    # Batched projections: one matmul per operand covers all heads at once.
    # 1/sqrt(dk) folded into Q (loop invariant, applied once).
    q = jnp.dot(xq, wq, preferred_element_type=jnp.float32) * scale   # (Lq, H*dk)
    k = jnp.dot(xkv, wk, preferred_element_type=jnp.float32)          # (Lk, H*dk)
    v = jnp.dot(xkv, wv, preferred_element_type=jnp.float32)          # (Lk, H*dv)
    kt = k.T                                   # ONE transpose shared by all heads

    attn_parts = []
    ctx_parts = []
    for h in range(N_HEADS):                   # tiny tiles; fits in vregs at L<=10
        qh = q[:, h * D_K:(h + 1) * D_K]       # (Lq, dk)
        kth = kt[h * D_K:(h + 1) * D_K, :]     # (dk, Lk)  -- plain matmul, no transpose
        vh = v[:, h * D_V:(h + 1) * D_V]       # (Lk, dv)
        scores = jnp.dot(qh, kth, preferred_element_type=jnp.float32)
        scores = jnp.where(mask_bool, jnp.float32(NEG_INF), scores)   # masked_fill(-1e4)
        m = jnp.max(scores, axis=-1, keepdims=True)
        e = jnp.exp(scores - m)
        inv = pl.reciprocal(jnp.sum(e, axis=-1, keepdims=True), approx=True)
        attn = e * inv                                                 # (Lq, Lk)
        attn_parts.append(attn)
        ctx_parts.append(jnp.dot(attn, vh, preferred_element_type=jnp.float32))

    # Single lane-dense attention store; wrapper reshapes to (B, H, Lq, Lk).
    attn_ref[0, 0] = jnp.concatenate(attn_parts, axis=-1)             # (Lq, H*Lk)
    # fc(concat_h ctx_h): one K=512 matmul instead of 8 K=64 matmuls + add chain.
    ctx = jnp.concatenate(ctx_parts, axis=-1)                          # (Lq, H*dv)
    proj = jnp.dot(ctx, wo, preferred_element_type=jnp.float32)        # (Lq, Dm)
    return _layer_norm(proj + xq)


def _decoder_kernel(x0_ref, enc_ref, smask_ref, emask_ref,
                    sa_wq_ref, sa_wk_ref, sa_wv_ref, sa_wo_ref,
                    ca_wq_ref, ca_wk_ref, ca_wv_ref, ca_wo_ref,
                    ffn_w1_ref, ffn_w2_ref,
                    out_ref, sattn_ref, eattn_ref, x_sc):
    layer = pl.program_id(1)

    @pl.when(layer == 0)
    def _():
        x_sc[...] = x0_ref[0]          # embedded+pos input, resident for this batch row

    x = x_sc[...]                      # (L, Dm) activation carried in VMEM scratch
    enc = enc_ref[0]                   # (S, Dm)
    smask = smask_ref[0] > 0.5         # hoisted mask compares (loop invariant)
    emask = emask_ref[0] > 0.5

    # Self attention -> residual + LN
    x = _mha(x, x, smask,
             sa_wq_ref[0], sa_wk_ref[0], sa_wv_ref[0], sa_wo_ref[0], sattn_ref)
    # Cross (dec-enc) attention -> residual + LN
    x = _mha(x, enc, emask,
             ca_wq_ref[0], ca_wk_ref[0], ca_wv_ref[0], ca_wo_ref[0], eattn_ref)
    # Position-wise FFN -> residual + LN
    h = jnp.maximum(
        jnp.dot(x, ffn_w1_ref[0], preferred_element_type=jnp.float32), 0.0)
    y = jnp.dot(h, ffn_w2_ref[0], preferred_element_type=jnp.float32) + x
    x = _layer_norm(y)

    x_sc[...] = x
    out_ref[0] = x                     # constant block index across layers; last write wins


# ------------------------------ wrapper --------------------------------------

def positional_encoding(max_len, dm):
    pos = jnp.arange(max_len, dtype=jnp.float32)[:, None]
    div = jnp.exp(jnp.arange(0, dm, 2, dtype=jnp.float32) *
                  (-math.log(10000.0) / dm))
    pe = jnp.zeros((max_len, dm), jnp.float32)
    pe = pe.at[:, 0::2].set(jnp.sin(pos * div))
    pe = pe.at[:, 1::2].set(jnp.cos(pos * div))
    return pe


def decoder_forward(dec_inputs, enc_inputs, enc_outputs, params):
    B, L = dec_inputs.shape
    S = enc_inputs.shape[1]
    HK = N_HEADS * D_K
    HV = N_HEADS * D_V

    # Embedding lookup + positional encoding in plain JAX (no kernel launch).
    x0 = params["emb"][dec_inputs] + positional_encoding(L, D_MODEL)[None]
    # TODO(synk): nn.Dropout(p=0.1) in PositionalEncoding is identity here (inference mode).

    # Attention masks (cheap boolean logic in the wrapper; passed as f32 0/1).
    pad = jnp.broadcast_to((dec_inputs == 0)[:, None, :], (B, L, L))
    sub = jnp.triu(jnp.ones((L, L), jnp.int32), k=1)[None, :, :]
    self_mask = ((pad.astype(jnp.int32) + sub) > 0).astype(jnp.float32)
    enc_mask = jnp.broadcast_to((enc_inputs == 0)[:, None, :],
                                (B, L, S)).astype(jnp.float32)

    # Stack per-layer weights so the layer grid axis can index them.
    def stack(name):
        return jnp.stack([lyr[name] for lyr in params["layers"]], axis=0)

    weights = [stack(n) for n in ("sa_wq", "sa_wk", "sa_wv", "sa_wo",
                                  "ca_wq", "ca_wk", "ca_wv", "ca_wo",
                                  "ffn_w1", "ffn_w2")]

    def batch_blk(shape):
        return pl.BlockSpec((1,) + shape, lambda b, l: (b, 0, 0))

    def layer_blk(shape):
        return pl.BlockSpec((1,) + shape, lambda b, l: (l, 0, 0))

    out, sattn, eattn = pl.pallas_call(
        _decoder_kernel,
        out_shape=(
            jax.ShapeDtypeStruct((B, L, D_MODEL), jnp.float32),
            jax.ShapeDtypeStruct((B, N_LAYERS, L, N_HEADS * L), jnp.float32),
            jax.ShapeDtypeStruct((B, N_LAYERS, L, N_HEADS * S), jnp.float32),
        ),
        grid=(B, N_LAYERS),
        in_specs=[
            batch_blk((L, D_MODEL)),            # x0 (embedded input)
            batch_blk((S, D_MODEL)),            # enc_outputs
            batch_blk((L, L)),                  # self-attn mask
            batch_blk((L, S)),                  # enc-attn mask
            layer_blk((D_MODEL, HK)),           # sa_wq
            layer_blk((D_MODEL, HK)),           # sa_wk
            layer_blk((D_MODEL, HV)),           # sa_wv
            layer_blk((HV, D_MODEL)),           # sa_wo
            layer_blk((D_MODEL, HK)),           # ca_wq
            layer_blk((D_MODEL, HK)),           # ca_wk
            layer_blk((D_MODEL, HV)),           # ca_wv
            layer_blk((HV, D_MODEL)),           # ca_wo
            layer_blk((D_MODEL, D_FF)),         # ffn_w1
            layer_blk((D_FF, D_MODEL)),         # ffn_w2
        ],
        out_specs=(
            pl.BlockSpec((1, L, D_MODEL), lambda b, l: (b, 0, 0)),
            pl.BlockSpec((1, 1, L, N_HEADS * L), lambda b, l: (b, l, 0, 0)),
            pl.BlockSpec((1, 1, L, N_HEADS * S), lambda b, l: (b, l, 0, 0)),
        ),
        scratch_shapes=[pltpu.VMEM((L, D_MODEL), jnp.float32)],
        compiler_params=pltpu.CompilerParams(
            dimension_semantics=("parallel", "arbitrary")),
    )(x0, enc_outputs, self_mask, enc_mask, *weights)

    # Lane-dense (Lq, H*Lk) attention slabs -> per-layer (B, H, Lq, Lk). Free XLA plumbing.
    sattn = sattn.reshape(B, N_LAYERS, L, N_HEADS, L).transpose(1, 0, 3, 2, 4)
    eattn = eattn.reshape(B, N_LAYERS, L, N_HEADS, S).transpose(1, 0, 3, 2, 4)
    self_attns = [sattn[i] for i in range(N_LAYERS)]
    enc_attns = [eattn[i] for i in range(N_LAYERS)]
    return out, self_attns, enc_attns


# --------------------------- pure-JAX reference ------------------------------

def decoder_ref(dec_inputs, enc_inputs, enc_outputs, params):
    B, L = dec_inputs.shape
    S = enc_inputs.shape[1]
    x = params["emb"][dec_inputs] + positional_encoding(L, D_MODEL)[None]

    pad = jnp.broadcast_to((dec_inputs == 0)[:, None, :], (B, L, L))
    sub = jnp.triu(jnp.ones((L, L), jnp.int32), k=1)[None, :, :]
    self_mask = (pad.astype(jnp.int32) + sub) > 0
    enc_mask = jnp.broadcast_to((enc_inputs == 0)[:, None, :], (B, L, S))

    def ln(y):
        mu = y.mean(-1, keepdims=True)
        var = ((y - mu) ** 2).mean(-1, keepdims=True)
        return (y - mu) / jnp.sqrt(var + LN_EPS)

    def mha(xq, xkv, mask, wq, wk, wv, wo):
        Bq, Lq, _ = xq.shape
        Lk = xkv.shape[1]
        Q = (xq @ wq).reshape(Bq, Lq, N_HEADS, D_K).transpose(0, 2, 1, 3)
        K = (xkv @ wk).reshape(Bq, Lk, N_HEADS, D_K).transpose(0, 2, 1, 3)
        V = (xkv @ wv).reshape(Bq, Lk, N_HEADS, D_V).transpose(0, 2, 1, 3)
        scores = jnp.einsum("bhqd,bhkd->bhqk", Q, K) / math.sqrt(D_K)
        scores = jnp.where(mask[:, None, :, :], -10000.0, scores)
        attn = jax.nn.softmax(scores, axis=-1)
        ctx = jnp.einsum("bhqk,bhkd->bhqd", attn, V)
        ctx = ctx.transpose(0, 2, 1, 3).reshape(Bq, Lq, N_HEADS * D_V)
        return ln(ctx @ wo + xq), attn

    sas, eas = [], []
    for lyr in params["layers"]:
        x, sa = mha(x, x, self_mask, lyr["sa_wq"], lyr["sa_wk"],
                    lyr["sa_wv"], lyr["sa_wo"])
        x, ea = mha(x, enc_outputs, enc_mask, lyr["ca_wq"], lyr["ca_wk"],
                    lyr["ca_wv"], lyr["ca_wo"])
        h = jnp.maximum(x @ lyr["ffn_w1"], 0.0)
        x = ln(h @ lyr["ffn_w2"] + x)
        sas.append(sa)
        eas.append(ea)
    return x, sas, eas


# --------------------------- setup & test ------------------------------------

def init_params(key):
    keys = jax.random.split(key, 1 + N_LAYERS * 10)
    params = {"emb": jax.random.normal(keys[0], (TGT_VOCAB, D_MODEL), jnp.float32),
              "layers": []}
    ki = 1
    s_in = 1.0 / math.sqrt(D_MODEL)
    s_hd = 1.0 / math.sqrt(N_HEADS * D_V)
    s_ff = 1.0 / math.sqrt(D_FF)
    for _ in range(N_LAYERS):
        def nxt():
            nonlocal ki
            k = keys[ki]
            ki += 1
            return k
        lyr = {
            "sa_wq": jax.random.normal(nxt(), (D_MODEL, N_HEADS * D_K), jnp.float32) * s_in,
            "sa_wk": jax.random.normal(nxt(), (D_MODEL, N_HEADS * D_K), jnp.float32) * s_in,
            "sa_wv": jax.random.normal(nxt(), (D_MODEL, N_HEADS * D_V), jnp.float32) * s_in,
            "sa_wo": jax.random.normal(nxt(), (N_HEADS * D_V, D_MODEL), jnp.float32) * s_hd,
            "ca_wq": jax.random.normal(nxt(), (D_MODEL, N_HEADS * D_K), jnp.float32) * s_in,
            "ca_wk": jax.random.normal(nxt(), (D_MODEL, N_HEADS * D_K), jnp.float32) * s_in,
            "ca_wv": jax.random.normal(nxt(), (D_MODEL, N_HEADS * D_V), jnp.float32) * s_in,
            "ca_wo": jax.random.normal(nxt(), (N_HEADS * D_V, D_MODEL), jnp.float32) * s_hd,
            "ffn_w1": jax.random.normal(nxt(), (D_MODEL, D_FF), jnp.float32) * s_in,
            "ffn_w2": jax.random.normal(nxt(), (D_FF, D_MODEL), jnp.float32) * s_ff,
        }
        params["layers"].append(lyr)
    return params


if __name__ == "__main__":
    B, TGT_LEN, SRC_LEN = 2, 8, 10
    key = jax.random.PRNGKey(0)
    kp, kd, ke, ko = jax.random.split(key, 4)

    params = init_params(kp)
    dec_inputs = jax.random.randint(kd, (B, TGT_LEN), 0, TGT_VOCAB, dtype=jnp.int32)
    dec_inputs = dec_inputs.at[:, -1].set(0)       # force some pad tokens
    enc_inputs = jax.random.randint(ke, (B, SRC_LEN), 0, TGT_VOCAB, dtype=jnp.int32)
    enc_inputs = enc_inputs.at[:, -2:].set(0)      # force some pad tokens
    enc_outputs = jax.random.normal(ko, (B, SRC_LEN, D_MODEL), jnp.float32)

    out, self_attns, enc_attns = decoder_forward(dec_inputs, enc_inputs,
                                                 enc_outputs, params)
    jax.block_until_ready(out)

    ref_out, ref_sa, ref_ea = decoder_ref(dec_inputs, enc_inputs,
                                          enc_outputs, params)

    assert out.shape == (B, TGT_LEN, D_MODEL), out.shape
    assert len(self_attns) == N_LAYERS and len(enc_attns) == N_LAYERS
    assert self_attns[0].shape == (B, N_HEADS, TGT_LEN, TGT_LEN)
    assert enc_attns[0].shape == (B, N_HEADS, TGT_LEN, SRC_LEN)

    # Tolerances: pl.reciprocal(approx=True) in the softmax adds ~1e-4 relative
    # error per stage; 5e-3 covers its accumulation over 6 layers. First-layer
    # attention (a single softmax) is held to the tighter 2e-3.
    max_err = float(jnp.max(jnp.abs(out - ref_out)))
    assert jnp.allclose(out, ref_out, atol=5e-3, rtol=5e-3), max_err
    assert jnp.allclose(self_attns[0], ref_sa[0], atol=2e-3, rtol=2e-3)
    assert jnp.allclose(self_attns[-1], ref_sa[-1], atol=5e-3, rtol=5e-3)
    assert jnp.allclose(enc_attns[-1], ref_ea[-1], atol=5e-3, rtol=5e-3)
    print("KERNEL_OK")
</pallas_src>

<mosaic_0001>
module attributes {stable_mosaic.version = 11 : i64} {
  func.func @_decoder_kernel(%arg0: i32, %arg1: i32, %arg2: memref<1x8x30xf32, #tpu.memory_space<vmem>>, %arg3: memref<1x10x30xf32, #tpu.memory_space<vmem>>, %arg4: memref<1x8x8xf32, #tpu.memory_space<vmem>>, %arg5: memref<1x8x10xf32, #tpu.memory_space<vmem>>, %arg6: memref<1x30x512xf32, #tpu.memory_space<vmem>>, %arg7: memref<1x30x512xf32, #tpu.memory_space<vmem>>, %arg8: memref<1x30x512xf32, #tpu.memory_space<vmem>>, %arg9: memref<1x512x30xf32, #tpu.memory_space<vmem>>, %arg10: memref<1x30x512xf32, #tpu.memory_space<vmem>>, %arg11: memref<1x30x512xf32, #tpu.memory_space<vmem>>, %arg12: memref<1x30x512xf32, #tpu.memory_space<vmem>>, %arg13: memref<1x512x30xf32, #tpu.memory_space<vmem>>, %arg14: memref<1x30x1024xf32, #tpu.memory_space<vmem>>, %arg15: memref<1x1024x30xf32, #tpu.memory_space<vmem>>, %arg16: memref<1x8x30xf32, #tpu.memory_space<vmem>>, %arg17: memref<1x1x8x64xf32, #tpu.memory_space<vmem>>, %arg18: memref<1x1x8x80xf32, #tpu.memory_space<vmem>>, %arg19: memref<8x30xf32, #tpu.memory_space<vmem>>) attributes {dimension_semantics = [#tpu.dimension_semantics<parallel>, #tpu.dimension_semantics<arbitrary>], iteration_bounds = array<i64: 2, 6>, scalar_prefetch = 0 : i64, scratch_operands = 1 : i64, tpu.core_type = #tpu.core_type<tc>, window_params = [{transform_indices = @transform_0, window_bounds = array<i64: 1, 8, 30>}, {transform_indices = @transform_1, window_bounds = array<i64: 1, 10, 30>}, {transform_indices = @transform_2, window_bounds = array<i64: 1, 8, 8>}, {transform_indices = @transform_3, window_bounds = array<i64: 1, 8, 10>}, {transform_indices = @transform_4, window_bounds = array<i64: 1, 30, 512>}, {transform_indices = @transform_5, window_bounds = array<i64: 1, 30, 512>}, {transform_indices = @transform_6, window_bounds = array<i64: 1, 30, 512>}, {transform_indices = @transform_7, window_bounds = array<i64: 1, 512, 30>}, {transform_indices = @transform_8, window_bounds = array<i64: 1, 30, 512>}, {transform_indices = @transform_9, window_bounds = array<i64: 1, 30, 512>}, {transform_indices = @transform_10, window_bounds = array<i64: 1, 30, 512>}, {transform_indices = @transform_11, window_bounds = array<i64: 1, 512, 30>}, {transform_indices = @transform_12, window_bounds = array<i64: 1, 30, 1024>}, {transform_indices = @transform_13, window_bounds = array<i64: 1, 1024, 30>}, {transform_indices = @transform_14, window_bounds = array<i64: 1, 8, 30>}, {transform_indices = @transform_15, window_bounds = array<i64: 1, 1, 8, 64>}, {transform_indices = @transform_16, window_bounds = array<i64: 1, 1, 8, 80>}]} {
    %c0_i32 = arith.constant 0 : i32
    %0 = arith.cmpi eq, %arg1, %c0_i32 : i32
    %1 = arith.extui %0 : i1 to i32
    %c0_i32_0 = arith.constant 0 : i32
    %2 = arith.cmpi ne, %1, %c0_i32_0 : i32
    scf.if %2 {
      %c0_163 = arith.constant 0 : index
      %c0_164 = arith.constant 0 : index
      %c0_165 = arith.constant 0 : index
      %401 = vector.load %arg2[%c0_163, %c0_164, %c0_165] : memref<1x8x30xf32, #tpu.memory_space<vmem>>, vector<1x8x30xf32>
      %402 = vector.shape_cast %401 : vector<1x8x30xf32> to vector<8x30xf32>
      %c0_166 = arith.constant 0 : index
      %c0_167 = arith.constant 0 : index
      %403 = vector.load %arg19[%c0_166, %c0_167] : memref<8x30xf32, #tpu.memory_space<vmem>>, vector<8x30xf32>
      tpu.vector_store %arg19[%c0_166, %c0_167], %402 {strides = array<i32>} : memref<8x30xf32, #tpu.memory_space<vmem>>, vector<8x30xf32>,
    } else {
    }
    %c0 = arith.constant 0 : index
    %c0_1 = arith.constant 0 : index
    %3 = vector.load %arg19[%c0, %c0_1] : memref<8x30xf32, #tpu.memory_space<vmem>>, vector<8x30xf32>
    %c0_2 = arith.constant 0 : index
    %c0_3 = arith.constant 0 : index
    %c0_4 = arith.constant 0 : index
    %4 = vector.load %arg3[%c0_2, %c0_3, %c0_4] : memref<1x10x30xf32, #tpu.memory_space<vmem>>, vector<1x10x30xf32>
    %5 = vector.shape_cast %4 : vector<1x10x30xf32> to vector<10x30xf32>
    %c0_5 = arith.constant 0 : index
    %c0_6 = arith.constant 0 : index
    %c0_7 = arith.constant 0 : index
    %6 = vector.load %arg4[%c0_5, %c0_6, %c0_7] : memref<1x8x8xf32, #tpu.memory_space<vmem>>, vector<1x8x8xf32>
    %7 = vector.shape_cast %6 : vector<1x8x8xf32> to vector<8x8xf32>
    %cst = arith.constant 5.000000e-01 : f32
    %8 = vector.broadcast %cst : f32 to vector<8x8xf32>
    %9 = arith.cmpf ogt, %7, %8 : vector<8x8xf32>
    %c0_8 = arith.constant 0 : index
    %c0_9 = arith.constant 0 : index
    %c0_10 = arith.constant 0 : index
    %10 = vector.load %arg5[%c0_8, %c0_9, %c0_10] : memref<1x8x10xf32, #tpu.memory_space<vmem>>, vector<1x8x10xf32>
    %11 = vector.shape_cast %10 : vector<1x8x10xf32> to vector<8x10xf32>
    %cst_11 = arith.constant 5.000000e-01 : f32
    %12 = vector.broadcast %cst_11 : f32 to vector<8x10xf32>
    %13 = arith.cmpf ogt, %11, %12 : vector<8x10xf32>
    %c0_12 = arith.constant 0 : index
    %c0_13 = arith.constant 0 : index
    %c0_14 = arith.constant 0 : index
    %14 = vector.load %arg6[%c0_12, %c0_13, %c0_14] : memref<1x30x512xf32, #tpu.memory_space<vmem>>, vector<1x30x512xf32>
    %15 = vector.shape_cast %14 : vector<1x30x512xf32> to vector<30x512xf32>
    %c0_15 = arith.constant 0 : index
    %c0_16 = arith.constant 0 : index
    %c0_17 = arith.constant 0 : index
    %16 = vector.load %arg7[%c0_15, %c0_16, %c0_17] : memref<1x30x512xf32, #tpu.memory_space<vmem>>, vector<1x30x512xf32>
    %17 = vector.shape_cast %16 : vector<1x30x512xf32> to vector<30x512xf32>
    %c0_18 = arith.constant 0 : index
    %c0_19 = arith.constant 0 : index
    %c0_20 = arith.constant 0 : index
    %18 = vector.load %arg8[%c0_18, %c0_19, %c0_20] : memref<1x30x512xf32, #tpu.memory_space<vmem>>, vector<1x30x512xf32>
    %19 = vector.shape_cast %18 : vector<1x30x512xf32> to vector<30x512xf32>
    %c0_21 = arith.constant 0 : index
    %c0_22 = arith.constant 0 : index
    %c0_23 = arith.constant 0 : index
    %20 = vector.load %arg9[%c0_21, %c0_22, %c0_23] : memref<1x512x30xf32, #tpu.memory_space<vmem>>, vector<1x512x30xf32>
    %21 = vector.shape_cast %20 : vector<1x512x30xf32> to vector<512x30xf32>
    %cst_24 = arith.constant dense<0.000000e+00> : vector<8x512xf32>
    %22 = tpu.matmul %3, %15, %cst_24 {dimension_numbers = #tpu.dot_dimension_numbers<[1], [0], [0], [1], [0, 0, 1, 1], [], []>} : vector<8x30xf32>, vector<30x512xf32>, vector<8x512xf32> -> vector<8x512xf32>
    %cst_25 = arith.constant 1.250000e-01 : f32
    %23 = vector.broadcast %cst_25 : f32 to vector<8x512xf32>
    %24 = arith.mulf %22, %23 : vector<8x512xf32>
    %cst_26 = arith.constant dense<0.000000e+00> : vector<8x512xf32>
    %25 = tpu.matmul %3, %17, %cst_26 {dimension_numbers = #tpu.dot_dimension_numbers<[1], [0], [0], [1], [0, 0, 1, 1], [], []>} : vector<8x30xf32>, vector<30x512xf32>, vector<8x512xf32> -> vector<8x512xf32>
    %cst_27 = arith.constant dense<0.000000e+00> : vector<8x512xf32>
    %26 = tpu.matmul %3, %19, %cst_27 {dimension_numbers = #tpu.dot_dimension_numbers<[1], [0], [0], [1], [0, 0, 1, 1], [], []>} : vector<8x30xf32>, vector<30x512xf32>, vector<8x512xf32> -> vector<8x512xf32>
    %27 = tpu.transpose %25, [1, 0] : vector<8x512xf32> -> vector<512x8xf32>
    %28 = vector.extract_strided_slice %24 {offsets = [0, 0], sizes = [8, 64], strides = [1, 1]} : vector<8x512xf32> to vector<8x64xf32>
    %29 = vector.extract_strided_slice %27 {offsets = [0, 0], sizes = [64, 8], strides = [1, 1]} : vector<512x8xf32> to vector<64x8xf32>
    %30 = vector.extract_strided_slice %26 {offsets = [0, 0], sizes = [8, 64], strides = [1, 1]} : vector<8x512xf32> to vector<8x64xf32>
    %cst_28 = arith.constant dense<0.000000e+00> : vector<8x8xf32>
    %31 = tpu.matmul %28, %29, %cst_28 {dimension_numbers = #tpu.dot_dimension_numbers<[1], [0], [0], [1], [0, 0, 1, 1], [], []>} : vector<8x64xf32>, vector<64x8xf32>, vector<8x8xf32> -> vector<8x8xf32>
    %cst_29 = arith.constant -1.000000e+04 : f32
    %32 = vector.broadcast %cst_29 : f32 to vector<8x8xf32>
    %33 = arith.select %9, %32, %31 : vector<8x8xi1>, vector<8x8xf32>
    %cst_30 = arith.constant dense<0xFF800000> : vector<8xf32>
    %34 = vector.multi_reduction <maximumf>, %33, %cst_30 [1] : vector<8x8xf32> to vector<8xf32>
    %35 = vector.shape_cast %34 : vector<8xf32> to vector<8x1xf32>
    %36 = vector.broadcast %35 : vector<8x1xf32> to vector<8x8xf32>
    %37 = arith.subf %33, %36 : vector<8x8xf32>
    %38 = math.exp %37 : vector<8x8xf32>
    %cst_31 = arith.constant dense<0.000000e+00> : vector<8xf32>
    %39 = vector.multi_reduction <add>, %38, %cst_31 [1] : vector<8x8xf32> to vector<8xf32>
    %40 = vector.shape_cast %39 : vector<8xf32> to vector<8x1xf32>
    %41 = tpu.reciprocal %40 {approx = true} : vector<8x1xf32> -> vector<8x1xf32>
    %42 = vector.broadcast %41 : vector<8x1xf32> to vector<8x8xf32>
    %43 = arith.mulf %38, %42 : vector<8x8xf32>
    %cst_32 = arith.constant dense<0.000000e+00> : vector<8x64xf32>
    %44 = tpu.matmul %43, %30, %cst_32 {dimension_numbers = #tpu.dot_dimension_numbers<[1], [0], [0], [1], [0, 0, 1, 1], [], []>} : vector<8x8xf32>, vector<8x64xf32>, vector<8x64xf32> -> vector<8x64xf32>
    %45 = vector.extract_strided_slice %24 {offsets = [0, 64], sizes = [8, 64], strides = [1, 1]} : vector<8x512xf32> to vector<8x64xf32>
    %46 = vector.extract_strided_slice %27 {offsets = [64, 0], sizes = [64, 8], strides = [1, 1]} : vector<512x8xf32> to vector<64x8xf32>
    %47 = vector.extract_strided_slice %26 {offsets = [0, 64], sizes = [8, 64], strides = [1, 1]} : vector<8x512xf32> to vector<8x64xf32>
    %cst_33 = arith.constant dense<0.000000e+00> : vector<8x8xf32>
    %48 = tpu.matmul %45, %46, %cst_33 {dimension_numbers = #tpu.dot_dimension_numbers<[1], [0], [0], [1], [0, 0, 1, 1], [], []>} : vector<8x64xf32>, vector<64x8xf32>, vector<8x8xf32> -> vector<8x8xf32>
    %cst_34 = arith.constant -1.000000e+04 : f32
    %49 = vector.broadcast %cst_34 : f32 to vector<8x8xf32>
    %50 = arith.select %9, %49, %48 : vector<8x8xi1>, vector<8x8xf32>
    %cst_35 = arith.constant dense<0xFF800000> : vector<8xf32>
    %51 = vector.multi_reduction <maximumf>, %50, %cst_35 [1] : vector<8x8xf32> to vector<8xf32>
    %52 = vector.shape_cast %51 : vector<8xf32> to vector<8x1xf32>
    %53 = vector.broadcast %52 : vector<8x1xf32> to vector<8x8xf32>
    %54 = arith.subf %50, %53 : vector<8x8xf32>
    %55 = math.exp %54 : vector<8x8xf32>
    %cst_36 = arith.constant dense<0.000000e+00> : vector<8xf32>
    %56 = vector.multi_reduction <add>, %55, %cst_36 [1] : vector<8x8xf32> to vector<8xf32>
    %57 = vector.shape_cast %56 : vector<8xf32> to vector<8x1xf32>
    %58 = tpu.reciprocal %57 {approx = true} : vector<8x1xf32> -> vector<8x1xf32>
    %59 = vector.broadcast %58 : vector<8x1xf32> to vector<8x8xf32>
    %60 = arith.mulf %55, %59 : vector<8x8xf32>
    %cst_37 = arith.constant dense<0.000000e+00> : vector<8x64xf32>
    %61 = tpu.matmul %60, %47, %cst_37 {dimension_numbers = #tpu.dot_dimension_numbers<[1], [0], [0], [1], [0, 0, 1, 1], [], []>} : vector<8x8xf32>, vector<8x64xf32>, vector<8x64xf32> -> vector<8x64xf32>
    %62 = vector.extract_strided_slice %24 {offsets = [0, 128], sizes = [8, 64], strides = [1, 1]} : vector<8x512xf32> to vector<8x64xf32>
    %63 = vector.extract_strided_slice %27 {offsets = [128, 0], sizes = [64, 8], strides = [1, 1]} : vector<512x8xf32> to vector<64x8xf32>
    %64 = vector.extract_strided_slice %26 {offsets = [0, 128], sizes = [8, 64], strides = [1, 1]} : vector<8x512xf32> to vector<8x64xf32>
    %cst_38 = arith.constant dense<0.000000e+00> : vector<8x8xf32>
    %65 = tpu.matmul %62, %63, %cst_38 {dimension_numbers = #tpu.dot_dimension_numbers<[1], [0], [0], [1], [0, 0, 1, 1], [], []>} : vector<8x64xf32>, vector<64x8xf32>, vector<8x8xf32> -> vector<8x8xf32>
    %cst_39 = arith.constant -1.000000e+04 : f32
    %66 = vector.broadcast %cst_39 : f32 to vector<8x8xf32>
    %67 = arith.select %9, %66, %65 : vector<8x8xi1>, vector<8x8xf32>
    %cst_40 = arith.constant dense<0xFF800000> : vector<8xf32>
    %68 = vector.multi_reduction <maximumf>, %67, %cst_40 [1] : vector<8x8xf32> to vector<8xf32>
    %69 = vector.shape_cast %68 : vector<8xf32> to vector<8x1xf32>
    %70 = vector.broadcast %69 : vector<8x1xf32> to vector<8x8xf32>
    %71 = arith.subf %67, %70 : vector<8x8xf32>
    %72 = math.exp %71 : vector<8x8xf32>
    %cst_41 = arith.constant dense<0.000000e+00> : vector<8xf32>
    %73 = vector.multi_reduction <add>, %72, %cst_41 [1] : vector<8x8xf32> to vector<8xf32>
    %74 = vector.shape_cast %73 : vector<8xf32> to vector<8x1xf32>
    %75 = tpu.reciprocal %74 {approx = true} : vector<8x1xf32> -> vector<8x1xf32>
    %76 = vector.broadcast %75 : vector<8x1xf32> to vector<8x8xf32>
    %77 = arith.mulf %72, %76 : vector<8x8xf32>
    %cst_42 = arith.constant dense<0.000000e+00> : vector<8x64xf32>
    %78 = tpu.matmul %77, %64, %cst_42 {dimension_numbers = #tpu.dot_dimension_numbers<[1], [0], [0], [1], [0, 0, 1, 1], [], []>} : vector<8x8xf32>, vector<8x64xf32>, vector<8x64xf32> -> vector<8x64xf32>
    %79 = vector.extract_strided_slice %24 {offsets = [0, 192], sizes = [8, 64], strides = [1, 1]} : vector<8x512xf32> to vector<8x64xf32>
    %80 = vector.extract_strided_slice %27 {offsets = [192, 0], sizes = [64, 8], strides = [1, 1]} : vector<512x8xf32> to vector<64x8xf32>
    %81 = vector.extract_strided_slice %26 {offsets = [0, 192], sizes = [8, 64], strides = [1, 1]} : vector<8x512xf32> to vector<8x64xf32>
    %cst_43 = arith.constant dense<0.000000e+00> : vector<8x8xf32>
    %82 = tpu.matmul %79, %80, %cst_43 {dimension_numbers = #tpu.dot_dimension_numbers<[1], [0], [0], [1], [0, 0, 1, 1], [], []>} : vector<8x64xf32>, vector<64x8xf32>, vector<8x8xf32> -> vector<8x8xf32>
    %cst_44 = arith.constant -1.000000e+04 : f32
    %83 = vector.broadcast %cst_44 : f32 to vector<8x8xf32>
    %84 = arith.select %9, %83, %82 : vector<8x8xi1>, vector<8x8xf32>
    %cst_45 = arith.constant dense<0xFF800000> : vector<8xf32>
    %85 = vector.multi_reduction <maximumf>, %84, %cst_45 [1] : vector<8x8xf32> to vector<8xf32>
    %86 = vector.shape_cast %85 : vector<8xf32> to vector<8x1xf32>
    %87 = vector.broadcast %86 : vector<8x1xf32> to vector<8x8xf32>
    %88 = arith.subf %84, %87 : vector<8x8xf32>
    %89 = math.exp %88 : vector<8x8xf32>
    %cst_46 = arith.constant dense<0.000000e+00> : vector<8xf32>
    %90 = vector.multi_reduction <add>, %89, %cst_46 [1] : vector<8x8xf32> to vector<8xf32>
    %91 = vector.shape_cast %90 : vector<8xf32> to vector<8x1xf32>
    %92 = tpu.reciprocal %91 {approx = true} : vector<8x1xf32> -> vector<8x1xf32>
    %93 = vector.broadcast %92 : vector<8x1xf32> to vector<8x8xf32>
    %94 = arith.mulf %89, %93 : vector<8x8xf32>
    %cst_47 = arith.constant dense<0.000000e+00> : vector<8x64xf32>
    %95 = tpu.matmul %94, %81, %cst_47 {dimension_numbers = #tpu.dot_dimension_numbers<[1], [0], [0], [1], [0, 0, 1, 1], [], []>} : vector<8x8xf32>, vector<8x64xf32>, vector<8x64xf32> -> vector<8x64xf32>
    %96 = vector.extract_strided_slice %24 {offsets = [0, 256], sizes = [8, 64], strides = [1, 1]} : vector<8x512xf32> to vector<8x64xf32>
    %97 = vector.extract_strided_slice %27 {offsets = [256, 0], sizes = [64, 8], strides = [1, 1]} : vector<512x8xf32> to vector<64x8xf32>
    %98 = vector.extract_strided_slice %26 {offsets = [0, 256], sizes = [8, 64], strides = [1, 1]} : vector<8x512xf32> to vector<8x64xf32>
    %cst_48 = arith.constant dense<0.000000e+00> : vector<8x8xf32>
    %99 = tpu.matmul %96, %97, %cst_48 {dimension_numbers = #tpu.dot_dimension_numbers<[1], [0], [0], [1], [0, 0, 1, 1], [], []>} : vector<8x64xf32>, vector<64x8xf32>, vector<8x8xf32> -> vector<8x8xf32>
    %cst_49 = arith.constant -1.000000e+04 : f32
    %100 = vector.broadcast %cst_49 : f32 to vector<8x8xf32>
    %101 = arith.select %9, %100, %99 : vector<8x8xi1>, vector<8x8xf32>
    %cst_50 = arith.constant dense<0xFF800000> : vector<8xf32>
    %102 = vector.multi_reduction <maximumf>, %101, %cst_50 [1] : vector<8x8xf32> to vector<8xf32>
    %103 = vector.shape_cast %102 : vector<8xf32> to vector<8x1xf32>
    %104 = vector.broadcast %103 : vector<8x1xf32> to vector<8x8xf32>
    %105 = arith.subf %101, %104 : vector<8x8xf32>
    %106 = math.exp %105 : vector<8x8xf32>
    %cst_51 = arith.constant dense<0.000000e+00> : vector<8xf32>
    %107 = vector.multi_reduction <add>, %106, %cst_51 [1] : vector<8x8xf32> to vector<8xf32>
    %108 = vector.shape_cast %107 : vector<8xf32> to vector<8x1xf32>
    %109 = tpu.reciprocal %108 {approx = true} : vector<8x1xf32> -> vector<8x1xf32>
    %110 = vector.broadcast %109 : vector<8x1xf32> to vector<8x8xf32>
    %111 = arith.mulf %106, %110 : vector<8x8xf32>
    %cst_52 = arith.constant dense<0.000000e+00> : vector<8x64xf32>
    %112 = tpu.matmul %111, %98, %cst_52 {dimension_numbers = #tpu.dot_dimension_numbers<[1], [0], [0], [1], [0, 0, 1, 1], [], []>} : vector<8x8xf32>, vector<8x64xf32>, vector<8x64xf32> -> vector<8x64xf32>
    %113 = vector.extract_strided_slice %24 {offsets = [0, 320], sizes = [8, 64], strides = [1, 1]} : vector<8x512xf32> to vector<8x64xf32>
    %114 = vector.extract_strided_slice %27 {offsets = [320, 0], sizes = [64, 8], strides = [1, 1]} : vector<512x8xf32> to vector<64x8xf32>
    %115 = vector.extract_strided_slice %26 {offsets = [0, 320], sizes = [8, 64], strides = [1, 1]} : vector<8x512xf32> to vector<8x64xf32>
    %cst_53 = arith.constant dense<0.000000e+00> : vector<8x8xf32>
    %116 = tpu.matmul %113, %114, %cst_53 {dimension_numbers = #tpu.dot_dimension_numbers<[1], [0], [0], [1], [0, 0, 1, 1], [], []>} : vector<8x64xf32>, vector<64x8xf32>, vector<8x8xf32> -> vector<8x8xf32>
    %cst_54 = arith.constant -1.000000e+04 : f32
    %117 = vector.broadcast %cst_54 : f32 to vector<8x8xf32>
    %118 = arith.select %9, %117, %116 : vector<8x8xi1>, vector<8x8xf32>
    %cst_55 = arith.constant dense<0xFF800000> : vector<8xf32>
    %119 = vector.multi_reduction <maximumf>, %118, %cst_55 [1] : vector<8x8xf32> to vector<8xf32>
    %120 = vector.shape_cast %119 : vector<8xf32> to vector<8x1xf32>
    %121 = vector.broadcast %120 : vector<8x1xf32> to vector<8x8xf32>
    %122 = arith.subf %118, %121 : vector<8x8xf32>
    %123 = math.exp %122 : vector<8x8xf32>
    %cst_56 = arith.constant dense<0.000000e+00> : vector<8xf32>
    %124 = vector.multi_reduction <add>, %123, %cst_56 [1] : vector<8x8xf32> to vector<8xf32>
    %125 = vector.shape_cast %124 : vector<8xf32> to vector<8x1xf32>
    %126 = tpu.reciprocal %125 {approx = true} : vector<8x1xf32> -> vector<8x1xf32>
    %127 = vector.broadcast %126 : vector<8x1xf32> to vector<8x8xf32>
    %128 = arith.mulf %123, %127 : vector<8x8xf32>
    %cst_57 = arith.constant dense<0.000000e+00> : vector<8x64xf32>
    %129 = tpu.matmul %128, %115, %cst_57 {dimension_numbers = #tpu.dot_dimension_numbers<[1], [0], [0], [1], [0, 0, 1, 1], [], []>} : vector<8x8xf32>, vector<8x64xf32>, vector<8x64xf32> -> vector<8x64xf32>
    %130 = vector.extract_strided_slice %24 {offsets = [0, 384], sizes = [8, 64], strides = [1, 1]} : vector<8x512xf32> to vector<8x64xf32>
    %131 = vector.extract_strided_slice %27 {offsets = [384, 0], sizes = [64, 8], strides = [1, 1]} : vector<512x8xf32> to vector<64x8xf32>
    %132 = vector.extract_strided_slice %26 {offsets = [0, 384], sizes = [8, 64], strides = [1, 1]} : vector<8x512xf32> to vector<8x64xf32>
    %cst_58 = arith.constant dense<0.000000e+00> : vector<8x8xf32>
    %133 = tpu.matmul %130, %131, %cst_58 {dimension_numbers = #tpu.dot_dimension_numbers<[1], [0], [0], [1], [0, 0, 1, 1], [], []>} : vector<8x64xf32>, vector<64x8xf32>, vector<8x8xf32> -> vector<8x8xf32>
    %cst_59 = arith.constant -1.000000e+04 : f32
    %134 = vector.broadcast %cst_59 : f32 to vector<8x8xf32>
    %135 = arith.select %9, %134, %133 : vector<8x8xi1>, vector<8x8xf32>
    %cst_60 = arith.constant dense<0xFF800000> : vector<8xf32>
    %136 = vector.multi_reduction <maximumf>, %135, %cst_60 [1] : vector<8x8xf32> to vector<8xf32>
    %137 = vector.shape_cast %136 : vector<8xf32> to vector<8x1xf32>
    %138 = vector.broadcast %137 : vector<8x1xf32> to vector<8x8xf32>
    %139 = arith.subf %135, %138 : vector<8x8xf32>
    %140 = math.exp %139 : vector<8x8xf32>
    %cst_61 = arith.constant dense<0.000000e+00> : vector<8xf32>
    %141 = vector.multi_reduction <add>, %140, %cst_61 [1] : vector<8x8xf32> to vector<8xf32>
    %142 = vector.shape_cast %141 : vector<8xf32> to vector<8x1xf32>
    %143 = tpu.reciprocal %142 {approx = true} : vector<8x1xf32> -> vector<8x1xf32>
    %144 = vector.broadcast %143 : vector<8x1xf32> to vector<8x8xf32>
    %145 = arith.mulf %140, %144 : vector<8x8xf32>
    %cst_62 = arith.constant dense<0.000000e+00> : vector<8x64xf32>
    %146 = tpu.matmul %145, %132, %cst_62 {dimension_numbers = #tpu.dot_dimension_numbers<[1], [0], [0], [1], [0, 0, 1, 1], [], []>} : vector<8x8xf32>, vector<8x64xf32>, vector<8x64xf32> -> vector<8x64xf32>
    %147 = vector.extract_strided_slice %24 {offsets = [0, 448], sizes = [8, 64], strides = [1, 1]} : vector<8x512xf32> to vector<8x64xf32>
    %148 = vector.extract_strided_slice %27 {offsets = [448, 0], sizes = [64, 8], strides = [1, 1]} : vector<512x8xf32> to vector<64x8xf32>
    %149 = vector.extract_strided_slice %26 {offsets = [0, 448], sizes = [8, 64], strides = [1, 1]} : vector<8x512xf32> to vector<8x64xf32>
    %cst_63 = arith.constant dense<0.000000e+00> : vector<8x8xf32>
    %150 = tpu.matmul %147, %148, %cst_63 {dimension_numbers = #tpu.dot_dimension_numbers<[1], [0], [0], [1], [0, 0, 1, 1], [], []>} : vector<8x64xf32>, vector<64x8xf32>, vector<8x8xf32> -> vector<8x8xf32>
    %cst_64 = arith.constant -1.000000e+04 : f32
    %151 = vector.broadcast %cst_64 : f32 to vector<8x8xf32>
    %152 = arith.select %9, %151, %150 : vector<8x8xi1>, vector<8x8xf32>
    %cst_65 = arith.constant dense<0xFF800000> : vector<8xf32>
    %153 = vector.multi_reduction <maximumf>, %152, %cst_65 [1] : vector<8x8xf32> to vector<8xf32>
    %154 = vector.shape_cast %153 : vector<8xf32> to vector<8x1xf32>
    %155 = vector.broadcast %154 : vector<8x1xf32> to vector<8x8xf32>
    %156 = arith.subf %152, %155 : vector<8x8xf32>
    %157 = math.exp %156 : vector<8x8xf32>
    %cst_66 = arith.constant dense<0.000000e+00> : vector<8xf32>
    %158 = vector.multi_reduction <add>, %157, %cst_66 [1] : vector<8x8xf32> to vector<8xf32>
    %159 = vector.shape_cast %158 : vector<8xf32> to vector<8x1xf32>
    %160 = tpu.reciprocal %159 {approx = true} : vector<8x1xf32> -> vector<8x1xf32>
    %161 = vector.broadcast %160 : vector<8x1xf32> to vector<8x8xf32>
    %162 = arith.mulf %157, %161 : vector<8x8xf32>
    %cst_67 = arith.constant dense<0.000000e+00> : vector<8x64xf32>
    %163 = tpu.matmul %162, %149, %cst_67 {dimension_numbers = #tpu.dot_dimension_numbers<[1], [0], [0], [1], [0, 0, 1, 1], [], []>} : vector<8x8xf32>, vector<8x64xf32>, vector<8x64xf32> -> vector<8x64xf32>
    %164 = tpu.concatenate %43, %60, %77, %94, %111, %128, %145, %162 in 1 : vector<8x8xf32>, vector<8x8xf32>, vector<8x8xf32>, vector<8x8xf32>, vector<8x8xf32>, vector<8x8xf32>, vector<8x8xf32>, vector<8x8xf32> -> vector<8x64xf32>
    %c0_68 = arith.constant 0 : index
    %c0_69 = arith.constant 0 : index
    %c0_70 = arith.constant 0 : index
    %c0_71 = arith.constant 0 : index
    %165 = vector.load %arg17[%c0_68, %c0_69, %c0_70, %c0_71] : memref<1x1x8x64xf32, #tpu.memory_space<vmem>>, vector<1x1x8x64xf32>
    %166 = vector.shape_cast %165 : vector<1x1x8x64xf32> to vector<8x64xf32>
    %167 = vector.shape_cast %164 : vector<8x64xf32> to vector<1x1x8x64xf32>
    tpu.vector_store %arg17[%c0_68, %c0_69, %c0_70, %c0_71], %167 {strides = array<i32>} : memref<1x1x8x64xf32, #tpu.memory_space<vmem>>, vector<1x1x8x64xf32>,
    %168 = tpu.concatenate %44, %61, %78, %95, %112, %129, %146, %163 in 1 : vector<8x64xf32>, vector<8x64xf32>, vector<8x64xf32>, vector<8x64xf32>, vector<8x64xf32>, vector<8x64xf32>, vector<8x64xf32>, vector<8x64xf32> -> vector<8x512xf32>
    %cst_72 = arith.constant dense<0.000000e+00> : vector<8x30xf32>
    %169 = tpu.matmul %168, %21, %cst_72 {dimension_numbers = #tpu.dot_dimension_numbers<[1], [0], [0], [1], [0, 0, 1, 1], [], []>} : vector<8x512xf32>, vector<512x30xf32>, vector<8x30xf32> -> vector<8x30xf32>
    %170 = arith.addf %169, %3 : vector<8x30xf32>
    %cst_73 = arith.constant dense<0.000000e+00> : vector<8xf32>
    %171 = vector.multi_reduction <add>, %170, %cst_73 [1] : vector<8x30xf32> to vector<8xf32>
    %172 = vector.shape_cast %171 : vector<8xf32> to vector<8x1xf32>
    %cst_74 = arith.constant 3.000000e+01 : f32
    %173 = vector.broadcast %cst_74 : f32 to vector<8x1xf32>
    %174 = arith.divf %172, %173 : vector<8x1xf32>
    %175 = vector.broadcast %174 : vector<8x1xf32> to vector<8x30xf32>
    %176 = arith.subf %170, %175 : vector<8x30xf32>
    %177 = vector.broadcast %174 : vector<8x1xf32> to vector<8x30xf32>
    %178 = arith.subf %170, %177 : vector<8x30xf32>
    %179 = arith.mulf %176, %178 : vector<8x30xf32>
    %cst_75 = arith.constant dense<0.000000e+00> : vector<8xf32>
    %180 = vector.multi_reduction <add>, %179, %cst_75 [1] : vector<8x30xf32> to vector<8xf32>
    %181 = vector.shape_cast %180 : vector<8xf32> to vector<8x1xf32>
    %cst_76 = arith.constant 3.000000e+01 : f32
    %182 = vector.broadcast %cst_76 : f32 to vector<8x1xf32>
    %183 = arith.divf %181, %182 : vector<8x1xf32>
    %184 = vector.broadcast %174 : vector<8x1xf32> to vector<8x30xf32>
    %185 = arith.subf %170, %184 : vector<8x30xf32>
    %cst_77 = arith.constant 9.99999974E-6 : f32
    %186 = vector.broadcast %cst_77 : f32 to vector<8x1xf32>
    %187 = arith.addf %183, %186 : vector<8x1xf32>
    %188 = math.rsqrt %187 : vector<8x1xf32>
    %189 = vector.broadcast %188 : vector<8x1xf32> to vector<8x30xf32>
    %190 = arith.mulf %185, %189 : vector<8x30xf32>
    %c0_78 = arith.constant 0 : index
    %c0_79 = arith.constant 0 : index
    %c0_80 = arith.constant 0 : index
    %191 = vector.load %arg10[%c0_78, %c0_79, %c0_80] : memref<1x30x512xf32, #tpu.memory_space<vmem>>, vector<1x30x512xf32>
    %192 = vector.shape_cast %191 : vector<1x30x512xf32> to vector<30x512xf32>
    %c0_81 = arith.constant 0 : index
    %c0_82 = arith.constant 0 : index
    %c0_83 = arith.constant 0 : index
    %193 = vector.load %arg11[%c0_81, %c0_82, %c0_83] : memref<1x30x512xf32, #tpu.memory_space<vmem>>, vector<1x30x512xf32>
    %194 = vector.shape_cast %193 : vector<1x30x512xf32> to vector<30x512xf32>
    %c0_84 = arith.constant 0 : index
    %c0_85 = arith.constant 0 : index
    %c0_86 = arith.constant 0 : index
    %195 = vector.load %arg12[%c0_84, %c0_85, %c0_86] : memref<1x30x512xf32, #tpu.memory_space<vmem>>, vector<1x30x512xf32>
    %196 = vector.shape_cast %195 : vector<1x30x512xf32> to vector<30x512xf32>
    %c0_87 = arith.constant 0 : index
    %c0_88 = arith.constant 0 : index
    %c0_89 = arith.constant 0 : index
    %197 = vector.load %arg13[%c0_87, %c0_88, %c0_89] : memref<1x512x30xf32, #tpu.memory_space<vmem>>, vector<1x512x30xf32>
    %198 = vector.shape_cast %197 : vector<1x512x30xf32> to vector<512x30xf32>
    %cst_90 = arith.constant dense<0.000000e+00> : vector<8x512xf32>
    %199 = tpu.matmul %190, %192, %cst_90 {dimension_numbers = #tpu.dot_dimension_numbers<[1], [0], [0], [1], [0, 0, 1, 1], [], []>} : vector<8x30xf32>, vector<30x512xf32>, vector<8x512xf32> -> vector<8x512xf32>
    %cst_91 = arith.constant 1.250000e-01 : f32
    %200 = vector.broadcast %cst_91 : f32 to vector<8x512xf32>
    %201 = arith.mulf %199, %200 : vector<8x512xf32>
    %cst_92 = arith.constant dense<0.000000e+00> : vector<10x512xf32>
    %202 = tpu.matmul %5, %194, %cst_92 {dimension_numbers = #tpu.dot_dimension_numbers<[1], [0], [0], [1], [0, 0, 1, 1], [], []>} : vector<10x30xf32>, vector<30x512xf32>, vector<10x512xf32> -> vector<10x512xf32>
    %cst_93 = arith.constant dense<0.000000e+00> : vector<10x512xf32>
    %203 = tpu.matmul %5, %196, %cst_93 {dimension_numbers = #tpu.dot_dimension_numbers<[1], [0], [0], [1], [0, 0, 1, 1], [], []>} : vector<10x30xf32>, vector<30x512xf32>, vector<10x512xf32> -> vector<10x512xf32>
    %204 = tpu.transpose %202, [1, 0] : vector<10x512xf32> -> vector<512x10xf32>
    %205 = vector.extract_strided_slice %201 {offsets = [0, 0], sizes = [8, 64], strides = [1, 1]} : vector<8x512xf32> to vector<8x64xf32>
    %206 = vector.extract_strided_slice %204 {offsets = [0, 0], sizes = [64, 10], strides = [1, 1]} : vector<512x10xf32> to vector<64x10xf32>
    %207 = vector.extract_strided_slice %203 {offsets = [0, 0], sizes = [10, 64], strides = [1, 1]} : vector<10x512xf32> to vector<10x64xf32>
    %cst_94 = arith.constant dense<0.000000e+00> : vector<8x10xf32>
    %208 = tpu.matmul %205, %206, %cst_94 {dimension_numbers = #tpu.dot_dimension_numbers<[1], [0], [0], [1], [0, 0, 1, 1], [], []>} : vector<8x64xf32>, vector<64x10xf32>, vector<8x10xf32> -> vector<8x10xf32>
    %cst_95 = arith.constant -1.000000e+04 : f32
    %209 = vector.broadcast %cst_95 : f32 to vector<8x10xf32>
    %210 = arith.select %13, %209, %208 : vector<8x10xi1>, vector<8x10xf32>
    %cst_96 = arith.constant dense<0xFF800000> : vector<8xf32>
    %211 = vector.multi_reduction <maximumf>, %210, %cst_96 [1] : vector<8x10xf32> to vector<8xf32>
    %212 = vector.shape_cast %211 : vector<8xf32> to vector<8x1xf32>
    %213 = vector.broadcast %212 : vector<8x1xf32> to vector<8x10xf32>
    %214 = arith.subf %210, %213 : vector<8x10xf32>
    %215 = math.exp %214 : vector<8x10xf32>
    %cst_97 = arith.constant dense<0.000000e+00> : vector<8xf32>
    %216 = vector.multi_reduction <add>, %215, %cst_97 [1] : vector<8x10xf32> to vector<8xf32>
    %217 = vector.shape_cast %216 : vector<8xf32> to vector<8x1xf32>
    %218 = tpu.reciprocal %217 {approx = true} : vector<8x1xf32> -> vector<8x1xf32>
    %219 = vector.broadcast %218 : vector<8x1xf32> to vector<8x10xf32>
    %220 = arith.mulf %215, %219 : vector<8x10xf32>
    %cst_98 = arith.constant dense<0.000000e+00> : vector<8x64xf32>
    %221 = tpu.matmul %220, %207, %cst_98 {dimension_numbers = #tpu.dot_dimension_numbers<[1], [0], [0], [1], [0, 0, 1, 1], [], []>} : vector<8x10xf32>, vector<10x64xf32>, vector<8x64xf32> -> vector<8x64xf32>
    %222 = vector.extract_strided_slice %201 {offsets = [0, 64], sizes = [8, 64], strides = [1, 1]} : vector<8x512xf32> to vector<8x64xf32>
    %223 = vector.extract_strided_slice %204 {offsets = [64, 0], sizes = [64, 10], strides = [1, 1]} : vector<512x10xf32> to vector<64x10xf32>
    %224 = vector.extract_strided_slice %203 {offsets = [0, 64], sizes = [10, 64], strides = [1, 1]} : vector<10x512xf32> to vector<10x64xf32>
    %cst_99 = arith.constant dense<0.000000e+00> : vector<8x10xf32>
    %225 = tpu.matmul %222, %223, %cst_99 {dimension_numbers = #tpu.dot_dimension_numbers<[1], [0], [0], [1], [0, 0, 1, 1], [], []>} : vector<8x64xf32>, vector<64x10xf32>, vector<8x10xf32> -> vector<8x10xf32>
    %cst_100 = arith.constant -1.000000e+04 : f32
    %226 = vector.broadcast %cst_100 : f32 to vector<8x10xf32>
    %227 = arith.select %13, %226, %225 : vector<8x10xi1>, vector<8x10xf32>
    %cst_101 = arith.constant dense<0xFF800000> : vector<8xf32>
    %228 = vector.multi_reduction <maximumf>, %227, %cst_101 [1] : vector<8x10xf32> to vector<8xf32>
    %229 = vector.shape_cast %228 : vector<8xf32> to vector<8x1xf32>
    %230 = vector.broadcast %229 : vector<8x1xf32> to vector<8x10xf32>
    %231 = arith.subf %227, %230 : vector<8x10xf32>
    %232 = math.exp %231 : vector<8x10xf32>
    %cst_102 = arith.constant dense<0.000000e+00> : vector<8xf32>
    %233 = vector.multi_reduction <add>, %232, %cst_102 [1] : vector<8x10xf32> to vector<8xf32>
    %234 = vector.shape_cast %233 : vector<8xf32> to vector<8x1xf32>
    %235 = tpu.reciprocal %234 {approx = true} : vector<8x1xf32> -> vector<8x1xf32>
    %236 = vector.broadcast %235 : vector<8x1xf32> to vector<8x10xf32>
    %237 = arith.mulf %232, %236 : vector<8x10xf32>
    %cst_103 = arith.constant dense<0.000000e+00> : vector<8x64xf32>
    %238 = tpu.matmul %237, %224, %cst_103 {dimension_numbers = #tpu.dot_dimension_numbers<[1], [0], [0], [1], [0, 0, 1, 1], [], []>} : vector<8x10xf32>, vector<10x64xf32>, vector<8x64xf32> -> vector<8x64xf32>
    %239 = vector.extract_strided_slice %201 {offsets = [0, 128], sizes = [8, 64], strides = [1, 1]} : vector<8x512xf32> to vector<8x64xf32>
    %240 = vector.extract_strided_slice %204 {offsets = [128, 0], sizes = [64, 10], strides = [1, 1]} : vector<512x10xf32> to vector<64x10xf32>
    %241 = vector.extract_strided_slice %203 {offsets = [0, 128], sizes = [10, 64], strides = [1, 1]} : vector<10x512xf32> to vector<10x64xf32>
    %cst_104 = arith.constant dense<0.000000e+00> : vector<8x10xf32>
    %242 = tpu.matmul %239, %240, %cst_104 {dimension_numbers = #tpu.dot_dimension_numbers<[1], [0], [0], [1], [0, 0, 1, 1], [], []>} : vector<8x64xf32>, vector<64x10xf32>, vector<8x10xf32> -> vector<8x10xf32>
    %cst_105 = arith.constant -1.000000e+04 : f32
    %243 = vector.broadcast %cst_105 : f32 to vector<8x10xf32>
    %244 = arith.select %13, %243, %242 : vector<8x10xi1>, vector<8x10xf32>
    %cst_106 = arith.constant dense<0xFF800000> : vector<8xf32>
    %245 = vector.multi_reduction <maximumf>, %244, %cst_106 [1] : vector<8x10xf32> to vector<8xf32>
    %246 = vector.shape_cast %245 : vector<8xf32> to vector<8x1xf32>
    %247 = vector.broadcast %246 : vector<8x1xf32> to vector<8x10xf32>
    %248 = arith.subf %244, %247 : vector<8x10xf32>
    %249 = math.exp %248 : vector<8x10xf32>
    %cst_107 = arith.constant dense<0.000000e+00> : vector<8xf32>
    %250 = vector.multi_reduction <add>, %249, %cst_107 [1] : vector<8x10xf32> to vector<8xf32>
    %251 = vector.shape_cast %250 : vector<8xf32> to vector<8x1xf32>
    %252 = tpu.reciprocal %251 {approx = true} : vector<8x1xf32> -> vector<8x1xf32>
    %253 = vector.broadcast %252 : vector<8x1xf32> to vector<8x10xf32>
    %254 = arith.mulf %249, %253 : vector<8x10xf32>
    %cst_108 = arith.constant dense<0.000000e+00> : vector<8x64xf32>
    %255 = tpu.matmul %254, %241, %cst_108 {dimension_numbers = #tpu.dot_dimension_numbers<[1], [0], [0], [1], [0, 0, 1, 1], [], []>} : vector<8x10xf32>, vector<10x64xf32>, vector<8x64xf32> -> vector<8x64xf32>
    %256 = vector.extract_strided_slice %201 {offsets = [0, 192], sizes = [8, 64], strides = [1, 1]} : vector<8x512xf32> to vector<8x64xf32>
    %257 = vector.extract_strided_slice %204 {offsets = [192, 0], sizes = [64, 10], strides = [1, 1]} : vector<512x10xf32> to vector<64x10xf32>
    %258 = vector.extract_strided_slice %203 {offsets = [0, 192], sizes = [10, 64], strides = [1, 1]} : vector<10x512xf32> to vector<10x64xf32>
    %cst_109 = arith.constant dense<0.000000e+00> : vector<8x10xf32>
    %259 = tpu.matmul %256, %257, %cst_109 {dimension_numbers = #tpu.dot_dimension_numbers<[1], [0], [0], [1], [0, 0, 1, 1], [], []>} : vector<8x64xf32>, vector<64x10xf32>, vector<8x10xf32> -> vector<8x10xf32>
    %cst_110 = arith.constant -1.000000e+04 : f32
    %260 = vector.broadcast %cst_110 : f32 to vector<8x10xf32>
    %261 = arith.select %13, %260, %259 : vector<8x10xi1>, vector<8x10xf32>
    %cst_111 = arith.constant dense<0xFF800000> : vector<8xf32>
    %262 = vector.multi_reduction <maximumf>, %261, %cst_111 [1] : vector<8x10xf32> to vector<8xf32>
    %263 = vector.shape_cast %262 : vector<8xf32> to vector<8x1xf32>
    %264 = vector.broadcast %263 : vector<8x1xf32> to vector<8x10xf32>
    %265 = arith.subf %261, %264 : vector<8x10xf32>
    %266 = math.exp %265 : vector<8x10xf32>
    %cst_112 = arith.constant dense<0.000000e+00> : vector<8xf32>
    %267 = vector.multi_reduction <add>, %266, %cst_112 [1] : vector<8x10xf32> to vector<8xf32>
    %268 = vector.shape_cast %267 : vector<8xf32> to vector<8x1xf32>
    %269 = tpu.reciprocal %268 {approx = true} : vector<8x1xf32> -> vector<8x1xf32>
    %270 = vector.broadcast %269 : vector<8x1xf32> to vector<8x10xf32>
    %271 = arith.mulf %266, %270 : vector<8x10xf32>
    %cst_113 = arith.constant dense<0.000000e+00> : vector<8x64xf32>
    %272 = tpu.matmul %271, %258, %cst_113 {dimension_numbers = #tpu.dot_dimension_numbers<[1], [0], [0], [1], [0, 0, 1, 1], [], []>} : vector<8x10xf32>, vector<10x64xf32>, vector<8x64xf32> -> vector<8x64xf32>
    %273 = vector.extract_strided_slice %201 {offsets = [0, 256], sizes = [8, 64], strides = [1, 1]} : vector<8x512xf32> to vector<8x64xf32>
    %274 = vector.extract_strided_slice %204 {offsets = [256, 0], sizes = [64, 10], strides = [1, 1]} : vector<512x10xf32> to vector<64x10xf32>
    %275 = vector.extract_strided_slice %203 {offsets = [0, 256], sizes = [10, 64], strides = [1, 1]} : vector<10x512xf32> to vector<10x64xf32>
    %cst_114 = arith.constant dense<0.000000e+00> : vector<8x10xf32>
    %276 = tpu.matmul %273, %274, %cst_114 {dimension_numbers = #tpu.dot_dimension_numbers<[1], [0], [0], [1], [0, 0, 1, 1], [], []>} : vector<8x64xf32>, vector<64x10xf32>, vector<8x10xf32> -> vector<8x10xf32>
    %cst_115 = arith.constant -1.000000e+04 : f32
    %277 = vector.broadcast %cst_115 : f32 to vector<8x10xf32>
    %278 = arith.select %13, %277, %276 : vector<8x10xi1>, vector<8x10xf32>
    %cst_116 = arith.constant dense<0xFF800000> : vector<8xf32>
    %279 = vector.multi_reduction <maximumf>, %278, %cst_116 [1] : vector<8x10xf32> to vector<8xf32>
    %280 = vector.shape_cast %279 : vector<8xf32> to vector<8x1xf32>
    %281 = vector.broadcast %280 : vector<8x1xf32> to vector<8x10xf32>
    %282 = arith.subf %278, %281 : vector<8x10xf32>
    %283 = math.exp %282 : vector<8x10xf32>
    %cst_117 = arith.constant dense<0.000000e+00> : vector<8xf32>
    %284 = vector.multi_reduction <add>, %283, %cst_117 [1] : vector<8x10xf32> to vector<8xf32>
    %285 = vector.shape_cast %284 : vector<8xf32> to vector<8x1xf32>
    %286 = tpu.reciprocal %285 {approx = true} : vector<8x1xf32> -> vector<8x1xf32>
    %287 = vector.broadcast %286 : vector<8x1xf32> to vector<8x10xf32>
    %288 = arith.mulf %283, %287 : vector<8x10xf32>
    %cst_118 = arith.constant dense<0.000000e+00> : vector<8x64xf32>
    %289 = tpu.matmul %288, %275, %cst_118 {dimension_numbers = #tpu.dot_dimension_numbers<[1], [0], [0], [1], [0, 0, 1, 1], [], []>} : vector<8x10xf32>, vector<10x64xf32>, vector<8x64xf32> -> vector<8x64xf32>
    %290 = vector.extract_strided_slice %201 {offsets = [0, 320], sizes = [8, 64], strides = [1, 1]} : vector<8x512xf32> to vector<8x64xf32>
    %291 = vector.extract_strided_slice %204 {offsets = [320, 0], sizes = [64, 10], strides = [1, 1]} : vector<512x10xf32> to vector<64x10xf32>
    %292 = vector.extract_strided_slice %203 {offsets = [0, 320], sizes = [10, 64], strides = [1, 1]} : vector<10x512xf32> to vector<10x64xf32>
    %cst_119 = arith.constant dense<0.000000e+00> : vector<8x10xf32>
    %293 = tpu.matmul %290, %291, %cst_119 {dimension_numbers = #tpu.dot_dimension_numbers<[1], [0], [0], [1], [0, 0, 1, 1], [], []>} : vector<8x64xf32>, vector<64x10xf32>, vector<8x10xf32> -> vector<8x10xf32>
    %cst_120 = arith.constant -1.000000e+04 : f32
    %294 = vector.broadcast %cst_120 : f32 to vector<8x10xf32>
    %295 = arith.select %13, %294, %293 : vector<8x10xi1>, vector<8x10xf32>
    %cst_121 = arith.constant dense<0xFF800000> : vector<8xf32>
    %296 = vector.multi_reduction <maximumf>, %295, %cst_121 [1] : vector<8x10xf32> to vector<8xf32>
    %297 = vector.shape_cast %296 : vector<8xf32> to vector<8x1xf32>
    %298 = vector.broadcast %297 : vector<8x1xf32> to vector<8x10xf32>
    %299 = arith.subf %295, %298 : vector<8x10xf32>
    %300 = math.exp %299 : vector<8x10xf32>
    %cst_122 = arith.constant dense<0.000000e+00> : vector<8xf32>
    %301 = vector.multi_reduction <add>, %300, %cst_122 [1] : vector<8x10xf32> to vector<8xf32>
    %302 = vector.shape_cast %301 : vector<8xf32> to vector<8x1xf32>
    %303 = tpu.reciprocal %302 {approx = true} : vector<8x1xf32> -> vector<8x1xf32>
    %304 = vector.broadcast %303 : vector<8x1xf32> to vector<8x10xf32>
    %305 = arith.mulf %300, %304 : vector<8x10xf32>
    %cst_123 = arith.constant dense<0.000000e+00> : vector<8x64xf32>
    %306 = tpu.matmul %305, %292, %cst_123 {dimension_numbers = #tpu.dot_dimension_numbers<[1], [0], [0], [1], [0, 0, 1, 1], [], []>} : vector<8x10xf32>, vector<10x64xf32>, vector<8x64xf32> -> vector<8x64xf32>
    %307 = vector.extract_strided_slice %201 {offsets = [0, 384], sizes = [8, 64], strides = [1, 1]} : vector<8x512xf32> to vector<8x64xf32>
    %308 = vector.extract_strided_slice %204 {offsets = [384, 0], sizes = [64, 10], strides = [1, 1]} : vector<512x10xf32> to vector<64x10xf32>
    %309 = vector.extract_strided_slice %203 {offsets = [0, 384], sizes = [10, 64], strides = [1, 1]} : vector<10x512xf32> to vector<10x64xf32>
    %cst_124 = arith.constant dense<0.000000e+00> : vector<8x10xf32>
    %310 = tpu.matmul %307, %308, %cst_124 {dimension_numbers = #tpu.dot_dimension_numbers<[1], [0], [0], [1], [0, 0, 1, 1], [], []>} : vector<8x64xf32>, vector<64x10xf32>, vector<8x10xf32> -> vector<8x10xf32>
    %cst_125 = arith.constant -1.000000e+04 : f32
    %311 = vector.broadcast %cst_125 : f32 to vector<8x10xf32>
    %312 = arith.select %13, %311, %310 : vector<8x10xi1>, vector<8x10xf32>
    %cst_126 = arith.constant dense<0xFF800000> : vector<8xf32>
    %313 = vector.multi_reduction <maximumf>, %312, %cst_126 [1] : vector<8x10xf32> to vector<8xf32>
    %314 = vector.shape_cast %313 : vector<8xf32> to vector<8x1xf32>
    %315 = vector.broadcast %314 : vector<8x1xf32> to vector<8x10xf32>
    %316 = arith.subf %312, %315 : vector<8x10xf32>
    %317 = math.exp %316 : vector<8x10xf32>
    %cst_127 = arith.constant dense<0.000000e+00> : vector<8xf32>
    %318 = vector.multi_reduction <add>, %317, %cst_127 [1] : vector<8x10xf32> to vector<8xf32>
    %319 = vector.shape_cast %318 : vector<8xf32> to vector<8x1xf32>
    %320 = tpu.reciprocal %319 {approx = true} : vector<8x1xf32> -> vector<8x1xf32>
    %321 = vector.broadcast %320 : vector<8x1xf32> to vector<8x10xf32>
    %322 = arith.mulf %317, %321 : vector<8x10xf32>
    %cst_128 = arith.constant dense<0.000000e+00> : vector<8x64xf32>
    %323 = tpu.matmul %322, %309, %cst_128 {dimension_numbers = #tpu.dot_dimension_numbers<[1], [0], [0], [1], [0, 0, 1, 1], [], []>} : vector<8x10xf32>, vector<10x64xf32>, vector<8x64xf32> -> vector<8x64xf32>
    %324 = vector.extract_strided_slice %201 {offsets = [0, 448], sizes = [8, 64], strides = [1, 1]} : vector<8x512xf32> to vector<8x64xf32>
    %325 = vector.extract_strided_slice %204 {offsets = [448, 0], sizes = [64, 10], strides = [1, 1]} : vector<512x10xf32> to vector<64x10xf32>
    %326 = vector.extract_strided_slice %203 {offsets = [0, 448], sizes = [10, 64], strides = [1, 1]} : vector<10x512xf32> to vector<10x64xf32>
    %cst_129 = arith.constant dense<0.000000e+00> : vector<8x10xf32>
    %327 = tpu.matmul %324, %325, %cst_129 {dimension_numbers = #tpu.dot_dimension_numbers<[1], [0], [0], [1], [0, 0, 1, 1], [], []>} : vector<8x64xf32>, vector<64x10xf32>, vector<8x10xf32> -> vector<8x10xf32>
    %cst_130 = arith.constant -1.000000e+04 : f32
    %328 = vector.broadcast %cst_130 : f32 to vector<8x10xf32>
    %329 = arith.select %13, %328, %327 : vector<8x10xi1>, vector<8x10xf32>
    %cst_131 = arith.constant dense<0xFF800000> : vector<8xf32>
    %330 = vector.multi_reduction <maximumf>, %329, %cst_131 [1] : vector<8x10xf32> to vector<8xf32>
    %331 = vector.shape_cast %330 : vector<8xf32> to vector<8x1xf32>
    %332 = vector.broadcast %331 : vector<8x1xf32> to vector<8x10xf32>
    %333 = arith.subf %329, %332 : vector<8x10xf32>
    %334 = math.exp %333 : vector<8x10xf32>
    %cst_132 = arith.constant dense<0.000000e+00> : vector<8xf32>
    %335 = vector.multi_reduction <add>, %334, %cst_132 [1] : vector<8x10xf32> to vector<8xf32>
    %336 = vector.shape_cast %335 : vector<8xf32> to vector<8x1xf32>
    %337 = tpu.reciprocal %336 {approx = true} : vector<8x1xf32> -> vector<8x1xf32>
    %338 = vector.broadcast %337 : vector<8x1xf32> to vector<8x10xf32>
    %339 = arith.mulf %334, %338 : vector<8x10xf32>
    %cst_133 = arith.constant dense<0.000000e+00> : vector<8x64xf32>
    %340 = tpu.matmul %339, %326, %cst_133 {dimension_numbers = #tpu.dot_dimension_numbers<[1], [0], [0], [1], [0, 0, 1, 1], [], []>} : vector<8x10xf32>, vector<10x64xf32>, vector<8x64xf32> -> vector<8x64xf32>
    %341 = tpu.concatenate %220, %237, %254, %271, %288, %305, %322, %339 in 1 : vector<8x10xf32>, vector<8x10xf32>, vector<8x10xf32>, vector<8x10xf32>, vector<8x10xf32>, vector<8x10xf32>, vector<8x10xf32>, vector<8x10xf32> -> vector<8x80xf32>
    %c0_134 = arith.constant 0 : index
    %c0_135 = arith.constant 0 : index
    %c0_136 = arith.constant 0 : index
    %c0_137 = arith.constant 0 : index
    %342 = vector.load %arg18[%c0_134, %c0_135, %c0_136, %c0_137] : memref<1x1x8x80xf32, #tpu.memory_space<vmem>>, vector<1x1x8x80xf32>
    %343 = vector.shape_cast %342 : vector<1x1x8x80xf32> to vector<8x80xf32>
    %344 = vector.shape_cast %341 : vector<8x80xf32> to vector<1x1x8x80xf32>
    tpu.vector_store %arg18[%c0_134, %c0_135, %c0_136, %c0_137], %344 {strides = array<i32>} : memref<1x1x8x80xf32, #tpu.memory_space<vmem>>, vector<1x1x8x80xf32>,
    %345 = tpu.concatenate %221, %238, %255, %272, %289, %306, %323, %340 in 1 : vector<8x64xf32>, vector<8x64xf32>, vector<8x64xf32>, vector<8x64xf32>, vector<8x64xf32>, vector<8x64xf32>, vector<8x64xf32>, vector<8x64xf32> -> vector<8x512xf32>
    %cst_138 = arith.constant dense<0.000000e+00> : vector<8x30xf32>
    %346 = tpu.matmul %345, %198, %cst_138 {dimension_numbers = #tpu.dot_dimension_numbers<[1], [0], [0], [1], [0, 0, 1, 1], [], []>} : vector<8x512xf32>, vector<512x30xf32>, vector<8x30xf32> -> vector<8x30xf32>
    %347 = arith.addf %346, %190 : vector<8x30xf32>
    %cst_139 = arith.constant dense<0.000000e+00> : vector<8xf32>
    %348 = vector.multi_reduction <add>, %347, %cst_139 [1] : vector<8x30xf32> to vector<8xf32>
    %349 = vector.shape_cast %348 : vector<8xf32> to vector<8x1xf32>
    %cst_140 = arith.constant 3.000000e+01 : f32
    %350 = vector.broadcast %cst_140 : f32 to vector<8x1xf32>
    %351 = arith.divf %349, %350 : vector<8x1xf32>
    %352 = vector.broadcast %351 : vector<8x1xf32> to vector<8x30xf32>
    %353 = arith.subf %347, %352 : vector<8x30xf32>
    %354 = vector.broadcast %351 : vector<8x1xf32> to vector<8x30xf32>
    %355 = arith.subf %347, %354 : vector<8x30xf32>
    %356 = arith.mulf %353, %355 : vector<8x30xf32>
    %cst_141 = arith.constant dense<0.000000e+00> : vector<8xf32>
    %357 = vector.multi_reduction <add>, %356, %cst_141 [1] : vector<8x30xf32> to vector<8xf32>
    %358 = vector.shape_cast %357 : vector<8xf32> to vector<8x1xf32>
    %cst_142 = arith.constant 3.000000e+01 : f32
    %359 = vector.broadcast %cst_142 : f32 to vector<8x1xf32>
    %360 = arith.divf %358, %359 : vector<8x1xf32>
    %361 = vector.broadcast %351 : vector<8x1xf32> to vector<8x30xf32>
    %362 = arith.subf %347, %361 : vector<8x30xf32>
    %cst_143 = arith.constant 9.99999974E-6 : f32
    %363 = vector.broadcast %cst_143 : f32 to vector<8x1xf32>
    %364 = arith.addf %360, %363 : vector<8x1xf32>
    %365 = math.rsqrt %364 : vector<8x1xf32>
    %366 = vector.broadcast %365 : vector<8x1xf32> to vector<8x30xf32>
    %367 = arith.mulf %362, %366 : vector<8x30xf32>
    %c0_144 = arith.constant 0 : index
    %c0_145 = arith.constant 0 : index
    %c0_146 = arith.constant 0 : index
    %368 = vector.load %arg14[%c0_144, %c0_145, %c0_146] : memref<1x30x1024xf32, #tpu.memory_space<vmem>>, vector<1x30x1024xf32>
    %369 = vector.shape_cast %368 : vector<1x30x1024xf32> to vector<30x1024xf32>
    %cst_147 = arith.constant dense<0.000000e+00> : vector<8x1024xf32>
    %370 = tpu.matmul %367, %369, %cst_147 {dimension_numbers = #tpu.dot_dimension_numbers<[1], [0], [0], [1], [0, 0, 1, 1], [], []>} : vector<8x30xf32>, vector<30x1024xf32>, vector<8x1024xf32> -> vector<8x1024xf32>
    %cst_148 = arith.constant 0.000000e+00 : f32
    %371 = vector.broadcast %cst_148 : f32 to vector<8x1024xf32>
    %372 = arith.maximumf %370, %371 : vector<8x1024xf32>
    %c0_149 = arith.constant 0 : index
    %c0_150 = arith.constant 0 : index
    %c0_151 = arith.constant 0 : index
    %373 = vector.load %arg15[%c0_149, %c0_150, %c0_151] : memref<1x1024x30xf32, #tpu.memory_space<vmem>>, vector<1x1024x30xf32>
    %374 = vector.shape_cast %373 : vector<1x1024x30xf32> to vector<1024x30xf32>
    %cst_152 = arith.constant dense<0.000000e+00> : vector<8x30xf32>
    %375 = tpu.matmul %372, %374, %cst_152 {dimension_numbers = #tpu.dot_dimension_numbers<[1], [0], [0], [1], [0, 0, 1, 1], [], []>} : vector<8x1024xf32>, vector<1024x30xf32>, vector<8x30xf32> -> vector<8x30xf32>
    %376 = arith.addf %375, %367 : vector<8x30xf32>
    %cst_153 = arith.constant dense<0.000000e+00> : vector<8xf32>
    %377 = vector.multi_reduction <add>, %376, %cst_153 [1] : vector<8x30xf32> to vector<8xf32>
    %378 = vector.shape_cast %377 : vector<8xf32> to vector<8x1xf32>
    %cst_154 = arith.constant 3.000000e+01 : f32
    %379 = vector.broadcast %cst_154 : f32 to vector<8x1xf32>
    %380 = arith.divf %378, %379 : vector<8x1xf32>
    %381 = vector.broadcast %380 : vector<8x1xf32> to vector<8x30xf32>
    %382 = arith.subf %376, %381 : vector<8x30xf32>
    %383 = vector.broadcast %380 : vector<8x1xf32> to vector<8x30xf32>
    %384 = arith.subf %376, %383 : vector<8x30xf32>
    %385 = arith.mulf %382, %384 : vector<8x30xf32>
    %cst_155 = arith.constant dense<0.000000e+00> : vector<8xf32>
    %386 = vector.multi_reduction <add>, %385, %cst_155 [1] : vector<8x30xf32> to vector<8xf32>
    %387 = vector.shape_cast %386 : vector<8xf32> to vector<8x1xf32>
    %cst_156 = arith.constant 3.000000e+01 : f32
    %388 = vector.broadcast %cst_156 : f32 to vector<8x1xf32>
    %389 = arith.divf %387, %388 : vector<8x1xf32>
    %390 = vector.broadcast %380 : vector<8x1xf32> to vector<8x30xf32>
    %391 = arith.subf %376, %390 : vector<8x30xf32>
    %cst_157 = arith.constant 9.99999974E-6 : f32
    %392 = vector.broadcast %cst_157 : f32 to vector<8x1xf32>
    %393 = arith.addf %389, %392 : vector<8x1xf32>
    %394 = math.rsqrt %393 : vector<8x1xf32>
    %395 = vector.broadcast %394 : vector<8x1xf32> to vector<8x30xf32>
    %396 = arith.mulf %391, %395 : vector<8x30xf32>
    %c0_158 = arith.constant 0 : index
    %c0_159 = arith.constant 0 : index
    %397 = vector.load %arg19[%c0_158, %c0_159] : memref<8x30xf32, #tpu.memory_space<vmem>>, vector<8x30xf32>
    tpu.vector_store %arg19[%c0_158, %c0_159], %396 {strides = array<i32>} : memref<8x30xf32, #tpu.memory_space<vmem>>, vector<8x30xf32>,
    %c0_160 = arith.constant 0 : index
    %c0_161 = arith.constant 0 : index
    %c0_162 = arith.constant 0 : index
    %398 = vector.load %arg16[%c0_160, %c0_161, %c0_162] : memref<1x8x30xf32, #tpu.memory_space<vmem>>, vector<1x8x30xf32>
    %399 = vector.shape_cast %398 : vector<1x8x30xf32> to vector<8x30xf32>
    %400 = vector.shape_cast %396 : vector<8x30xf32> to vector<1x8x30xf32>
    tpu.vector_store %arg16[%c0_160, %c0_161, %c0_162], %400 {strides = array<i32>} : memref<1x8x30xf32, #tpu.memory_space<vmem>>, vector<1x8x30xf32>,
    return
  }
  func.func @transform_0(%arg0: i32, %arg1: i32) -> (i32, i32, i32) {
    %c0_i32 = arith.constant 0 : i32
    %c0_i32_0 = arith.constant 0 : i32
    %c0_i32_1 = arith.constant 0 : i32
    return %arg0, %c0_i32, %c0_i32_0 : i32, i32, i32
  }
  func.func @transform_1(%arg0: i32, %arg1: i32) -> (i32, i32, i32) {
    %c0_i32 = arith.constant 0 : i32
    %c0_i32_0 = arith.constant 0 : i32
    %c0_i32_1 = arith.constant 0 : i32
    return %arg0, %c0_i32, %c0_i32_0 : i32, i32, i32
  }
  func.func @transform_2(%arg0: i32, %arg1: i32) -> (i32, i32, i32) {
    %c0_i32 = arith.constant 0 : i32
    %c0_i32_0 = arith.constant 0 : i32
    %c0_i32_1 = arith.constant 0 : i32
    return %arg0, %c0_i32, %c0_i32_0 : i32, i32, i32
  }
  func.func @transform_3(%arg0: i32, %arg1: i32) -> (i32, i32, i32) {
    %c0_i32 = arith.constant 0 : i32
    %c0_i32_0 = arith.constant 0 : i32
    %c0_i32_1 = arith.constant 0 : i32
    return %arg0, %c0_i32, %c0_i32_0 : i32, i32, i32
  }
  func.func @transform_4(%arg0: i32, %arg1: i32) -> (i32, i32, i32) {
    %c0_i32 = arith.constant 0 : i32
    %c0_i32_0 = arith.constant 0 : i32
    %c0_i32_1 = arith.constant 0 : i32
    return %arg1, %c0_i32, %c0_i32_0 : i32, i32, i32
  }
  func.func @transform_5(%arg0: i32, %arg1: i32) -> (i32, i32, i32) {
    %c0_i32 = arith.constant 0 : i32
    %c0_i32_0 = arith.constant 0 : i32
    %c0_i32_1 = arith.constant 0 : i32
    return %arg1, %c0_i32, %c0_i32_0 : i32, i32, i32
  }
  func.func @transform_6(%arg0: i32, %arg1: i32) -> (i32, i32, i32) {
    %c0_i32 = arith.constant 0 : i32
    %c0_i32_0 = arith.constant 0 : i32
    %c0_i32_1 = arith.constant 0 : i32
    return %arg1, %c0_i32, %c0_i32_0 : i32, i32, i32
  }
  func.func @transform_7(%arg0: i32, %arg1: i32) -> (i32, i32, i32) {
    %c0_i32 = arith.constant 0 : i32
    %c0_i32_0 = arith.constant 0 : i32
    %c0_i32_1 = arith.constant 0 : i32
    return %arg1, %c0_i32, %c0_i32_0 : i32, i32, i32
  }
  func.func @transform_8(%arg0: i32, %arg1: i32) -> (i32, i32, i32) {
    %c0_i32 = arith.constant 0 : i32
    %c0_i32_0 = arith.constant 0 : i32
    %c0_i32_1 = arith.constant 0 : i32
    return %arg1, %c0_i32, %c0_i32_0 : i32, i32, i32
  }
  func.func @transform_9(%arg0: i32, %arg1: i32) -> (i32, i32, i32) {
    %c0_i32 = arith.constant 0 : i32
    %c0_i32_0 = arith.constant 0 : i32
    %c0_i32_1 = arith.constant 0 : i32
    return %arg1, %c0_i32, %c0_i32_0 : i32, i32, i32
  }
  func.func @transform_10(%arg0: i32, %arg1: i32) -> (i32, i32, i32) {
    %c0_i32 = arith.constant 0 : i32
    %c0_i32_0 = arith.constant 0 : i32
    %c0_i32_1 = arith.constant 0 : i32
    return %arg1, %c0_i32, %c0_i32_0 : i32, i32, i32
  }
  func.func @transform_11(%arg0: i32, %arg1: i32) -> (i32, i32, i32) {
    %c0_i32 = arith.constant 0 : i32
    %c0_i32_0 = arith.constant 0 : i32
    %c0_i32_1 = arith.constant 0 : i32
    return %arg1, %c0_i32, %c0_i32_0 : i32, i32, i32
  }
  func.func @transform_12(%arg0: i32, %arg1: i32) -> (i32, i32, i32) {
    %c0_i32 = arith.constant 0 : i32
    %c0_i32_0 = arith.constant 0 : i32
    %c0_i32_1 = arith.constant 0 : i32
    return %arg1, %c0_i32, %c0_i32_0 : i32, i32, i32
  }
  func.func @transform_13(%arg0: i32, %arg1: i32) -> (i32, i32, i32) {
    %c0_i32 = arith.constant 0 : i32
    %c0_i32_0 = arith.constant 0 : i32
    %c0_i32_1 = arith.constant 0 : i32
    return %arg1, %c0_i32, %c0_i32_0 : i32, i32, i32
  }
  func.func @transform_14(%arg0: i32, %arg1: i32) -> (i32, i32, i32) {
    %c0_i32 = arith.constant 0 : i32
    %c0_i32_0 = arith.constant 0 : i32
    %c0_i32_1 = arith.constant 0 : i32
    return %arg0, %c0_i32, %c0_i32_0 : i32, i32, i32
  }
  func.func @transform_15(%arg0: i32, %arg1: i32) -> (i32, i32, i32, i32) {
    %c0_i32 = arith.constant 0 : i32
    %c0_i32_0 = arith.constant 0 : i32
    %c0_i32_1 = arith.constant 0 : i32
    return %arg0, %arg1, %c0_i32, %c0_i32_0 : i32, i32, i32, i32
  }
  func.func @transform_16(%arg0: i32, %arg1: i32) -> (i32, i32, i32, i32) {
    %c0_i32 = arith.constant 0 : i32
    %c0_i32_0 = arith.constant 0 : i32
    %c0_i32_1 = arith.constant 0 : i32
    return %arg0, %arg1, %c0_i32, %c0_i32_0 : i32, i32, i32, i32
  }
}

</mosaic_0001>

<bundles_post_ra>
// kernel: tpu_custom_call.1
= control target key start
LH: loop header
LB: loop body
LE: loop exit
PB: predicated region body
PF: predicated region fallthrough
CT: control target
= control target key end

     0   :  { %s9383_s0 = inlined_call_operand.vmem [shape: f32[2,8,30], index: 0, kind: input, shape index: {}]   ;;  %s9384_s1 = inlined_call_operand.vmem [shape: f32[2,10,30], index: 1, kind: input, shape index: {}]   ;;  %s9385_s2 = inlined_call_operand.vmem [shape: f32[2,8,8], index: 2, kind: input, shape index: {}]   ;;  %s9386_s3 = inlined_call_operand.vmem [shape: f32[2,8,10], index: 3, kind: input, shape index: {}]   ;;  %s9387_s4 = inlined_call_operand.vmem [shape: f32[6,30,512], index: 4, kind: input, shape index: {}]   ;;  %s9388_s5 = inlined_call_operand.vmem [shape: f32[6,30,512], index: 5, kind: input, shape index: {}]   ;;  %s9389_s6 = inlined_call_operand.vmem [shape: f32[6,30,512], index: 6, kind: input, shape index: {}]   ;;  %s9390_s7 = inlined_call_operand.vmem [shape: f32[6,512,30], index: 7, kind: input, shape index: {}]   ;;  %s9391_s8 = inlined_call_operand.vmem [shape: f32[6,30,512], index: 8, kind: input, shape index: {}]   ;;  %s9392_s9 = inlined_call_operand.vmem [shape: f32[6,30,512], index: 9, kind: input, shape index: {}]   ;;  %s9393_s10 = inlined_call_operand.vmem [shape: f32[6,30,512], index: 10, kind: input, shape index: {}]   ;;  %s9394_s11 = inlined_call_operand.vmem [shape: f32[6,512,30], index: 11, kind: input, shape index: {}]   ;;  %s9395_s12 = inlined_call_operand.vmem [shape: f32[6,30,1024], index: 12, kind: input, shape index: {}]   ;;  %s9396_s13 = inlined_call_operand.vmem [shape: f32[6,1024,30], index: 13, kind: input, shape index: {}]   ;;  %s9397_s14 = inlined_call_operand.hbm [shape: f32[2,8,30], index: 14, kind: output, shape index: {0}]   ;;  %s9398_s15 = inlined_call_operand.hbm [shape: f32[2,6,8,64], index: 15, kind: output, shape index: {1}]   ;;  %s9399_s16 = inlined_call_operand.hbm [shape: f32[2,6,8,80], index: 16, kind: output, shape index: {2}]  }
   0x1   :  { %9427 = sst [smem:[#allocation30_spill]] %s9383_s0 }
   0x2   :  { %9428 = sst [smem:[#allocation31_spill]] %s9384_s1 }
   0x3   :  { %9429 = sst [smem:[#allocation32_spill]] %s9386_s3 }
   0x4   :  { %9430 = sst [smem:[#allocation33_spill]] %s9387_s4 }
   0x5   :  { %9431 = sst [smem:[#allocation34_spill]] %s9388_s5 }
   0x6   :  { %9432 = sst [smem:[#allocation35_spill]] %s9389_s6 }
   0x7   :  { %9433 = sst [smem:[#allocation36_spill]] %s9390_s7 }
   0x8   :  { %9434 = sst [smem:[#allocation37_spill]] %s9391_s8 }
   0x9   :  { %9435 = sst [smem:[#allocation38_spill]] %s9392_s9 }
   0xa   :  { %9436 = sst [smem:[#allocation39_spill]] %s9393_s10 }
   0xb   :  { %9437 = sst [smem:[#allocation40_spill]] %s9394_s11 }
   0xc   :  { %9438 = sst [smem:[#allocation41_spill]] %s9395_s12 }
   0xd   :  { %9439 = sst [smem:[#allocation42_spill]] %s9396_s13 }
   0xe   :  { %9440 = sst [smem:[#allocation43_spill]] %s9397_s14 }
   0xf   :  { %9441 = sst [smem:[#allocation44_spill]] %s9398_s15 }
  0x10   :  { %9442 = sst [smem:[#allocation45_spill]] %s9399_s16 }
  0x11   :  { %22 = vsyncpa [#allocation4], 0 }
  0x12   :  { %24 = vsyncpa [#allocation4 + $0x1], 0 }
  0x13   :  { %25 = vsyncpa [#allocation6], 0 }
  0x14   :  { %27 = vsyncpa [#allocation6 + $0x1], 0  ;;  %s7974_s21 = smov 0   ;;  %s7976_s22 = smov 0  }
  0x15   :  { %s7978_s23 = smov 0   ;;  %s7980_s24 = smov 0  }
  0x16   :  { %s7982_s25 = smov 0   ;;  %s7984_s26 = smov 0  }
  0x17   :  { %s7986_s27 = smov 0   ;;  %s7988_s28 = smov 0  }
  0x18   :  { %s7990_s29 = smov 0   ;;  %s7992_s30 = smov 0  }
  0x19   :  { %s7994_s0 = smov 0  }
  0x1a LB: > { %9443 = sst [smem:[#allocation10_spill]] %s7830_s22  ;;  %s9403_s17 = sadd.s32 4294967295, %s7866_s0   ;;  %s7866_s0 = sphi %s7994_s0, %s33_s0   ;;  %s7862_s30 = sphi %s7992_s30, %s9521_s30   ;;  %s7858_s29 = sphi %s7990_s29, %s9520_s29   ;;  %s7854_s28 = sphi %s7988_s28, %s9519_s28   ;;  %s7850_s27 = sphi %s7986_s27, %s9518_s27   ;;  %s7846_s26 = sphi %s7984_s26, %s9517_s26   ;;  %s7842_s25 = sphi %s7982_s25, %s9516_s25   ;;  %s7838_s24 = sphi %s7980_s24, %s9515_s24   ;;  %s7834_s23 = sphi %s7978_s23, %s9514_s23   ;;  %s7830_s22 = sphi %s7976_s22, %s9513_s22   ;;  %s7826_s21 = sphi %s7974_s21, %s9512_s21  }
  0x1b   : > { %9444 = sst [smem:[#allocation11_spill]] %s7834_s23  ;;  %s42_s19 = sadd.s32 1, %s7858_s29 }
  0x1c   : > { %9445 = sst [smem:[#allocation12_spill]] %s7838_s24  ;;  %s45_s20 = sadd.s32 1, %s7862_s30 }
  0x1d   : > { %9446 = sst [smem:[#allocation13_spill]] %s7842_s25  ;;  %p43_p0 = scmp.ge.s32.totalorder %s42_s19, 6 }
  0x1e   : > { %9447 = sst [smem:[#allocation14_spill]] %s7846_s26  ;;  %s416_s14 = sadd.s32 1, %s7846_s26 }
  0x1f   : > { %9448 = sst [smem:[#allocation15_spill]] %s7854_s28  ;;  %p426_p1 = scmp.ne.s32.totalorder %s7846_s26, %s7842_s25 }
  0x20   : > { %9449 = sst [smem:[#allocation16_spill]] %s7858_s29  ;;  %p8038_p2 = scmp.eq.s32.totalorder %s9403_s17, 11 }
  0x21   : > { %9450 = sst [smem:[#allocation17_spill]] %s7862_s30  ;;  %s9523_s19 = smov (%p43_p0, %s42_s19), 0 }
  0x22   : > { %9451 = sst [smem:[#allocation18_spill]] %s7866_s0  ;;  %s9525_s20 = smov (!%p43_p0, %s45_s20), %s7862_s30 }
  0x23   : > { %9453 = sst [smem:[#allocation19_spill]] %s9523_s19  ;;  %p8047_p3 = por %p8038_p2, %p426_p1 }
  0x24   : > { %p432_p4 = scmp.ne.s32.totalorder %s7842_s25, %s7838_s24  ;;  %p47_p5 = scmp.ge.s32.totalorder %s9525_s20, 2 }
  0x25   : > { %s9454_s18 = scalar_select %p8047_p3, 1, 0 }
  0x26   : > { %s9456_s15 = sadd.s32 4294967294, %s7866_s0   ;;  %s440_s13 = ssub.s32 %s7858_s29, %s9523_s19 }
  0x27   : > { %9455 = sst [smem:[#allocation20_spill]] %s9454_s18  ;;  %p8055_p6 = scmp.eq.s32.totalorder %s9456_s15, 11 }
  0x28   : > { %s444_s12 = sadd.s32 1, %s7834_s23  ;;  %s9527_s20 = smov (%p47_p5, %s9525_s20), 0 }
  0x29   : > { %9458 = sst [smem:[#allocation21_spill]] %s9527_s20  ;;  %p8066_p7 = por %p8055_p6, %p432_p4 }
  0x2a   : > { %p454_p8 = scmp.ne.s32.totalorder %s7834_s23, %s7830_s22  ;;  %s413_s24 = ssub.s32 %s7862_s30, %s9527_s20 }
  0x2b   : > { %s9459_s18 = scalar_select %p8066_p7, 1, 0 }
  0x2c   : > { %p460_p9 = scmp.ne.s32.totalorder %s7830_s22, %s7826_s21  ;;  %p414_p10 = scmp.eq.s32.totalorder %s413_s24, 0 }
  0x2d   : > { %9460 = sst [smem:[#allocation22_spill]] %s9459_s18  ;;  %s441_s15 = sor.u32 %s440_s13, %s413_s24 }
  0x2e   : > { %p442_p11 = scmp.eq.s32.totalorder %s441_s15, 0  ;;  %p8078_p12 = por %p454_p8, %p8038_p2 }
  0x2f   : > { %s8083_s19 = scalar_select %p414_p10, %s7846_s26, %s416_s14  }
  0x30   : > { %s9461_s11 = scalar_select %p8078_p12, 1, 0 }
  0x31   : > { %9463 = sst [smem:[#allocation24_spill]] %s8083_s19  ;;  %p8090_p13 = por %p460_p9, %p8055_p6 }
  0x32   : > { %9462 = sst [smem:[#allocation23_spill]] %s9461_s11  ;;  %p6236_p0 = scmp.ge.s32.totalorder %s7866_s0, 1 }
  0x33   : > { %s8086_s29 = scalar_select %p442_p11, %s7834_s23, %s444_s12  }
  0x34   : > { %s9465_s10 = scalar_select %p8090_p13, 1, 0 }
  0x35   : > { %9464 = sst [smem:[#allocation25_spill]] %s8086_s29  ;;  %p616_p1 = scmp.lt.s32.totalorder %s7866_s0, 13 }
  0x36   : > { %9466 = sst [smem:[#allocation26_spill]] %s9465_s10 }
  0x37   : > { %p617_p4 = pnand %p6236_p0, %p616_p1 }
  0x39   : > { %620 = sbr.rel (%p617_p4) target bundleno = 7600 (0x1db0), region = 76 }
  0x40   : > { %s9413_s13 = sand.u32 1, %s7842_s25   ;;  %s728_s14 = sand.u32 1, %s7830_s22  }
  0x41   : > { %s8100_s12 = sshll.u32 %s9413_s13, 3  ;;  %s8102_s16 = sshll.u32 %s728_s14, 3 }
  0x42   : > { %p738_p2 = scmp.lt.s32.totalorder %s7854_s28, 1  ;;  %p755_p5 = scmp.lt.s32.totalorder %s7850_s27, 5 }
  0x43   : > { %s9467_s19 = sld [smem:[#allocation30_spill]]  ;;  %s9468_s1 = sld [smem:[#allocation31_spill]] }
  0x44   : > { %s739_s21 = scalar_select %p738_p2, %s7854_s28, 1 }
  0x45   : > { %s756_s24 = scalar_select %p755_p5, %s7850_s27, 5 }
  0x46   : > { %s8108_s17 = sshll.u32 %s739_s21, 3  ;;  %s6390_s15 = sshll.u32 %s739_s21, 4 }
  0x47   : > { %s6391_s21 = sshll.u32 %s756_s24, 7  ;;  %s6394_s28 = sshll.u32 %s756_s24, 9 }
  0x48   : > { %s9471_s4 = sld [smem:[#allocation33_spill]]  ;;  %s9472_s5 = sld [smem:[#allocation34_spill]] }
  0x49   : > { %s741_s26 = scalar_lea.vmem %s9467_s19, %s8108_s17  ;;  %s8117_s13 = scalar_lea.vmem %s9468_s1, %s6390_s15 }
  0x4a   : > { %9469 = sst [smem:[#allocation27_spill]] %s8117_s13  ;;  %s9473_s6 = sld [smem:[#allocation35_spill]] }
  0x4b   : > { %s9474_s7 = sld [smem:[#allocation36_spill]]  ;;  %s9475_s8 = sld [smem:[#allocation37_spill]] }
  0x4c   : > { %s9477_s9 = sld [smem:[#allocation38_spill]]  ;;  %s9479_s22 = sld [smem:[#allocation39_spill]] }
  0x4d   : > { %s9480_s11 = sld [smem:[#allocation40_spill]]  ;;  %s6400_s13 = sshll.u32 %s756_s24, 10 }
  0x4e   : > { %s8130_s20 = scalar_lea.vmem %s9471_s4, %s6391_s21  ;;  %s8135_s15 = scalar_lea.vmem %s9472_s5, %s6391_s21 }
  0x4f   : > { %s723_s5 = scalar_lea.vmem [#allocation3], %s8100_s12  ;;  %s737_s29 = scalar_lea.vmem [#allocation7], %s8102_s16 }
  0x50   : > { %s8140_s25 = scalar_lea.vmem %s9473_s6, %s6391_s21  ;;  %p6265_p6 = scmp.ne.s32.totalorder %s7850_s27, 0 }
  0x51   : > { %s8145_s10 = scalar_lea.vmem %s9474_s7, %s6394_s28  ;;  %s8150_s30 = scalar_lea.vmem %s9475_s8, %s6391_s21  ;;  %v809_v0 = vld [vmem:[%s741_s26] sm:$0xff] (!%p6265_p6)  ;;  %vm810_vm0 = vcmask (!%p6265_p6), 244736  }
  0x52   : > { %9476 = sst [smem:[#allocation28_spill]] %s8150_s30  ;;  %s8155_s23 = scalar_lea.vmem %s9477_s9, %s6391_s21  ;;  %811 = vst.msk [vmem:[#allocation2] sm:$0xff] (!%p6265_p6), %vm810_vm0, %v809_v0 }
  0x53   : > { %9478 = sst [smem:[#allocation29_spill]] %s8155_s23  ;;  %s8160_s14 = scalar_lea.vmem %s9479_s22, %s6391_s21 }
  0x54   : > { %s8165_s18 = scalar_lea.vmem %s9480_s11, %s6394_s28  ;;  %s6399_s7 = sshll.u32 %s756_s24, 8 }
  0x55   : > { %s9481_s8 = sld [smem:[#allocation41_spill]]  ;;  %s9482_s9 = sld [smem:[#allocation42_spill]] }
  0x56   : > { %s730_s21 = scalar_lea.vmem [#allocation5], %s8102_s16  ;;  %808 = sbr.rel (%p6265_p6) target bundleno = 93 (0x5d), region = 80 }
  0x5b   : > { %s8170_s30 = scalar_lea.vmem %s9481_s8, %s6399_s7  ;;  %s8175_s23 = scalar_lea.vmem %s9482_s9, %s6400_s13 }
  0x5d PF: > { %v820_v1 = vld [vmem:[%s8130_s20 + $0x8] sm:$0xff]  ;;  %v819_v3 = vld [vmem:[%s8130_s20] sm:$0xff]  ;;  %vm935_vm1 = vcmask 1045504   ;;  %v7868_v8 = vmov 0.0   ;;  %vm7869_vm2 = vmmov 1   ;;  %v822_v20 = vld [vmem:[%s8130_s20 + $0x18] sm:$0xff]  ;;  %s9485_s8 = scalar_lea.vmem %s9385_s2, %s8108_s17 }
  0x5e   : > { %v824_v2 = vld [vmem:[%s8130_s20 + $0x28] sm:$0xff]  ;;  %v823_v5 = vld [vmem:[%s8130_s20 + $0x20] sm:$0xff]  ;;  %1012 = vmatprep.mubr.f32.mxu0 %v7868_v8  ;;  %1083 = vmatprep.mubr.f32.mxu1 %v7868_v8  ;;  %vm8190_vm3 = vmpackc.low %vm935_vm1, %vm7869_vm2  ;;  %vm931_vm4 = vcmask 244736   ;;  %vm7870_vm5 = vmmov 0   ;;  %vm1402_vm6 = vcmask 523264   ;;  %s7871_s3 = smov 64  }
  0x5f   : > { %v6953_v4 = vpack.c.bf16 %v824_v2, %v820_v1  ;;  %v828_v6 = vld [vmem:[%s8130_s20 + $0x48] sm:$0xff]  ;;  %v6955_v9 = vpack.c.bf16 %v823_v5, %v819_v3  ;;  %v827_v12 = vld [vmem:[%s8130_s20 + $0x40] sm:$0xff]  ;;  %v826_v21 = vld [vmem:[%s8130_s20 + $0x38] sm:$0xff]  ;;  %vm1480_vm8 = vcmask 64512   ;;  %s9486_s9 = sld [smem:[#allocation28_spill]]  ;;  %s9488_s26 = sld [smem:[#allocation27_spill]] }
  0x60   : > { %v832_v7 = vld [vmem:[%s8130_s20 + $0x68] sm:$0x3f]  ;;  %v831_v13 = vld [vmem:[%s8130_s20 + $0x60] sm:$0x3f]  ;;  %v6963_v25 = vpack.c.bf16 %v826_v21, %v822_v20  ;;  %v821_v26 = vld [vmem:[%s8130_s20 + $0x10] sm:$0xff]  ;;  %vm3631_vm10 = vcmask 1041408  }
  0x61   : > { %v6957_v10 = vpack.c.bf16 %v832_v7, %v828_v6  ;;  %6954 = vmatprep.subr.bf16.mxu0 %v6953_v4  ;;  %v836_v14 = vld [vmem:[%s8135_s15 + $0x8] sm:$0xff]  ;;  %v6960_v16 = vpack.c.bf16 %v831_v13, %v827_v12  ;;  %v835_v17 = vld [vmem:[%s8135_s15] sm:$0xff]  ;;  %v825_v27 = vld [vmem:[%s8130_s20 + $0x30] sm:$0xff]  ;;  %s9493_s24 = sld [smem:[#allocation32_spill]]  ;;  %vm3616_vm13 = vcmask 80896   ;;  %s7876_s22 = smov 40  }
  0x62   : > { %v840_v15 = vld [vmem:[%s8135_s15 + $0x28] sm:$0xff]  ;;  %6956 = vmatpush1.bf16.msra.mxu0 %v6955_v9  ;;  %v839_v19 = vld [vmem:[%s8135_s15 + $0x20] sm:$0xff]  ;;  %v830_v28 = vld [vmem:[%s8130_s20 + $0x58] sm:$0xff]  ;;  %6964 = vmatprep.subr.bf16.mxu1 %v6963_v25  ;;  %v6965_v31 = vpack.c.bf16 %v825_v27, %v821_v26  ;;  %s7878_s11 = smov 56   ;;  %s7880_s1 = smov 60   ;;  %vm2738_vm14 = vcmask 130048  }
  0x63   : > { %6959 = vmatprep.subr.msk.bf16.mxu0 %vm8190_vm3, %v6957_v10  ;;  %v6973_v18 = vpack.c.bf16 %v840_v15, %v836_v14  ;;  %v8204_v22 = vld [vmem:[#allocation2] sm:$0xff]  ;;  %v844_v23 = vld [vmem:[%s8135_s15 + $0x48] sm:$0xff]  ;;  %v834_v29 = vld [vmem:[%s8130_s20 + $0x78] sm:$0x3f]  ;;  %v6975_v30 = vpack.c.bf16 %v839_v19, %v835_v17  ;;  %s7883_s0 = smov 30   ;;  %s7884_s4 = smov 50  }
  0x64   : > { %v848_v24 = vld [vmem:[%s8135_s15 + $0x68] sm:$0x3f]  ;;  %v6967_v32 = vpack.c.bf16 %v834_v29, %v830_v28  ;;  %v829_v33 = vld [vmem:[%s8130_s20 + $0x50] sm:$0xff]  ;;  %v838_v35 = vld [vmem:[%s8135_s15 + $0x18] sm:$0xff]  ;;  %6966 = vmatpush1.bf16.msra.mxu1 %v6965_v31  ;;  %s7885_s19 = smov 70   ;;  %vm2740_vm15 = vcmask 195584  }
  0x65   : > { %v833_v34 = vld [vmem:[%s8130_s20 + $0x70] sm:$0x3f]  ;;  %v6977_v36 = vpack.c.bf16 %v848_v24, %v844_v23  ;;  %v843_v37 = vld [vmem:[%s8135_s15 + $0x40] sm:$0xff]  ;;  %v842_v39 = vld [vmem:[%s8135_s15 + $0x38] sm:$0xff]  ;;  %vm2742_vm0 = vcmask 261120   ;;  %vm2744_vm1 = vcmask 326656  }
  0x66   : > { %6962 = vmatpush1.bf16.msk.msra.mxu0 %vm8190_vm3, %v6960_v16  ;;  %v847_v38 = vld [vmem:[%s8135_s15 + $0x60] sm:$0x3f]  ;;  %v6970_v40 = vpack.c.bf16 %v833_v34, %v829_v33  ;;  %v837_v41 = vld [vmem:[%s8135_s15 + $0x10] sm:$0xff]  ;;  %6969 = vmatprep.subr.msk.bf16.mxu1 %vm8190_vm3, %v6967_v32  ;;  %v6983_v42 = vpack.c.bf16 %v842_v39, %v838_v35  ;;  %v852_v44 = vld [vmem:[%s8140_s25 + $0x8] sm:$0xff]  ;;  %s9496_s6 = sld [smem:[#allocation15_spill]] }
  0x67   : > { %6974 = vmatprep.subr.bf16.mxu0 %v6973_v18  ;;  %v841_v43 = vld [vmem:[%s8135_s15 + $0x30] sm:$0xff]  ;;  %v856_v45 = vld [vmem:[%s8140_s25 + $0x28] sm:$0xff]  ;;  %v6980_v46 = vpack.c.bf16 %v847_v38, %v843_v37  ;;  %v846_v47 = vld [vmem:[%s8135_s15 + $0x58] sm:$0xff]  ;;  %s9494_s20 = scalar_lea.vmem %s9493_s24, %s8108_s17  ;;  %s7873_s17 = smov 8  }
  0x68   : > { %v850_v48 = vld [vmem:[%s8135_s15 + $0x78] sm:$0x3f]  ;;  %v6993_v49 = vpack.c.bf16 %v856_v45, %v852_v44  ;;  %v851_v50 = vld [vmem:[%s8140_s25] sm:$0xff]  ;;  %6972 = vmatpush1.bf16.msk.msra.mxu1 %vm8190_vm3, %v6970_v40  ;;  %v6985_v52 = vpack.c.bf16 %v841_v43, %v837_v41  ;;  %v860_v53 = vld [vmem:[%s8140_s25 + $0x48] sm:$0xff] }
  0x69   : > { %6268 = vmatmul.mubr.msk.f32.vlgmr.msra.gmra.mrb[0].mxu0 %vm931_vm4, %v8204_v22  ;;  %v855_v51 = vld [vmem:[%s8140_s25 + $0x20] sm:$0xff]  ;;  %v864_v54 = vld [vmem:[%s8140_s25 + $0x68] sm:$0x3f]  ;;  %6984 = vmatprep.subr.bf16.mxu1 %v6983_v42  ;;  %v6987_v55 = vpack.c.bf16 %v850_v48, %v846_v47  ;;  %v845_v56 = vld [vmem:[%s8135_s15 + $0x50] sm:$0xff] }
  0x6a   : > { %6976 = vmatpush1.bf16.msra.mxu0 %v6975_v30  ;;  %1170 = vmatprep.mubr.f32.mxu0 %v7868_v8  ;;  %v849_v57 = vld [vmem:[%s8135_s15 + $0x70] sm:$0x3f]  ;;  %v6995_v58 = vpack.c.bf16 %v855_v51, %v851_v50  ;;  %v6997_v59 = vpack.c.bf16 %v864_v54, %v860_v53  ;;  %v859_v61 = vld [vmem:[%s8140_s25 + $0x40] sm:$0xff]  ;;  %v854_v16 = vld [vmem:[%s8140_s25 + $0x18] sm:$0xff]  ;;  %s7874_s15 = smov 24  }
  0x6b   : > { %6979 = vmatprep.subr.msk.bf16.mxu0 %vm8190_vm3, %v6977_v36  ;;  %6271 = vmatmul.mubr.msk.f32.vlgmr.msra.gmra.mrb[0].mxu1 %vm931_vm4, %v8204_v22  ;;  %v6990_v60 = vpack.c.bf16 %v849_v57, %v845_v56  ;;  %v863_v62 = vld [vmem:[%s8140_s25 + $0x60] sm:$0x3f]  ;;  %v858_v17 = vld [vmem:[%s8140_s25 + $0x38] sm:$0xff]  ;;  %v853_v18 = vld [vmem:[%s8140_s25 + $0x10] sm:$0xff] }
  0x6c   : > { %6986 = vmatpush1.bf16.msra.mxu1 %v6985_v52  ;;  %1241 = vmatprep.mubr.f32.mxu1 %v7868_v8  ;;  %v7000_v63 = vpack.c.bf16 %v863_v62, %v859_v61  ;;  %v7003_v19 = vpack.c.bf16 %v858_v17, %v854_v16  ;;  %v857_v20 = vld [vmem:[%s8140_s25 + $0x30] sm:$0xff]  ;;  %v862_v21 = vld [vmem:[%s8140_s25 + $0x58] sm:$0xff]  ;;  %v815_v37 = vld [vmem:[%s9485_s8] sm:$0xff] }
  0x6d   : > { %6989 = vmatprep.subr.msk.bf16.mxu1 %vm8190_vm3, %v6987_v55  ;;  %v866_v23 = vld [vmem:[%s8140_s25 + $0x78] sm:$0x3f]  ;;  %v7005_v24 = vpack.c.bf16 %v857_v20, %v853_v18  ;;  %v861_v26 = vld [vmem:[%s8140_s25 + $0x50] sm:$0xff]  ;;  %vm816_vm7 = vcmp.gt.f32.partialorder %v815_v37, 0.5  ;;  %vm8607_vm9 = vmpackc.low %vm1402_vm6, %vm1402_vm6 }
  0x6e   : > { %6982 = vmatpush1.bf16.msk.msra.mxu0 %vm8190_vm3, %v6980_v46  ;;  %v7007_v25 = vpack.c.bf16 %v866_v23, %v862_v21  ;;  %v865_v27 = vld [vmem:[%s8140_s25 + $0x70] sm:$0x3f]  ;;  %vm8672_vm11 = vmpackc.low %vm3631_vm10, %vm7869_vm2  ;;  %s7875_s25 = smov 32   ;;  %v5517_v11 = vld [vmem:[%s8175_s23 + $0x1a8] sm:$0xff]  ;;  %vm2746_vm2 = vcmask 392192  }
  0x6f   : > { %6994 = vmatprep.subr.bf16.mxu0 %v6993_v49  ;;  %v7010_v28 = vpack.c.bf16 %v865_v27, %v861_v26 }
  0x70   : > { %6992 = vmatpush1.bf16.msk.msra.mxu1 %vm8190_vm3, %v6990_v60 }
  0x71   : > { %6274 = vmatmul.mubr.msk.f32.vlgmr.msra.gmra.mrb[2].mxu0 %vm931_vm4, %v8204_v22  ;;  %7004 = vmatprep.subr.bf16.mxu1 %v7003_v19 }
  0x72   : > { %6996 = vmatpush1.bf16.msra.mxu0 %v6995_v58  ;;  %1324 = vmatprep.mubr.f32.mxu0 %v7868_v8 }
  0x73   : > { %6999 = vmatprep.subr.msk.bf16.mxu0 %vm8190_vm3, %v6997_v59  ;;  %6277 = vmatmul.mubr.msk.f32.vlgmr.msra.gmra.mrb[2].mxu1 %vm931_vm4, %v8204_v22 }
  0x74   : > { %1395 = vmatprep.mubr.f32.mxu1 %v7868_v8  ;;  %7006 = vmatpush1.bf16.msra.mxu1 %v7005_v24 }
  0x75   : > { %7009 = vmatprep.subr.msk.bf16.mxu1 %vm8190_vm3, %v7007_v25 }
  0x76   : > { %7002 = vmatpush1.bf16.msk.msra.mxu0 %vm8190_vm3, %v7000_v63 }
  0x77   : > { %6761 = vmatprep.subr.mxu0 %v7868_v8 }
  0x78   : > { %7012 = vmatpush1.bf16.msk.msra.mxu1 %vm8190_vm3, %v7010_v28 }
  0x79   : > { %6280 = vmatmul.mubr.msk.f32.vlgmr.msra.gmra.mrb[4].mxu0 %vm931_vm4, %v8204_v22  ;;  %6766 = vmatprep.subr.mxu1 %v7868_v8 }
  0x7a   : > { %6763 = vmatprep.mubr.msk.f32.mxu0 %vm7870_vm5, %v7868_v8 }
  0x7b   : > { %6283 = vmatmul.mubr.msk.f32.vlgmr.msra.gmra.mrb[4].mxu1 %vm931_vm4, %v8204_v22 }
  0x7c   : > { %6768 = vmatprep.mubr.msk.f32.mxu1 %vm7870_vm5, %v7868_v8 }
 0x13c   : > { %v1014_v0 = vpop.f32.mrb[0].mxu0 }
 0x13d   : > { %v1016_v1 = vpop.f32.mrb[1].mxu0  ;;  %v1090_v6 = vmul.f32 0.125, %v1014_v0 }
 0x13e   : > { %v1085_v2 = vpop.f32.mrb[0].mxu1  ;;  %v1091_v7 = vmul.f32 0.125, %v1016_v1 }
 0x13f   : > { %v1087_v3 = vpop.f32.mrb[1].mxu1  ;;  %v1092_v9 = vmul.f32 0.125, %v1085_v2 }
 0x140   : > { %v1093_v13 = vmul.f32 0.125, %v1087_v3 }
 0x144   : > { %v1172_v4 = vpop.f32.mrb[2].mxu0 }
 0x145   : > { %1567 = vrot.lane.b32.xlu0 %v1172_v4, %s7871_s3  ;;  %v1174_v5 = vpop.f32.mrb[3].mxu0  ;;  %6762 = vmatpush3.xpose.msk.msra.mxu0 %vm1402_vm6, %v1172_v4 }
 0x146   : > { %1895 = vrot.lane.b32.xlu1 %v1174_v5, %s7871_s3  ;;  %6771 = vmatprep.subr.mxu0 %v7868_v8  ;;  %v1243_v10 = vpop.f32.mrb[2].mxu1 }
 0x147   : > { %v1245_v12 = vpop.f32.mrb[3].mxu1 }
 0x148   : > { %6764 = vmatmul.mubr.msk.f32.vlgmr.msra.gmra.mrb[6].mxu0 %vm1402_vm6, %v1090_v6 }
 0x149   : > { %1565 = vrot.lane.b32.xlu0 %v1090_v6, %s7871_s3  ;;  %6773 = vmatprep.mubr.msk.f32.mxu0 %vm7870_vm5, %v7868_v8 }
 0x14a   : > { %1893 = vrot.lane.b32.xlu1 %v1091_v7, %s7871_s3 }
 0x14c   : > { %v8280_v14 = vpop.f32.mrb[4].mxu0 }
 0x14d   : > { %2223 = vrot.lane.b32.xlu0 %v1243_v10, %s7871_s3  ;;  %v8282_v15 = vpop.f32.mrb[5].mxu0  ;;  %6767 = vmatpush3.msra.mxu1 %v8280_v14 }
 0x14e   : > { %2221 = vrot.lane.b32.xlu1 %v1092_v9, %s7871_s3  ;;  %6776 = vmatprep.subr.mxu1 %v7868_v8 }
 0x151   : > { %2551 = vrot.lane.b32.xlu0 %v1245_v12, %s7871_s3 }
 0x152   : > { %2549 = vrot.lane.b32.xlu1 %v1093_v13, %s7871_s3 }
 0x1b7   : > { %v1568_v29 = vpop.permute.xlu0 %1567 }
 0x1b8   : > { %6772 = vmatpush3.xpose.msk.msra.mxu0 %vm1402_vm6, %v1568_v29  ;;  %v1896_v31 = vpop.permute.xlu1 %1895 }
 0x1b9   : > { %6781 = vmatprep.subr.mxu0 %v7868_v8 }
 0x1bb   : > { %v1566_v30 = vpop.permute.xlu0 %1565 }
 0x1bc   : > { %6774 = vmatmul.mubr.msk.f32.vlgmr.msra.gmra.mrb[8].mxu0 %vm1402_vm6, %v1566_v30  ;;  %v1894_v32 = vpop.permute.xlu1 %1893 }
 0x1bd   : > { %6782 = vmatpush3.xpose.msk.msra.mxu0 %vm1402_vm6, %v1174_v5  ;;  %6783 = vmatprep.mubr.msk.f32.mxu0 %vm7870_vm5, %v7868_v8 }
 0x1be   : > { %6791 = vmatprep.subr.mxu0 %v7868_v8 }
 0x1bf   : > { %v2224_v33 = vpop.permute.xlu0 %2223 }
 0x1c0   : > { %6784 = vmatmul.mubr.msk.f32.vlgmr.msra.gmra.mrb[10].mxu0 %vm1402_vm6, %v1091_v7  ;;  %v2222_v34 = vpop.permute.xlu1 %2221 }
 0x1c1   : > { %6792 = vmatpush3.xpose.msk.msra.mxu0 %vm1402_vm6, %v1896_v31  ;;  %6793 = vmatprep.mubr.msk.f32.mxu0 %vm7870_vm5, %v7868_v8 }
 0x1c2   : > { %6801 = vmatprep.subr.mxu0 %v7868_v8 }
 0x1c3   : > { %v2552_v35 = vpop.permute.xlu0 %2551 }
 0x1c4   : > { %6794 = vmatmul.mubr.msk.f32.vlgmr.msra.gmra.mrb[12].mxu0 %vm1402_vm6, %v1894_v32  ;;  %v2550_v36 = vpop.permute.xlu1 %2549 }
 0x1c5   : > { %6802 = vmatpush3.xpose.msk.msra.mxu0 %vm1402_vm6, %v1243_v10  ;;  %6803 = vmatprep.mubr.msk.f32.mxu0 %vm7870_vm5, %v7868_v8 }
 0x1c6   : > { %6811 = vmatprep.subr.mxu0 %v7868_v8 }
 0x1c8   : > { %6804 = vmatmul.mubr.msk.f32.vlgmr.msra.gmra.mrb[14].mxu0 %vm1402_vm6, %v1092_v9 }
 0x1c9   : > { %6812 = vmatpush3.xpose.msk.msra.mxu0 %vm1402_vm6, %v2224_v33  ;;  %6813 = vmatprep.mubr.msk.f32.mxu0 %vm7870_vm5, %v7868_v8 }
 0x1ca   : > { %6821 = vmatprep.subr.mxu0 %v7868_v8 }
 0x1cc   : > { %6814 = vmatmul.mubr.msk.f32.vlgmr.msra.gmra.mrb[16].mxu0 %vm1402_vm6, %v2222_v34 }
 0x1cd   : > { %6822 = vmatpush3.xpose.msk.msra.mxu0 %vm1402_vm6, %v1245_v12  ;;  %6823 = vmatprep.mubr.msk.f32.mxu0 %vm7870_vm5, %v7868_v8 }
 0x1ce   : > { %6831 = vmatprep.subr.mxu0 %v7868_v8 }
 0x1d0   : > { %6824 = vmatmul.mubr.msk.f32.vlgmr.msra.gmra.mrb[18].mxu0 %vm1402_vm6, %v1093_v13  ;;  %v8359_v13 = vpop.f32.mrb[4].mxu1 }
 0x1d1   : > { %6832 = vmatpush3.xpose.msk.msra.mxu0 %vm1402_vm6, %v2552_v35  ;;  %6833 = vmatprep.mubr.msk.f32.mxu0 %vm7870_vm5, %v7868_v8  ;;  %v8361_v16 = vpop.f32.mrb[5].mxu1 }
 0x1d4   : > { %6834 = vmatmul.mubr.msk.f32.vlgmr.msra.gmra.mrb[20].mxu0 %vm1402_vm6, %v2550_v36 }
 0x21b   : > { %v1475_v38 = vpop.f32.mrb[6].mxu0 }
 0x21c   : > { %v1479_v39 = vsel %vm816_vm7, -10000.0, %v1475_v38  ;;  %v6765_v40 = vpop.f32.mrb[7].mxu0 }
 0x21d   : > { %v1481_v41 = vsel %vm1480_vm8, %v1479_v39, -inf }
 0x21e   : > { %1482 = vmax.xlane.f32.xlu0 %v1481_v41 }
 0x28f   : > { %v1639_v42 = vpop.f32.mrb[8].mxu0 }
 0x290   : > { %v1643_v43 = vsel %vm816_vm7, -10000.0, %v1639_v42  ;;  %v6775_v44 = vpop.f32.mrb[9].mxu0 }
 0x291   : > { %v1644_v45 = vsel %vm1480_vm8, %v1643_v43, -inf }
 0x292   : > { %1645 = vmax.xlane.f32.xlu1 %v1644_v45 }
 0x293   : > { %v1804_v46 = vpop.f32.mrb[10].mxu0 }
 0x294   : > { %v1808_v47 = vsel %vm816_vm7, -10000.0, %v1804_v46  ;;  %v6785_v48 = vpop.f32.mrb[11].mxu0 }
 0x295   : > { %v1809_v49 = vsel %vm1480_vm8, %v1808_v47, -inf }
 0x296   : > { %1810 = vmax.xlane.f32.xlu0 %v1809_v49 }
 0x297   : > { %v1967_v50 = vpop.f32.mrb[12].mxu0 }
 0x298   : > { %v1971_v51 = vsel %vm816_vm7, -10000.0, %v1967_v50  ;;  %v6795_v52 = vpop.f32.mrb[13].mxu0 }
 0x299   : > { %v1972_v53 = vsel %vm1480_vm8, %v1971_v51, -inf }
 0x29a   : > { %1973 = vmax.xlane.f32.xlu0 %v1972_v53 }
 0x29b   : > { %v2132_v54 = vpop.f32.mrb[14].mxu0 }
 0x29c   : > { %v2136_v55 = vsel %vm816_vm7, -10000.0, %v2132_v54  ;;  %v6805_v56 = vpop.f32.mrb[15].mxu0 }
 0x29d   : > { %v2137_v57 = vsel %vm1480_vm8, %v2136_v55, -inf }
 0x29e   : > { %2138 = vmax.xlane.f32.xlu1 %v2137_v57 }
 0x29f   : > { %v2295_v58 = vpop.f32.mrb[16].mxu0 }
 0x2a0   : > { %v2299_v59 = vsel %vm816_vm7, -10000.0, %v2295_v58  ;;  %v6815_v60 = vpop.f32.mrb[17].mxu0 }
 0x2a1   : > { %v2300_v61 = vsel %vm1480_vm8, %v2299_v59, -inf }
 0x2a2   : > { %2301 = vmax.xlane.f32.xlu0 %v2300_v61 }
 0x2a3   : > { %v2460_v62 = vpop.f32.mrb[18].mxu0 }
 0x2a4   : > { %v2464_v63 = vsel %vm816_vm7, -10000.0, %v2460_v62  ;;  %v6825_v0 = vpop.f32.mrb[19].mxu0 }
 0x2a5   : > { %v2465_v1 = vsel %vm1480_vm8, %v2464_v63, -inf }
 0x2a6   : > { %2466 = vmax.xlane.f32.xlu1 %v2465_v1 }
 0x2a7   : > { %v2623_v2 = vpop.f32.mrb[20].mxu0 }
 0x2a8   : > { %v2627_v3 = vsel %vm816_vm7, -10000.0, %v2623_v2  ;;  %v6835_v4 = vpop.f32.mrb[21].mxu0  ;;  %vm4932_vm7 = vcmask 408576  }
 0x2a9   : > { %v2628_v5 = vsel %vm1480_vm8, %v2627_v3, -inf }
 0x2aa   : > { %2629 = vmax.xlane.f32.xlu0 %v2628_v5 }
 0x2ab   : > { %v1483_v6 = vpop.xlane.xlu0 %1482 }
 0x2ac   : > { %v1484_v7 = vsub.f32 %v1479_v39, %v1483_v6 }
 0x2ae   : > { %v1485_v9 = vmul.f32 1.442695, %v1484_v7 }
 0x2b0   : > { %7618 = vpow2.f32 %v1485_v9 }
 0x2b7   : > { %1656 = vrot.lane.b32.xlu1 %v8280_v14, %s7871_s3 }
 0x2ba   : > { %v7619_v10 = vpop.eup %7618 }
 0x2bb   : > { %v1487_v12 = vsel %vm1480_vm8, %v7619_v10, 0.0 }
 0x2db   : > { %1488 = vadd.xlane.f32.xlu1 %v1487_v12 }
 0x31f   : > { %v1646_v17 = vpop.xlane.xlu1 %1645 }
 0x320   : > { %v1647_v18 = vsub.f32 %v1643_v43, %v1646_v17 }
 0x322   : > { %v1648_v19 = vmul.f32 1.442695, %v1647_v18 }
 0x323   : > { %v1811_v20 = vpop.xlane.xlu0 %1810 }
 0x324   : > { %7620 = vpow2.f32 %v1648_v19  ;;  %v1812_v21 = vsub.f32 %v1808_v47, %v1811_v20  ;;  %v883_v19 = vld [vmem:[%s8145_s10 + $0x80] sm:$0xff]  ;;  %v884_v20 = vld [vmem:[%s8145_s10 + $0x88] sm:$0xff] }
 0x326   : > { %v1813_v23 = vmul.f32 1.442695, %v1812_v21  ;;  %v867_v21 = vld [vmem:[%s8145_s10] sm:$0xff] }
 0x327   : > { %v1974_v14 = vpop.xlane.xlu0 %1973 }
 0x328   : > { %7622 = vpow2.f32 %v1813_v23  ;;  %v1975_v24 = vsub.f32 %v1971_v51, %v1974_v14  ;;  %v7013_v23 = vpack.c.bf16 %v884_v20, %v883_v19  ;;  %v868_v14 = vld [vmem:[%s8145_s10 + $0x8] sm:$0xff]  ;;  %v877_v19 = vld [vmem:[%s8145_s10 + $0x50] sm:$0xff]  ;;  %v878_v20 = vld [vmem:[%s8145_s10 + $0x58] sm:$0xff] }
 0x32a   : > { %v1976_v25 = vmul.f32 1.442695, %v1975_v24  ;;  %v885_v24 = vld [vmem:[%s8145_s10 + $0x90] sm:$0xff]  ;;  %7014 = vmatprep.subr.bf16.mxu0 %v7013_v23  ;;  %v896_v23 = vld [vmem:[%s8145_s10 + $0xe8] sm:$0xff] }
 0x32b   : > { %v2139_v26 = vpop.xlane.xlu1 %2138 }
 0x32c   : > { %7624 = vpow2.f32 %v1976_v25  ;;  %v2140_v27 = vsub.f32 %v2136_v55, %v2139_v26  ;;  %v886_v25 = vld [vmem:[%s8145_s10 + $0x98] sm:$0xff]  ;;  %v7015_v26 = vpack.c.bf16 %v868_v14, %v867_v21  ;;  %v895_v21 = vld [vmem:[%s8145_s10 + $0xe0] sm:$0xff]  ;;  %v7035_v14 = vpack.c.bf16 %v878_v20, %v877_v19 }
 0x32d   : > { %v914_v19 = vld [vmem:[%s8145_s10 + $0x178] sm:$0xff] }
 0x32e   : > { %v7621_v28 = vpop.eup %7620  ;;  %v2141_v29 = vmul.f32 1.442695, %v2140_v27  ;;  %v7017_v27 = vpack.c.bf16 %v886_v25, %v885_v24  ;;  %7016 = vmatpush3.bf16.msra.mxu0 %v7015_v26  ;;  %v7037_v24 = vpack.c.bf16 %v896_v23, %v895_v21  ;;  %v879_v25 = vld [vmem:[%s8145_s10 + $0x60] sm:$0xff]  ;;  %v880_v26 = vld [vmem:[%s8145_s10 + $0x68] sm:$0xff] }
 0x32f   : > { %v2302_v30 = vpop.xlane.xlu0 %2301  ;;  %v1650_v31 = vsel %vm1480_vm8, %v7621_v28, 0.0 }
 0x330   : > { %7626 = vpow2.f32 %v2141_v29  ;;  %v2303_v32 = vsub.f32 %v2299_v59, %v2302_v30  ;;  %1651 = vadd.xlane.f32.xlu0 %v1650_v31  ;;  %v870_v29 = vld [vmem:[%s8145_s10 + $0x18] sm:$0xff]  ;;  %v887_v30 = vld [vmem:[%s8145_s10 + $0xa0] sm:$0xff]  ;;  %v888_v31 = vld [vmem:[%s8145_s10 + $0xa8] sm:$0xff]  ;;  %7018 = vmatprep.subr.bf16.mxu0 %v7017_v27  ;;  %v7039_v27 = vpack.c.bf16 %v880_v26, %v879_v25 }
 0x332   : > { %v7623_v33 = vpop.eup %7622  ;;  %v2304_v34 = vmul.f32 1.442695, %v2303_v32 }
 0x333   : > { %v2467_v35 = vpop.xlane.xlu1 %2466  ;;  %v1815_v36 = vsel %vm1480_vm8, %v7623_v33, 0.0 }
 0x334   : > { %7628 = vpow2.f32 %v2304_v34  ;;  %v2468_v37 = vsub.f32 %v2464_v63, %v2467_v35  ;;  %1816 = vadd.xlane.f32.xlu1 %v1815_v36  ;;  %v871_v34 = vld [vmem:[%s8145_s10 + $0x20] sm:$0xff]  ;;  %v872_v35 = vld [vmem:[%s8145_s10 + $0x28] sm:$0xff]  ;;  %v889_v36 = vld [vmem:[%s8145_s10 + $0xb0] sm:$0xff] }
 0x336   : > { %v7625_v38 = vpop.eup %7624  ;;  %v2469_v39 = vmul.f32 1.442695, %v2468_v37  ;;  %v890_v37 = vld [vmem:[%s8145_s10 + $0xb8] sm:$0xff] }
 0x337   : > { %v2630_v40 = vpop.xlane.xlu0 %2629  ;;  %v1978_v41 = vsel %vm1480_vm8, %v7625_v38, 0.0  ;;  %v1657_v52 = vpop.permute.xlu1 %1656 }
 0x338   : > { %7630 = vpow2.f32 %v2469_v39  ;;  %v2631_v42 = vsub.f32 %v2627_v3, %v2630_v40  ;;  %1979 = vadd.xlane.f32.xlu0 %v1978_v41  ;;  %v916_v39 = vld [vmem:[%s8145_s10 + $0x188] sm:$0xff]  ;;  %v899_v41 = vld [vmem:[%s8145_s10 + $0x100] sm:$0xff] }
 0x33a   : > { %v7627_v43 = vpop.eup %7626  ;;  %v2632_v44 = vmul.f32 1.442695, %v2631_v42  ;;  %v900_v42 = vld [vmem:[%s8145_s10 + $0x108] sm:$0xff] }
 0x33b   : > { %v2143_v45 = vsel %vm1480_vm8, %v7627_v43, 0.0 }
 0x33c   : > { %7632 = vpow2.f32 %v2632_v44  ;;  %2144 = vadd.xlane.f32.xlu1 %v2143_v45  ;;  %v7023_v44 = vpack.c.bf16 %v872_v35, %v871_v34  ;;  %v873_v45 = vld [vmem:[%s8145_s10 + $0x30] sm:$0xff] }
 0x33e   : > { %v7629_v46 = vpop.eup %7628 }
 0x33f   : > { %v2306_v47 = vsel %vm1480_vm8, %v7629_v46, 0.0 }
 0x340   : > { %2307 = vadd.xlane.f32.xlu0 %v2306_v47  ;;  %v917_v47 = vld [vmem:[%s8145_s10 + $0x190] sm:$0xff] }
 0x342   : > { %v8368_v48 = vpop.eup %7630 }
 0x343   : > { %v2471_v49 = vsel %vm1480_vm8, %v8368_v48, 0.0 }
 0x344   : > { %2472 = vadd.xlane.f32.xlu1 %v2471_v49  ;;  %v7025_v49 = vpack.c.bf16 %v890_v37, %v889_v36  ;;  %v922_v36 = vld [vmem:[%s8145_s10 + $0x1b8] sm:$0xff]  ;;  %v881_v37 = vld [vmem:[%s8145_s10 + $0x70] sm:$0xff] }
 0x346   : > { %v8372_v50 = vpop.eup %7632 }
 0x347   : > { %v2634_v51 = vsel %vm1480_vm8, %v8372_v50, 0.0 }
 0x348   : > { %2635 = vadd.xlane.f32.xlu0 %v2634_v51  ;;  %v891_v51 = vld [vmem:[%s8145_s10 + $0xc0] sm:$0xff] }
 0x355   : > { %2312 = vrot.lane.b32.xlu1 %v8359_v13, %s7871_s3 }
 0x359   : > { %2640 = vrot.lane.b32.xlu1 %v8361_v16, %s7871_s3 }
 0x35e   : > { %1984 = vrot.lane.b32.xlu0 %v8282_v15, %s7871_s3 }
 0x368   : > { %v1489_v53 = vpop.xlane.xlu1 %1488 }
 0x369   : > { %7634 = vrcp.f32 %v1489_v53  ;;  %v892_v53 = vld [vmem:[%s8145_s10 + $0xc8] sm:$0xff] }
 0x373   : > { %v7635_v54 = vpop.eup %7634 }
 0x374   : > { %v8382_v55 = vmul.f32 %v7635_v54, %v7619_v10 }
 0x376   : > { %6769 = vmatmul.mubr.msk.f32.vlgmr.msra.gmra.mrb[6].mxu1 %vm1480_vm8, %v8382_v55 }
 0x377   : > { %6777 = vmatpush3.msra.mxu1 %v1657_v52  ;;  %6778 = vmatprep.mubr.msk.f32.mxu1 %vm7870_vm5, %v7868_v8  ;;  %v918_v52 = vld [vmem:[%s8145_s10 + $0x198] sm:$0xff] }
 0x378   : > { %6786 = vmatprep.subr.mxu1 %v7868_v8  ;;  %v7049_v54 = vpack.c.bf16 %v918_v52, %v917_v47  ;;  %v926_v52 = vld [vmem:[%s8145_s10 + $0x1d8] sm:$0xff] }
 0x3bd   : > { %v1652_v56 = vpop.xlane.xlu0 %1651 }
 0x3be   : > { %7636 = vrcp.f32 %v1652_v56  ;;  %v901_v56 = vld [vmem:[%s8145_s10 + $0x110] sm:$0xff] }
 0x3c1   : > { %v1817_v57 = vpop.xlane.xlu1 %1816 }
 0x3c2   : > { %7638 = vrcp.f32 %v1817_v57  ;;  %v902_v57 = vld [vmem:[%s8145_s10 + $0x118] sm:$0xff] }
 0x3c5   : > { %v1980_v60 = vpop.xlane.xlu0 %1979 }
 0x3c6   : > { %7640 = vrcp.f32 %v1980_v60  ;;  %v919_v60 = vld [vmem:[%s8145_s10 + $0x1a0] sm:$0xff] }
 0x3c8   : > { %v7637_v58 = vpop.eup %7636 }
 0x3c9   : > { %v8389_v59 = vmul.f32 %v7637_v58, %v7621_v28  ;;  %v2145_v63 = vpop.xlane.xlu1 %2144  ;;  %v869_v28 = vld [vmem:[%s8145_s10 + $0x10] sm:$0xff]  ;;  %v7051_v58 = vpack.c.bf16 %v902_v57, %v901_v56  ;;  %v910_v56 = vld [vmem:[%s8145_s10 + $0x158] sm:$0xff]  ;;  %v927_v57 = vld [vmem:[%s8145_s10 + $0x1e0] sm:$0xff] }
 0x3ca   : > { %7642 = vrcp.f32 %v2145_v63  ;;  %v7019_v32 = vpack.c.bf16 %v870_v29, %v869_v28 }
 0x3cb   : > { %6779 = vmatmul.mubr.msk.f32.vlgmr.msra.gmra.mrb[8].mxu1 %vm1480_vm8, %v8389_v59 }
 0x3cc   : > { %v7639_v61 = vpop.eup %7638  ;;  %6787 = vmatpush3.msra.mxu1 %v8282_v15  ;;  %6788 = vmatprep.mubr.msk.f32.mxu1 %vm7870_vm5, %v7868_v8 }
 0x3cd   : > { %v8396_v62 = vmul.f32 %v7639_v61, %v7623_v33  ;;  %6796 = vmatprep.subr.mxu1 %v7868_v8  ;;  %v2308_v0 = vpop.xlane.xlu0 %2307  ;;  %v7021_v33 = vpack.c.bf16 %v888_v31, %v887_v30  ;;  %7020 = vmatpush3.bf16.msra.mxu0 %v7019_v32  ;;  %v920_v61 = vld [vmem:[%s8145_s10 + $0x1a8] sm:$0xff]  ;;  %v897_v31 = vld [vmem:[%s8145_s10 + $0xf0] sm:$0xff]  ;;  %v898_v32 = vld [vmem:[%s8145_s10 + $0xf8] sm:$0xff] }
 0x3ce   : > { %7644 = vrcp.f32 %v2308_v0  ;;  %v7053_v0 = vpack.c.bf16 %v920_v61, %v919_v60  ;;  %v7041_v35 = vpack.c.bf16 %v898_v32, %v897_v31 }
 0x3cf   : > { %6789 = vmatmul.mubr.msk.f32.vlgmr.msra.gmra.mrb[10].mxu1 %vm1480_vm8, %v8396_v62  ;;  %7022 = vmatprep.subr.bf16.mxu0 %v7021_v33  ;;  %v921_v33 = vld [vmem:[%s8145_s10 + $0x1b0] sm:$0xff] }
 0x3d0   : > { %6798 = vmatprep.mubr.msk.f32.mxu1 %vm7870_vm5, %v7868_v8  ;;  %v7641_v15 = vpop.eup %7640 }
 0x3d1   : > { %v2473_v1 = vpop.xlane.xlu1 %2472  ;;  %v8403_v3 = vmul.f32 %v7641_v15, %v7625_v38  ;;  %v915_v38 = vld [vmem:[%s8145_s10 + $0x180] sm:$0xff]  ;;  %7024 = vmatpush3.bf16.msra.mxu0 %v7023_v44 }
 0x3d2   : > { %7646 = vrcp.f32 %v2473_v1  ;;  %v7045_v40 = vpack.c.bf16 %v916_v39, %v915_v38  ;;  %v903_v1 = vld [vmem:[%s8145_s10 + $0x120] sm:$0xff]  ;;  %7026 = vmatprep.subr.bf16.mxu0 %v7025_v49  ;;  %v882_v38 = vld [vmem:[%s8145_s10 + $0x78] sm:$0xff]  ;;  %v7057_v39 = vpack.c.bf16 %v922_v36, %v921_v33  ;;  %v908_v49 = vld [vmem:[%s8145_s10 + $0x148] sm:$0xff] }
 0x3d3   : > { %v875_v15 = vld [vmem:[%s8145_s10 + $0x40] sm:$0xff] }
 0x3d4   : > { %v7643_v5 = vpop.eup %7642 }
 0x3d5   : > { %v2636_v2 = vpop.xlane.xlu0 %2635  ;;  %v8411_v6 = vmul.f32 %v7643_v5, %v7627_v43  ;;  %v2313_v9 = vpop.permute.xlu1 %2312  ;;  %v904_v5 = vld [vmem:[%s8145_s10 + $0x128] sm:$0xff] }
 0x3d6   : > { %7648 = vrcp.f32 %v2636_v2  ;;  %v7029_v2 = vpack.c.bf16 %v892_v53, %v891_v51  ;;  %v925_v51 = vld [vmem:[%s8145_s10 + $0x1d0] sm:$0xff] }
 0x3d7   : > { %v909_v53 = vld [vmem:[%s8145_s10 + $0x150] sm:$0xff] }
 0x3d8   : > { %v7645_v7 = vpop.eup %7644  ;;  %v7067_v60 = vpack.c.bf16 %v910_v56, %v909_v53  ;;  %v2925_v53 = vld [vmem:[%s9486_s9] sm:$0xff] }
 0x3d9   : > { %v1985_v4 = vpop.permute.xlu0 %1984  ;;  %v8418_v10 = vmul.f32 %v7645_v7, %v7629_v46  ;;  %v2641_v18 = vpop.permute.xlu1 %2640  ;;  %v7047_v46 = vpack.c.bf16 %v900_v42, %v899_v41  ;;  %v893_v7 = vld [vmem:[%s8145_s10 + $0xd0] sm:$0xff]  ;;  %v906_v42 = vld [vmem:[%s8145_s10 + $0x138] sm:$0xff]  ;;  %v2929_v56 = vld [vmem:[%s9486_s9 + $0x20] sm:$0xff] }
 0x3da   : > { %6797 = vmatpush3.msra.mxu1 %v1985_v4  ;;  %v876_v4 = vld [vmem:[%s8145_s10 + $0x48] sm:$0xff]  ;;  %v905_v41 = vld [vmem:[%s8145_s10 + $0x130] sm:$0xff] }
 0x3db   : > { %6799 = vmatmul.mubr.msk.f32.vlgmr.msra.gmra.mrb[12].mxu1 %vm1480_vm8, %v8403_v3  ;;  %6806 = vmatprep.subr.mxu1 %v7868_v8  ;;  %v7059_v44 = vpack.c.bf16 %v906_v42, %v905_v41 }
 0x3dc   : > { %6807 = vmatpush3.msra.mxu1 %v8359_v13  ;;  %6808 = vmatprep.mubr.msk.f32.mxu1 %vm7870_vm5, %v7868_v8  ;;  %v7647_v12 = vpop.eup %7646 }
 0x3dd   : > { %6816 = vmatprep.subr.mxu1 %v7868_v8  ;;  %v8427_v13 = vmul.f32 %v7647_v12, %v8368_v48  ;;  %v7055_v12 = vpack.c.bf16 %v904_v5, %v903_v1 }
 0x3df   : > { %6809 = vmatmul.mubr.msk.f32.vlgmr.msra.gmra.mrb[14].mxu1 %vm1480_vm8, %v8411_v6 }
 0x3e0   : > { %6817 = vmatpush3.msra.mxu1 %v2313_v9  ;;  %6818 = vmatprep.mubr.msk.f32.mxu1 %vm7870_vm5, %v7868_v8  ;;  %v7649_v17 = vpop.eup %7648  ;;  %v894_v9 = vld [vmem:[%s8145_s10 + $0xd8] sm:$0xff] }
 0x3e1   : > { %6826 = vmatprep.subr.mxu1 %v7868_v8 }
 0x3e3   : > { %6819 = vmatmul.mubr.msk.f32.vlgmr.msra.gmra.mrb[16].mxu1 %vm1480_vm8, %v8418_v10 }
 0x3e4   : > { %6827 = vmatpush3.msra.mxu1 %v8361_v16  ;;  %6828 = vmatprep.mubr.msk.f32.mxu1 %vm7870_vm5, %v7868_v8  ;;  %v8435_v16 = vmul.f32 %v7649_v17, %v8372_v50  ;;  %v874_v50 = vld [vmem:[%s8145_s10 + $0x38] sm:$0xff]  ;;  %v7031_v17 = vpack.c.bf16 %v876_v4, %v875_v15 }
 0x3e5   : > { %6836 = vmatprep.subr.mxu1 %v7868_v8  ;;  %v7027_v63 = vpack.c.bf16 %v874_v50, %v873_v45  ;;  %v923_v45 = vld [vmem:[%s8145_s10 + $0x1c0] sm:$0xff] }
 0x3e7   : > { %6829 = vmatmul.mubr.msk.f32.vlgmr.msra.gmra.mrb[18].mxu1 %vm1480_vm8, %v8427_v13  ;;  %7028 = vmatpush3.bf16.msra.mxu0 %v7027_v63  ;;  %v911_v63 = vld [vmem:[%s8145_s10 + $0x160] sm:$0xff] }
 0x3e8   : > { %6837 = vmatpush3.msra.mxu1 %v2641_v18  ;;  %6838 = vmatprep.mubr.msk.f32.mxu1 %vm7870_vm5, %v7868_v8  ;;  %v7033_v18 = vpack.c.bf16 %v894_v9, %v893_v7  ;;  %v929_v7 = vld [vmem:[%s8145_s10 + $0x1f0] sm:$0xff]  ;;  %v930_v9 = vld [vmem:[%s8145_s10 + $0x1f8] sm:$0xff] }
 0x3e9   : > { %7046 = vmatprep.subr.bf16.mxu1 %v7045_v40  ;;  %7030 = vmatprep.subr.bf16.mxu0 %v7029_v2  ;;  %v7043_v40 = vpack.c.bf16 %v882_v38, %v881_v37 }
 0x3eb   : > { %6839 = vmatmul.mubr.msk.f32.vlgmr.msra.gmra.mrb[20].mxu1 %vm1480_vm8, %v8435_v16  ;;  %7032 = vmatpush3.bf16.msra.mxu0 %v7031_v17  ;;  %v7073_v17 = vpack.c.bf16 %v930_v9, %v929_v7 }
 0x3ec   : > { %7048 = vmatpush3.bf16.msra.mxu1 %v7047_v46  ;;  %7034 = vmatprep.subr.bf16.mxu0 %v7033_v18  ;;  %v924_v46 = vld [vmem:[%s8145_s10 + $0x1c8] sm:$0xff]  ;;  %v913_v18 = vld [vmem:[%s8145_s10 + $0x170] sm:$0xff] }
 0x3ed   : > { %7050 = vmatprep.subr.bf16.mxu1 %v7049_v54  ;;  %v7061_v47 = vpack.c.bf16 %v924_v46, %v923_v45  ;;  %v7065_v54 = vpack.c.bf16 %v926_v52, %v925_v51  ;;  %v7075_v20 = vpack.c.bf16 %v914_v19, %v913_v18  ;;  %v2930_v52 = vld [vmem:[%s9486_s9 + $0x28] sm:$0xff]  ;;  %v2935_v18 = vld [vmem:[%s9486_s9 + $0x50] sm:$0xff] }
 0x3ef   : > { %7036 = vmatpush3.bf16.msra.mxu0 %v7035_v14 }
 0x3f0   : > { %7052 = vmatpush3.bf16.msra.mxu1 %v7051_v58  ;;  %7038 = vmatprep.subr.bf16.mxu0 %v7037_v24  ;;  %v928_v58 = vld [vmem:[%s8145_s10 + $0x1e8] sm:$0xff] }
 0x3f1   : > { %7054 = vmatprep.subr.bf16.mxu1 %v7053_v0  ;;  %v7069_v61 = vpack.c.bf16 %v928_v58, %v927_v57  ;;  %v912_v0 = vld [vmem:[%s8145_s10 + $0x168] sm:$0xff]  ;;  %v2928_v57 = vld [vmem:[%s9486_s9 + $0x18] sm:$0xff] }
 0x3f2   : > { %v7071_v4 = vpack.c.bf16 %v912_v0, %v911_v63  ;;  %v2932_v58 = vld [vmem:[%s9486_s9 + $0x38] sm:$0xff]  ;;  %v2927_v63 = vld [vmem:[%s9486_s9 + $0x10] sm:$0xff] }
 0x3f3   : > { %7040 = vmatpush3.bf16.msra.mxu0 %v7039_v27  ;;  %v2931_v0 = vld [vmem:[%s9486_s9 + $0x30] sm:$0xff] }
 0x3f4   : > { %7056 = vmatpush3.bf16.msra.mxu1 %v7055_v12  ;;  %7042 = vmatprep.subr.bf16.mxu0 %v7041_v35 }
 0x3f5   : > { %7058 = vmatprep.subr.bf16.mxu1 %v7057_v39 }
 0x3f7   : > { %7044 = vmatpush3.bf16.msra.mxu0 %v7043_v40 }
 0x3f8   : > { %7060 = vmatpush3.bf16.msra.mxu1 %v7059_v44 }
 0x3f9   : > { %7062 = vmatprep.subr.bf16.mxu1 %v7061_v47 }
 0x449   : > { %v8457_v43 = vpop.f32.mrb[6].mxu1 }
 0x44a   : > { %v6770_v48 = vpop.f32.mrb[7].mxu1 }
 0x44b   : > { %v907_v48 = vld [vmem:[%s8145_s10 + $0x140] sm:$0xff]  ;;  %s9487_s10 = sld [smem:[#allocation29_spill]] }
 0x44c   : > { %v7063_v50 = vpack.c.bf16 %v908_v49, %v907_v48 }
 0x44e   : > { %7064 = vmatpush3.bf16.msra.mxu1 %v7063_v50 }
 0x44f   : > { %7066 = vmatprep.subr.bf16.mxu1 %v7065_v54 }
 0x452   : > { %7068 = vmatpush3.bf16.msra.mxu1 %v7067_v60  ;;  %v7079_v60 = vpack.c.bf16 %v2929_v56, %v2925_v53 }
 0x453   : > { %7070 = vmatprep.subr.bf16.mxu1 %v7069_v61  ;;  %v7087_v61 = vpack.c.bf16 %v2932_v58, %v2928_v57 }
 0x456   : > { %7072 = vmatpush3.bf16.msra.mxu1 %v7071_v4  ;;  %v2933_v4 = vld [vmem:[%s9486_s9 + $0x40] sm:$0xff] }
 0x457   : > { %7074 = vmatprep.subr.bf16.mxu1 %v7073_v17  ;;  %v2940_v17 = vld [vmem:[%s9486_s9 + $0x78] sm:$0x3f] }
 0x45a   : > { %7076 = vmatpush3.bf16.msra.mxu1 %v7075_v20  ;;  %v2939_v20 = vld [vmem:[%s9486_s9 + $0x70] sm:$0x3f] }
 0x45b   : > { %7088 = vmatprep.subr.bf16.mxu1 %v7087_v61 }
 0x49e   : > { %v1728_v28 = vpop.f32.mrb[8].mxu1 }
 0x49f   : > { %v6780_v29 = vpop.f32.mrb[9].mxu1 }
 0x4a2   : > { %v8481_v30 = vpop.f32.mrb[10].mxu1 }
 0x4a3   : > { %v6790_v34 = vpop.f32.mrb[11].mxu1 }
 0x4ae   : > { %v2056_v1 = vpop.f32.mrb[12].mxu1 }
 0x4af   : > { %v7558_v2 = vpack.i.bf16 %v1728_v28, %v2056_v1  ;;  %v6800_v15 = vpop.f32.mrb[13].mxu1  ;;  %v2934_v1 = vld [vmem:[%s9486_s9 + $0x48] sm:$0xff] }
 0x4b0   : > { %v2938_v15 = vld [vmem:[%s9486_s9 + $0x68] sm:$0x3f] }
 0x4b1   : > { %7559 = vrot.lane.b32.xlu0 %v7558_v2, %s7871_s3  ;;  %v7089_v2 = vpack.c.bf16 %v2931_v0, %v2927_v63  ;;  %v7081_v7 = vpack.c.bf16 %v2938_v15, %v2934_v1 }
 0x4b2   : > { %v2217_v5 = vpop.f32.mrb[14].mxu1 }
 0x4b3   : > { %v6810_v12 = vpop.f32.mrb[15].mxu1 }
 0x4b4   : > { %v2936_v12 = vld [vmem:[%s9486_s9 + $0x58] sm:$0xff] }
 0x4b5   : > { %v7091_v19 = vpack.c.bf16 %v2940_v17, %v2936_v12 }
 0x4b6   : > { %v2384_v21 = vpop.f32.mrb[16].mxu1 }
 0x4b7   : > { %v6820_v23 = vpop.f32.mrb[17].mxu1 }
 0x4b8   : > { %v2946_v23 = vld [vmem:[%s9487_s10 + $0x28] sm:$0xff] }
 0x4ba   : > { %v2545_v14 = vpop.f32.mrb[18].mxu1 }
 0x4bb   : > { %v6830_v24 = vpop.f32.mrb[19].mxu1 }
 0x4be   : > { %v2712_v25 = vpop.f32.mrb[20].mxu1 }
 0x4bf   : > { %v7563_v26 = vpack.i.bf16 %v2384_v21, %v2712_v25  ;;  %v6840_v27 = vpop.f32.mrb[21].mxu1  ;;  %v2942_v21 = vld [vmem:[%s9487_s10 + $0x8] sm:$0xff] }
 0x4c0   : > { %v7097_v24 = vpack.c.bf16 %v2946_v23, %v2942_v21  ;;  %v2944_v23 = vld [vmem:[%s9487_s10 + $0x18] sm:$0xff] }
 0x4c1   : > { %7564 = vrot.lane.b32.xlu1 %v7563_v26, %s7871_s3 }
 0x523   : > { %v7560_v28 = vpop.permute.xlu0 %7559 }
 0x524   : > { %v7562_v29 = vunpack.i.h.bf16 %v7560_v28  ;;  %v7561_v31 = vunpack.i.l.bf16 %v7560_v28  ;;  %v2941_v28 = vld [vmem:[%s9487_s10] sm:$0xff] }
 0x526   : > { %v2768_v32 = vsel %vm1402_vm6, %v8481_v30, %v7561_v31  ;;  %v2767_v33 = vsel %vm1402_vm6, %v8457_v43, %v7562_v29  ;;  %v2945_v29 = vld [vmem:[%s9487_s10 + $0x20] sm:$0xff]  ;;  %v2950_v31 = vld [vmem:[%s9487_s10 + $0x48] sm:$0xff] }
 0x527   : > { %2835 = vmatprep.mubr.f32.mxu0 %v2768_v32  ;;  %v2954_v32 = vld [vmem:[%s9487_s10 + $0x68] sm:$0x3f] }
 0x528   : > { %2836 = vmatmul.mubr.f32.vlgmr.msra.gmra.mrb[22].mxu0 %v2767_v33 }
 0x529   : > { %3116 = vmatprep.mubr.f32.mxu0 %v7868_v8 }
 0x533   : > { %v7565_v34 = vpop.permute.xlu1 %7564 }
 0x534   : > { %v7567_v35 = vunpack.i.h.bf16 %v7565_v34  ;;  %v7566_v36 = vunpack.i.l.bf16 %v7565_v34  ;;  %v7099_v34 = vpack.c.bf16 %v2945_v29, %v2941_v28  ;;  %v2956_v28 = vld [vmem:[%s9487_s10 + $0x78] sm:$0x3f] }
 0x536   : > { %v2770_v37 = vsel %vm1402_vm6, %v2545_v14, %v7566_v36  ;;  %v2769_v38 = vsel %vm1402_vm6, %v2217_v5, %v7567_v35  ;;  %v2937_v5 = vld [vmem:[%s9486_s9 + $0x60] sm:$0x3f]  ;;  %v7094_v14 = vpack.c.bf16 %v2939_v20, %v2935_v18  ;;  %v7101_v36 = vpack.c.bf16 %v2954_v32, %v2950_v31  ;;  %v2951_v32 = vld [vmem:[%s9487_s10 + $0x50] sm:$0xff] }
 0x537   : > { %2905 = vmatprep.mubr.f32.mxu1 %v2770_v37  ;;  %v7084_v9 = vpack.c.bf16 %v2937_v5, %v2933_v4  ;;  %v2949_v37 = vld [vmem:[%s9487_s10 + $0x40] sm:$0xff] }
 0x538   : > { %2906 = vmatmul.mubr.f32.vlgmr.msra.gmra.mrb[22].mxu1 %v2769_v38  ;;  %v2953_v38 = vld [vmem:[%s9487_s10 + $0x60] sm:$0x3f] }
 0x539   : > { %3187 = vmatprep.mubr.f32.mxu1 %v7868_v8  ;;  %7090 = vmatpush1.bf16.msra.mxu1 %v7089_v2 }
 0x53a   : > { %7093 = vmatprep.subr.msk.bf16.mxu1 %vm8190_vm3, %v7091_v19 }
 0x53d   : > { %7096 = vmatpush1.bf16.msk.msra.mxu1 %vm8190_vm3, %v7094_v14  ;;  %v2948_v14 = vld [vmem:[%s9487_s10 + $0x38] sm:$0xff] }
 0x5fb   : > { %v6465_v39 = vpop.f32.mrb[22].mxu0 }
 0x5fc   : > { %v6466_v30 = vpop.f32.mrb[23].mxu0 }
 0x5fd   : > { %v6467_v43 = vadd.f32 %v6466_v30, %v6465_v39  ;;  %v7104_v39 = vpack.c.bf16 %v2953_v38, %v2949_v37  ;;  %v8565_v30 = vld [vmem:[%s9488_s26] sm:$0xff] }
 0x5ff   : > { %v2838_v42 = vadd.f32 %v6467_v43, %v8204_v22  ;;  %v2926_v22 = vld [vmem:[%s9486_s9 + $0x8] sm:$0xff] }
 0x600   : > { %v7077_v54 = vpack.c.bf16 %v2930_v52, %v2926_v22  ;;  %v8571_v43 = vld [vmem:[%s9488_s26 + $0x8] sm:$0x3]  ;;  %v7872_v52 = vmov 0.0|0.0   ;;  %s5926_s26 = sshll.u32 %s730_s21, 4  ;;  %s9249_s26 = int_to_ptr.vmem [resolvable:$true] %s5926_s26 }
 0x602   : > { %7078 = vmatprep.subr.bf16.mxu0 %v7077_v54 }
 0x603   : > { %7080 = vmatpush1.bf16.msra.mxu0 %v7079_v60 }
 0x604   : > { %7083 = vmatprep.subr.msk.bf16.mxu0 %vm8190_vm3, %v7081_v7 }
 0x607   : > { %7086 = vmatpush1.bf16.msk.msra.mxu0 %vm8190_vm3, %v7084_v9 }
 0x608   : > { %7098 = vmatprep.subr.bf16.mxu0 %v7097_v24  ;;  %v2943_v24 = vld [vmem:[%s9487_s10 + $0x10] sm:$0xff] }
 0x60b   : > { %v6500_v40 = vpop.f32.mrb[22].mxu1 }
 0x60c   : > { %v6501_v41 = vpop.f32.mrb[23].mxu1 }
 0x60d   : > { %v6502_v44 = vadd.f32 %v6501_v41, %v6500_v40  ;;  %v2958_v40 = vld [vmem:[%s8160_s14 + $0x8] sm:$0xff] }
 0x60e   : > { %v2962_v41 = vld [vmem:[%s8160_s14 + $0x28] sm:$0xff] }
 0x60f   : > { %v2908_v45 = vadd.f32 %v6502_v44, %v2838_v42  ;;  %v7117_v42 = vpack.c.bf16 %v2962_v41, %v2958_v40  ;;  %v2957_v44 = vld [vmem:[%s8160_s14] sm:$0xff]  ;;  %v2963_v40 = vld [vmem:[%s8160_s14 + $0x30] sm:$0xff]  ;;  %v2968_v41 = vld [vmem:[%s8160_s14 + $0x58] sm:$0xff] }
 0x611   : > { %v2911_v46 = vsel %vm931_vm4, %v2908_v45, 0.0 }
 0x612   : > { %2912 = vadd.xlane.f32.xlu0 %v2911_v46 }
 0x69f   : > { %v2913_v47 = vpop.xlane.xlu0 %2912 }
 0x6a0   : > { %v2915_v48 = vmul.f32 0.033333335, %v2913_v47  ;;  %v2966_v47 = vld [vmem:[%s8160_s14 + $0x48] sm:$0xff] }
 0x6a2   : > { %v2916_v49 = vsub.f32 %v2908_v45, %v2915_v48  ;;  %v2961_v45 = vld [vmem:[%s8160_s14 + $0x20] sm:$0xff]  ;;  %v2970_v48 = vld [vmem:[%s8160_s14 + $0x68] sm:$0x3f] }
 0x6a3   : > { %v7119_v46 = vpack.c.bf16 %v2961_v45, %v2957_v44 }
 0x6a4   : > { %v2917_v50 = vmul.f32 %v2916_v49, %v2916_v49 }
 0x6a6   : > { %v2918_v51 = vsel %vm931_vm4, %v2917_v50, 0.0  ;;  %v2965_v50 = vld [vmem:[%s8160_s14 + $0x40] sm:$0xff] }
 0x6a7   : > { %2919 = vadd.xlane.f32.xlu1 %v2918_v51  ;;  %v2969_v51 = vld [vmem:[%s8160_s14 + $0x60] sm:$0x3f] }
 0x6a8   : > { %v7124_v22 = vpack.c.bf16 %v2969_v51, %v2965_v50 }
 0x734   : > { %v2920_v25 = vpop.xlane.xlu1 %2919 }
 0x735   : > { %v2921_v26 = vmul.f32 0.033333335, %v2920_v25  ;;  %v7107_v25 = vpack.c.bf16 %v2948_v14, %v2944_v23 }
 0x737   : > { %v2922_v27 = vadd.f32 1e-05, %v2921_v26  ;;  %v2947_v26 = vld [vmem:[%s9487_s10 + $0x30] sm:$0xff]  ;;  %7108 = vmatprep.subr.bf16.mxu1 %v7107_v25 }
 0x738   : > { %v7109_v29 = vpack.c.bf16 %v2947_v26, %v2943_v24 }
 0x739   : > { %7650 = vrsqrt.f32 %v2922_v27  ;;  %v2952_v27 = vld [vmem:[%s9487_s10 + $0x58] sm:$0xff] }
 0x73a   : > { %v7111_v31 = vpack.c.bf16 %v2956_v28, %v2952_v27 }
 0x743   : > { %v7651_v33 = vpop.eup %7650 }
 0x744   : > { %v8550_v35 = vmul.f32 %v7651_v33, %v2916_v49  ;;  %v7121_v49 = vpack.c.bf16 %v2970_v48, %v2966_v47  ;;  %v2955_v33 = vld [vmem:[%s9487_s10 + $0x70] sm:$0x3f]  ;;  %s7433_s10 = smul.u32 6, %s9496_s6 }
 0x745   : > { %v7114_v37 = vpack.c.bf16 %v2955_v33, %v2951_v32  ;;  %v2971_v47 = vld [vmem:[%s8160_s14 + $0x70] sm:$0x3f] }
 0x746   : > { %6310 = vmatmul.mubr.msk.f32.vlgmr.msra.gmra.mrb[24].mxu0 %vm931_vm4, %v8550_v35  ;;  %6313 = vmatmul.mubr.msk.f32.vlgmr.msra.gmra.mrb[24].mxu1 %vm931_vm4, %v8550_v35  ;;  %s9247_s28 = sadd.s32 %s7850_s27, %s7433_s10  ;;  %s7886_s27 = smov [#allocation5]  }
 0x747   : > { %7100 = vmatpush1.bf16.msra.mxu0 %v7099_v34  ;;  %3280 = vmatprep.mubr.f32.mxu0 %v7868_v8  ;;  %v2960_v34 = vld [vmem:[%s8160_s14 + $0x18] sm:$0xff]  ;;  %s6386_s13 = sshll.u32 %s9247_s28, 7 }
 0x748   : > { %7103 = vmatprep.subr.msk.bf16.mxu0 %vm8190_vm3, %v7101_v36  ;;  %3357 = vmatprep.mubr.f32.mxu1 %v7868_v8  ;;  %v2964_v36 = vld [vmem:[%s8160_s14 + $0x38] sm:$0xff] }
 0x749   : > { %7110 = vmatpush1.bf16.msra.mxu1 %v7109_v29  ;;  %v7127_v38 = vpack.c.bf16 %v2964_v36, %v2960_v34 }
 0x74a   : > { %7113 = vmatprep.subr.msk.bf16.mxu1 %vm8190_vm3, %v7111_v31 }
 0x74b   : > { %7106 = vmatpush1.bf16.msk.msra.mxu0 %vm8190_vm3, %v7104_v39  ;;  %v2959_v39 = vld [vmem:[%s8160_s14 + $0x10] sm:$0xff] }
 0x74c   : > { %7118 = vmatprep.subr.bf16.mxu0 %v7117_v42  ;;  %v2972_v42 = vld [vmem:[%s8160_s14 + $0x78] sm:$0x3f]  ;;  %v7129_v44 = vpack.c.bf16 %v2963_v40, %v2959_v39 }
 0x74d   : > { %7116 = vmatpush1.bf16.msk.msra.mxu1 %vm8190_vm3, %v7114_v37  ;;  %v7131_v45 = vpack.c.bf16 %v2972_v42, %v2968_v41 }
 0x74e   : > { %6316 = vmatmul.mubr.msk.f32.vlgmr.msra.gmra.mrb[26].mxu0 %vm931_vm4, %v8565_v30  ;;  %7128 = vmatprep.subr.bf16.mxu1 %v7127_v38 }
 0x74f   : > { %3286 = vmatprep.mubr.f32.mxu0 %v7868_v8  ;;  %7120 = vmatpush1.bf16.msra.mxu0 %v7119_v46  ;;  %v2967_v46 = vld [vmem:[%s8160_s14 + $0x50] sm:$0xff]  ;;  %s7877_s14 = smov 48  }
 0x750   : > { %7123 = vmatprep.subr.msk.bf16.mxu0 %vm8190_vm3, %v7121_v49  ;;  %6320 = vmatmul.mubr.msk.f32.vlgmr.msra.gmra.mrb[26].mxu1 %vm931_vm4, %v8565_v30  ;;  %v7134_v48 = vpack.c.bf16 %v2971_v47, %v2967_v46 }
 0x751   : > { %7130 = vmatpush1.bf16.msra.mxu1 %v7129_v44  ;;  %3363 = vmatprep.mubr.f32.mxu1 %v7868_v8 }
 0x752   : > { %6317 = vmatmul.mubr.msk.f32.gmra.mrb[28].mxu0 %vm931_vm4, %v8571_v43  ;;  %7133 = vmatprep.subr.msk.bf16.mxu1 %vm8190_vm3, %v7131_v45 }
 0x753   : > { %3446 = vmatprep.mubr.f32.mxu0 %v7868_v8  ;;  %7126 = vmatpush1.bf16.msk.msra.mxu0 %vm8190_vm3, %v7124_v22 }
 0x754   : > { %7137 = vmatprep.subr.bf16.mxu0 %v7872_v52  ;;  %6321 = vmatmul.mubr.msk.f32.gmra.mrb[28].mxu1 %vm931_vm4, %v8571_v43 }
 0x755   : > { %7136 = vmatpush1.bf16.msk.msra.mxu1 %vm8190_vm3, %v7134_v48  ;;  %3523 = vmatprep.mubr.f32.mxu1 %v7868_v8 }
 0x756   : > { %6324 = vmatmul.mubr.msk.f32.vlgmr.msra.gmra.mrb[30].mxu0 %vm931_vm4, %v8565_v30  ;;  %7141 = vmatprep.subr.bf16.mxu1 %v7872_v52 }
 0x757   : > { %3452 = vmatprep.mubr.f32.mxu0 %v7868_v8 }
 0x758   : > { %6328 = vmatmul.mubr.msk.f32.vlgmr.msra.gmra.mrb[30].mxu1 %vm931_vm4, %v8565_v30 }
 0x759   : > { %3529 = vmatprep.mubr.f32.mxu1 %v7868_v8 }
 0x75a   : > { %6325 = vmatmul.mubr.msk.f32.gmra.mrb[32].mxu0 %vm931_vm4, %v8571_v43 }
 0x75b   : > { %6845 = vmatprep.mubr.msk.f32.mxu0 %vm7870_vm5, %v7868_v8 }
 0x75c   : > { %6329 = vmatmul.mubr.msk.f32.gmra.mrb[32].mxu1 %vm931_vm4, %v8571_v43  ;;  %v8700_v43 = vld [vmem:[%s9494_s20] sm:$0xff] }
 0x75d   : > { %6852 = vmatprep.mubr.msk.f32.mxu1 %vm7870_vm5, %v7868_v8  ;;  %vm818_vm12 = vcmp.gt.f32.partialorder %v8700_v43, 0.5 }
 0x819   : > { %v3118_v53 = vpop.f32.mrb[24].mxu0  ;;  %v8596_v54 = vpop.f32.mrb[24].mxu1 }
 0x81a   : > { %v3194_v56 = vmul.f32 0.125, %v3118_v53  ;;  %v8598_v57 = vpop.f32.mrb[25].mxu0  ;;  %v8600_v58 = vpop.f32.mrb[25].mxu1 }
 0x81b   : > { %v3195_v14 = vmul.f32 0.125, %v8598_v57 }
 0x81c   : > { %3705 = vrot.lane.b32.xlu1 %v3194_v56, %s7871_s3 }
 0x821   : > { %v3282_v60 = vpop.f32.mrb[26].mxu0 }
 0x822   : > { %v8603_v61 = vpop.f32.mrb[27].mxu0 }
 0x823   : > { %v8719_v39 = vpop.f32.mrb[26].mxu1 }
 0x824   : > { %v8723_v40 = vpop.f32.mrb[27].mxu1 }
 0x825   : > { %v3288_v63 = vpop.f32.mrb[28].mxu0 }
 0x826   : > { %v7568_v1 = vpack.i.bf16 %v3288_v63, %v3282_v60  ;;  %v7138_v2 = vpack.c.bf16 %v3288_v63, %v3282_v60  ;;  %v8611_v15 = vpop.f32.mrb[29].mxu0 }
 0x827   : > { %v7578_v4 = vpack.i.bf16 %v8611_v15, %v8603_v61  ;;  %v7154_v5 = vpack.c.bf16 %v8611_v15, %v8603_v61  ;;  %v8729_v41 = vpop.f32.mrb[28].mxu1 }
 0x828   : > { %7569 = vrot.lane.b32.xlu0 %v7568_v1, %s7871_s3  ;;  %7140 = vmatpush3.bf16.xpose.msk.msra.mxu0 %vm8607_vm9, %v7138_v2  ;;  %v7588_v42 = vpack.i.bf16 %v8729_v41, %v8719_v39  ;;  %v7170_v44 = vpack.c.bf16 %v8729_v41, %v8719_v39  ;;  %v8736_v45 = vpop.f32.mrb[29].mxu1 }
 0x829   : > { %7145 = vmatprep.subr.bf16.mxu0 %v7872_v52  ;;  %v8624_v7 = vpop.f32.mrb[30].mxu0  ;;  %v7598_v46 = vpack.i.bf16 %v8736_v45, %v8723_v40  ;;  %v7186_v47 = vpack.c.bf16 %v8736_v45, %v8723_v40 }
 0x82a   : > { %v8626_v9 = vpop.f32.mrb[31].mxu0 }
 0x82b   : > { %v8742_v48 = vpop.f32.mrb[30].mxu1 }
 0x82d   : > { %v8628_v12 = vpop.f32.mrb[32].mxu0 }
 0x82e   : > { %v7573_v17 = vpack.i.bf16 %v8628_v12, %v8624_v7  ;;  %v7142_v18 = vpack.c.bf16 %v8628_v12, %v8624_v7  ;;  %v8634_v19 = vpop.f32.mrb[33].mxu0 }
 0x82f   : > { %6846 = vmatmul.mubr.msk.f32.vlgmr.msra.gmra.mrb[34].mxu0 %vm1402_vm6, %v3194_v56  ;;  %v7583_v20 = vpack.i.bf16 %v8634_v19, %v8626_v9  ;;  %v7158_v21 = vpack.c.bf16 %v8634_v19, %v8626_v9 }
 0x830   : > { %6859 = vmatprep.mubr.msk.f32.mxu0 %vm7870_vm5, %v7868_v8  ;;  %7144 = vmatpush3.bf16.msk.msra.mxu1 %vm8672_vm11, %v7142_v18 }
 0x831   : > { %7149 = vmatprep.subr.bf16.mxu1 %v7872_v52 }
 0x88e   : > { %v3706_v30 = vpop.permute.xlu1 %3705 }
 0x89a   : > { %v7570_v50 = vpop.permute.xlu0 %7569 }
 0x89b   : > { %v7572_v51 = vunpack.i.h.bf16 %v7570_v50  ;;  %v7571_v22 = vunpack.i.l.bf16 %v7570_v50  ;;  %v8744_v50 = vpop.f32.mrb[31].mxu1 }
 0x89d   : > { %v7146_v53 = vpack.c.bf16 %v7572_v51, %v7571_v22  ;;  %v8746_v51 = vpop.f32.mrb[32].mxu1 }
 0x89e   : > { %v7593_v22 = vpack.i.bf16 %v8746_v51, %v8742_v48 }
 0x89f   : > { %7148 = vmatpush3.bf16.xpose.msk.msra.mxu0 %vm8607_vm9, %v7146_v53  ;;  %v7174_v53 = vpack.c.bf16 %v8746_v51, %v8742_v48 }
 0x8a0   : > { %7157 = vmatprep.subr.bf16.mxu0 %v7872_v52 }
 0x8a6   : > { %6860 = vmatmul.mubr.msk.f32.vlgmr.msra.gmra.mrb[36].mxu0 %vm1402_vm6, %v3706_v30  ;;  %v8752_v30 = vpop.f32.mrb[33].mxu1 }
 0x8a7   : > { %7160 = vmatpush3.bf16.msk.msra.mxu0 %vm8672_vm11, %v7158_v21  ;;  %6880 = vmatprep.mubr.msk.f32.mxu0 %vm7870_vm5, %v7868_v8 }
 0x8a8   : > { %7161 = vmatprep.subr.bf16.mxu0 %v7872_v52 }
 0x902   : > { %v3611_v56 = vpop.f32.mrb[34].mxu0 }
 0x903   : > { %v3615_v60 = vsel %vm818_vm12, -10000.0, %v3611_v56  ;;  %v6847_v63 = vpop.f32.mrb[35].mxu0  ;;  %v7603_v56 = vpack.i.bf16 %v8752_v30, %v8744_v50 }
 0x904   : > { %v3617_v1 = vsel %vm3616_vm13, %v3615_v60, -inf }
 0x905   : > { %3618 = vmax.xlane.f32.xlu0 %v3617_v1 }
 0x979   : > { %v3783_v2 = vpop.f32.mrb[36].mxu0 }
 0x97a   : > { %v3787_v18 = vsel %vm818_vm12, -10000.0, %v3783_v2  ;;  %v6861_v21 = vpop.f32.mrb[37].mxu0 }
 0x97b   : > { %v3788_v23 = vsel %vm3616_vm13, %v3787_v18, -inf }
 0x97c   : > { %3789 = vmax.xlane.f32.xlu1 %v3788_v23 }
 0x98d   : > { %7574 = vrot.lane.b32.xlu1 %v7573_v17, %s7871_s3 }
 0x991   : > { %4047 = vrot.lane.b32.xlu1 %v3195_v14, %s7871_s3 }
 0x992   : > { %v3619_v24 = vpop.xlane.xlu0 %3618 }
 0x993   : > { %v3620_v25 = vsub.f32 %v3615_v60, %v3619_v24  ;;  %v7190_v60 = vpack.c.bf16 %v8752_v30, %v8744_v50  ;;  %v2989_v30 = vld [vmem:[%s8165_s18 + $0x80] sm:$0xff] }
 0x995   : > { %v3621_v26 = vmul.f32 1.442695, %v3620_v25 }
 0x997   : > { %7652 = vpow2.f32 %v3621_v26 }
 0x9a1   : > { %v7653_v27 = vpop.eup %7652 }
 0x9a2   : > { %v3623_v28 = vsel %vm3616_vm13, %v7653_v27, 0.0 }
 0x9a3   : > { %3624 = vadd.xlane.f32.xlu0 %v3623_v28 }
 0xa09   : > { %v3790_v29 = vpop.xlane.xlu1 %3789 }
 0xa0a   : > { %v3791_v31 = vsub.f32 %v3787_v18, %v3790_v29 }
 0xa0c   : > { %v3792_v32 = vmul.f32 1.442695, %v3791_v31 }
 0xa0d   : > { %v7575_v57 = vpop.permute.xlu1 %7574 }
 0xa0e   : > { %7654 = vpow2.f32 %v3792_v32  ;;  %v7577_v17 = vunpack.i.h.bf16 %v7575_v57  ;;  %v7576_v34 = vunpack.i.l.bf16 %v7575_v57 }
 0xa10   : > { %v7150_v38 = vpack.c.bf16 %v7577_v17, %v7576_v34 }
 0xa11   : > { %v4048_v61 = vpop.permute.xlu1 %4047 }
 0xa18   : > { %v7655_v33 = vpop.eup %7654 }
 0xa19   : > { %v3794_v7 = vsel %vm3616_vm13, %v7655_v33, 0.0 }
 0xa1a   : > { %3795 = vadd.xlane.f32.xlu0 %v3794_v7 }
 0xa30   : > { %v3625_v12 = vpop.xlane.xlu0 %3624 }
 0xa31   : > { %7656 = vrcp.f32 %v3625_v12 }
 0xa3b   : > { %v7657_v36 = vpop.eup %7656 }
 0xa3c   : > { %v8717_v37 = vmul.f32 %v7657_v36, %v7653_v27 }
 0xa3e   : > { %6853 = vmatmul.mubr.msk.f32.vlgmr.msra.gmra.mrb[34].mxu1 %vm3616_vm13, %v8717_v37 }
 0xa3f   : > { %7152 = vmatpush3.bf16.msk.msra.mxu1 %vm8672_vm11, %v7150_v38  ;;  %6866 = vmatprep.mubr.msk.f32.mxu1 %vm7870_vm5, %v7868_v8 }
 0xa40   : > { %7153 = vmatprep.subr.bf16.mxu1 %v7872_v52 }
 0xaa7   : > { %v3796_v63 = vpop.xlane.xlu0 %3795 }
 0xaa8   : > { %7658 = vrcp.f32 %v3796_v63 }
 0xab2   : > { %v7659_v1 = vpop.eup %7658 }
 0xab3   : > { %v8758_v2 = vmul.f32 %v7659_v1, %v7655_v33 }
 0xab5   : > { %6867 = vmatmul.mubr.msk.f32.vlgmr.msra.gmra.mrb[36].mxu1 %vm3616_vm13, %v8758_v2 }
 0xab6   : > { %7156 = vmatpush3.bf16.xpose.msk.msra.mxu1 %vm8607_vm9, %v7154_v5  ;;  %6873 = vmatprep.mubr.msk.f32.mxu1 %vm7870_vm5, %v7868_v8 }
 0xab7   : > { %7165 = vmatprep.subr.bf16.mxu1 %v7872_v52 }
 0xabd   : > { %6874 = vmatmul.mubr.msk.f32.vlgmr.msra.gmra.mrb[38].mxu1 %vm1402_vm6, %v3195_v14 }
 0xabe   : > { %6894 = vmatprep.mubr.msk.f32.mxu1 %vm7870_vm5, %v7868_v8 }
 0xb11   : > { %v8773_v18 = vpop.f32.mrb[34].mxu1 }
 0xb12   : > { %v6854_v21 = vpop.f32.mrb[35].mxu1 }
 0xb88   : > { %v8775_v23 = vpop.f32.mrb[36].mxu1 }
 0xb89   : > { %v6868_v24 = vpop.f32.mrb[37].mxu1 }
 0xb90   : > { %v3955_v25 = vpop.f32.mrb[38].mxu1 }
 0xb91   : > { %v3959_v5 = vsel %vm818_vm12, -10000.0, %v3955_v25  ;;  %v6875_v26 = vpop.f32.mrb[39].mxu1 }
 0xb92   : > { %v3960_v27 = vsel %vm3616_vm13, %v3959_v5, -inf }
 0xb93   : > { %3961 = vmax.xlane.f32.xlu0 %v3960_v27 }
 0xc20   : > { %v3962_v28 = vpop.xlane.xlu0 %3961 }
 0xc21   : > { %v3963_v29 = vsub.f32 %v3959_v5, %v3962_v28 }
 0xc23   : > { %v3964_v14 = vmul.f32 1.442695, %v3963_v29 }
 0xc25   : > { %7660 = vpow2.f32 %v3964_v14 }
 0xc2f   : > { %v7661_v31 = vpop.eup %7660 }
 0xc30   : > { %v3966_v32 = vsel %vm3616_vm13, %v7661_v31, 0.0 }
 0xc31   : > { %3967 = vadd.xlane.f32.xlu0 %v3966_v32 }
 0xc47   : > { %7579 = vrot.lane.b32.xlu0 %v7578_v4, %s7871_s3 }
 0xcbe   : > { %v3968_v33 = vpop.xlane.xlu0 %3967 }
 0xcbf   : > { %7662 = vrcp.f32 %v3968_v33 }
 0xcc2   : > { %v7580_v7 = vpop.permute.xlu0 %7579 }
 0xcc3   : > { %v7582_v12 = vunpack.i.h.bf16 %v7580_v7  ;;  %v7581_v57 = vunpack.i.l.bf16 %v7580_v7 }
 0xcc5   : > { %v7162_v36 = vpack.c.bf16 %v7582_v12, %v7581_v57 }
 0xcc9   : > { %v7663_v17 = vpop.eup %7662 }
 0xcca   : > { %v8785_v34 = vmul.f32 %v7663_v17, %v7661_v31 }
 0xccc   : > { %6881 = vmatmul.mubr.msk.f32.vlgmr.msra.gmra.mrb[38].mxu0 %vm3616_vm13, %v8785_v34 }
 0xccd   : > { %7164 = vmatpush3.bf16.xpose.msk.msra.mxu0 %vm8607_vm9, %v7162_v36  ;;  %6887 = vmatprep.mubr.msk.f32.mxu0 %vm7870_vm5, %v7868_v8 }
 0xcce   : > { %7173 = vmatprep.subr.bf16.mxu0 %v7872_v52 }
 0xcd4   : > { %6888 = vmatmul.mubr.msk.f32.vlgmr.msra.gmra.mrb[40].mxu0 %vm1402_vm6, %v4048_v61 }
 0xcd5   : > { %7176 = vmatpush3.bf16.msk.msra.mxu0 %vm8672_vm11, %v7174_v53  ;;  %6908 = vmatprep.mubr.msk.f32.mxu0 %vm7870_vm5, %v7868_v8  ;;  %v3196_v53 = vmul.f32 0.125, %v8596_v54 }
 0xcd6   : > { %7177 = vmatprep.subr.bf16.mxu0 %v7872_v52 }
 0xd9f   : > { %v8800_v15 = vpop.f32.mrb[38].mxu0 }
 0xda0   : > { %v6882_v4 = vpop.f32.mrb[39].mxu0 }
 0xda7   : > { %v4125_v38 = vpop.f32.mrb[40].mxu0 }
 0xda8   : > { %v4129_v63 = vsel %vm818_vm12, -10000.0, %v4125_v38  ;;  %v6889_v1 = vpop.f32.mrb[41].mxu0 }
 0xda9   : > { %v4130_v21 = vsel %vm3616_vm13, %v4129_v63, -inf }
 0xdaa   : > { %4131 = vmax.xlane.f32.xlu1 %v4130_v21 }
 0xdbb   : > { %7584 = vrot.lane.b32.xlu1 %v7583_v20, %s7871_s3 }
 0xdbf   : > { %4389 = vrot.lane.b32.xlu1 %v3196_v53, %s7871_s3 }
 0xe37   : > { %v4132_v24 = vpop.xlane.xlu1 %4131 }
 0xe38   : > { %v4133_v25 = vsub.f32 %v4129_v63, %v4132_v24 }
 0xe3a   : > { %v4134_v5 = vmul.f32 1.442695, %v4133_v25 }
 0xe3b   : > { %v7585_v26 = vpop.permute.xlu1 %7584 }
 0xe3c   : > { %7664 = vpow2.f32 %v4134_v5  ;;  %v7587_v27 = vunpack.i.h.bf16 %v7585_v26  ;;  %v7586_v28 = vunpack.i.l.bf16 %v7585_v26 }
 0xe3e   : > { %v7166_v29 = vpack.c.bf16 %v7587_v27, %v7586_v28 }
 0xe3f   : > { %v4390_v39 = vpop.permute.xlu1 %4389 }
 0xe40   : > { %7168 = vmatpush3.bf16.msk.msra.mxu1 %vm8672_vm11, %v7166_v29 }
 0xe41   : > { %7169 = vmatprep.subr.bf16.mxu1 %v7872_v52 }
 0xe46   : > { %v7665_v14 = vpop.eup %7664 }
 0xe47   : > { %v4136_v9 = vsel %vm3616_vm13, %v7665_v14, 0.0 }
 0xe48   : > { %4137 = vadd.xlane.f32.xlu0 %v4136_v9 }
 0xed5   : > { %v4138_v54 = vpop.xlane.xlu0 %4137 }
 0xed6   : > { %7666 = vrcp.f32 %v4138_v54 }
 0xee0   : > { %v7667_v19 = vpop.eup %7666 }
 0xee1   : > { %v8815_v20 = vmul.f32 %v7667_v19, %v7665_v14 }
 0xee3   : > { %6895 = vmatmul.mubr.msk.f32.vlgmr.msra.gmra.mrb[40].mxu1 %vm3616_vm13, %v8815_v20 }
 0xee4   : > { %7172 = vmatpush3.bf16.xpose.msk.msra.mxu1 %vm8607_vm9, %v7170_v44  ;;  %6901 = vmatprep.mubr.msk.f32.mxu1 %vm7870_vm5, %v7868_v8 }
 0xee5   : > { %7181 = vmatprep.subr.bf16.mxu1 %v7872_v52 }
 0xeeb   : > { %6902 = vmatmul.mubr.msk.f32.vlgmr.msra.gmra.mrb[42].mxu1 %vm1402_vm6, %v3196_v53 }
 0xeec   : > { %6922 = vmatprep.mubr.msk.f32.mxu1 %vm7870_vm5, %v7868_v8 }
 0xfb6   : > { %v8830_v31 = vpop.f32.mrb[40].mxu1 }
 0xfb7   : > { %v7608_v32 = vpack.i.bf16 %v8775_v23, %v8830_v31  ;;  %v6896_v33 = vpop.f32.mrb[41].mxu1 }
 0xfbe   : > { %v4297_v7 = vpop.f32.mrb[42].mxu1 }
 0xfbf   : > { %v4301_v44 = vsel %vm818_vm12, -10000.0, %v4297_v7  ;;  %v6903_v12 = vpop.f32.mrb[43].mxu1 }
 0xfc0   : > { %v4302_v57 = vsel %vm3616_vm13, %v4301_v44, -inf  ;;  %v3197_v12 = vmul.f32 0.125, %v8600_v58 }
 0xfc1   : > { %4303 = vmax.xlane.f32.xlu0 %v4302_v57 }
0x104e   : > { %v4304_v17 = vpop.xlane.xlu0 %4303 }
0x104f   : > { %v4305_v36 = vsub.f32 %v4301_v44, %v4304_v17 }
0x1051   : > { %v4306_v61 = vmul.f32 1.442695, %v4305_v36 }
0x1053   : > { %7668 = vpow2.f32 %v4306_v61 }
0x105d   : > { %v7669_v4 = vpop.eup %7668 }
0x105e   : > { %v4308_v38 = vsel %vm3616_vm13, %v7669_v4, 0.0 }
0x105f   : > { %4309 = vadd.xlane.f32.xlu0 %v4308_v38 }
0x1075   : > { %7589 = vrot.lane.b32.xlu0 %v7588_v42, %s7871_s3 }
0x10ec   : > { %v4310_v63 = vpop.xlane.xlu0 %4309 }
0x10ed   : > { %7670 = vrcp.f32 %v4310_v63 }
0x10f0   : > { %v7590_v1 = vpop.permute.xlu0 %7589 }
0x10f1   : > { %v7592_v21 = vunpack.i.h.bf16 %v7590_v1  ;;  %v7591_v53 = vunpack.i.l.bf16 %v7590_v1 }
0x10f3   : > { %v7178_v5 = vpack.c.bf16 %v7592_v21, %v7591_v53 }
0x10f7   : > { %v7671_v24 = vpop.eup %7670 }
0x10f8   : > { %v8842_v25 = vmul.f32 %v7671_v24, %v7669_v4 }
0x10fa   : > { %6909 = vmatmul.mubr.msk.f32.vlgmr.msra.gmra.mrb[42].mxu0 %vm3616_vm13, %v8842_v25 }
0x10fb   : > { %7180 = vmatpush3.bf16.xpose.msk.msra.mxu0 %vm8607_vm9, %v7178_v5  ;;  %6915 = vmatprep.mubr.msk.f32.mxu0 %vm7870_vm5, %v7868_v8 }
0x10fc   : > { %7189 = vmatprep.subr.bf16.mxu0 %v7872_v52 }
0x1102   : > { %6916 = vmatmul.mubr.msk.f32.vlgmr.msra.gmra.mrb[44].mxu0 %vm1402_vm6, %v4390_v39 }
0x1103   : > { %7192 = vmatpush3.bf16.msk.msra.mxu0 %vm8672_vm11, %v7190_v60  ;;  %6936 = vmatprep.mubr.msk.f32.mxu0 %vm7870_vm5, %v7868_v8 }
0x1104   : > { %7193 = vmatprep.subr.bf16.mxu0 %v7872_v52 }
0x11cd   : > { %v8860_v41 = vpop.f32.mrb[42].mxu0 }
0x11ce   : > { %v6910_v42 = vpop.f32.mrb[43].mxu0 }
0x11d5   : > { %v4467_v26 = vpop.f32.mrb[44].mxu0 }
0x11d6   : > { %v4471_v27 = vsel %vm818_vm12, -10000.0, %v4467_v26  ;;  %v6917_v28 = vpop.f32.mrb[45].mxu0 }
0x11d7   : > { %v4472_v29 = vsel %vm3616_vm13, %v4471_v27, -inf }
0x11d8   : > { %4473 = vmax.xlane.f32.xlu1 %v4472_v29 }
0x11e9   : > { %7594 = vrot.lane.b32.xlu1 %v7593_v22, %s7871_s3 }
0x11ed   : > { %7599 = vrot.lane.b32.xlu1 %v7598_v46, %s7871_s3 }
0x1265   : > { %v4474_v60 = vpop.xlane.xlu1 %4473 }
0x1266   : > { %v4475_v14 = vsub.f32 %v4471_v27, %v4474_v60 }
0x1268   : > { %v4476_v9 = vmul.f32 1.442695, %v4475_v14 }
0x1269   : > { %v7595_v54 = vpop.permute.xlu1 %7594 }
0x126a   : > { %7672 = vpow2.f32 %v4476_v9  ;;  %v7597_v19 = vunpack.i.h.bf16 %v7595_v54  ;;  %v7596_v33 = vunpack.i.l.bf16 %v7595_v54 }
0x126c   : > { %v7182_v7 = vpack.c.bf16 %v7597_v19, %v7596_v33 }
0x126d   : > { %v7600_v1 = vpop.permute.xlu1 %7599 }
0x126e   : > { %7184 = vmatpush3.bf16.msk.msra.mxu1 %vm8672_vm11, %v7182_v7  ;;  %v7602_v21 = vunpack.i.h.bf16 %v7600_v1  ;;  %v7601_v53 = vunpack.i.l.bf16 %v7600_v1  ;;  %v2977_v1 = vld [vmem:[%s8165_s18 + $0x20] sm:$0xff] }
0x126f   : > { %7185 = vmatprep.subr.bf16.mxu1 %v7872_v52 }
0x1270   : > { %v7194_v39 = vpack.c.bf16 %v7602_v21, %v7601_v53  ;;  %v2978_v21 = vld [vmem:[%s8165_s18 + $0x28] sm:$0xff]  ;;  %v2995_v53 = vld [vmem:[%s8165_s18 + $0xb0] sm:$0xff] }
0x1274   : > { %v7673_v48 = vpop.eup %7672 }
0x1275   : > { %v4478_v51 = vsel %vm3616_vm13, %v7673_v48, 0.0 }
0x1276   : > { %4479 = vadd.xlane.f32.xlu0 %v4478_v51 }
0x1303   : > { %v4480_v22 = vpop.xlane.xlu0 %4479 }
0x1304   : > { %7674 = vrcp.f32 %v4480_v22 }
0x130e   : > { %v7675_v46 = vpop.eup %7674 }
0x130f   : > { %v8877_v44 = vmul.f32 %v7675_v46, %v7673_v48  ;;  %v2973_v46 = vld [vmem:[%s8165_s18] sm:$0xff] }
0x1311   : > { %6923 = vmatmul.mubr.msk.f32.vlgmr.msra.gmra.mrb[44].mxu1 %vm3616_vm13, %v8877_v44 }
0x1312   : > { %7188 = vmatpush3.bf16.xpose.msk.msra.mxu1 %vm8607_vm9, %v7186_v47  ;;  %6929 = vmatprep.mubr.msk.f32.mxu1 %vm7870_vm5, %v7868_v8 }
0x1313   : > { %7197 = vmatprep.subr.bf16.mxu1 %v7872_v52 }
0x1319   : > { %6930 = vmatmul.mubr.msk.f32.vlgmr.msra.gmra.mrb[46].mxu1 %vm1402_vm6, %v3197_v12 }
0x131a   : > { %6950 = vmatprep.mubr.msk.f32.mxu1 %vm7870_vm5, %v7868_v8 }
0x13e4   : > { %v8893_v57 = vpop.f32.mrb[44].mxu1 }
0x13e5   : > { %v6924_v17 = vpop.f32.mrb[45].mxu1 }
0x13e6   : > { %v2991_v17 = vld [vmem:[%s8165_s18 + $0x90] sm:$0xff] }
0x13ec   : > { %v4639_v36 = vpop.f32.mrb[46].mxu1 }
0x13ed   : > { %v4643_v40 = vsel %vm818_vm12, -10000.0, %v4639_v36  ;;  %v6931_v45 = vpop.f32.mrb[47].mxu1  ;;  %v2992_v36 = vld [vmem:[%s8165_s18 + $0x98] sm:$0xff] }
0x13ee   : > { %v4644_v47 = vsel %vm3616_vm13, %v4643_v40, -inf  ;;  %v7205_v45 = vpack.c.bf16 %v2992_v36, %v2991_v17  ;;  %v3004_v17 = vld [vmem:[%s8165_s18 + $0xf8] sm:$0xff] }
0x13ef   : > { %4645 = vmax.xlane.f32.xlu0 %v4644_v47  ;;  %v2975_v47 = vld [vmem:[%s8165_s18 + $0x10] sm:$0xff] }
0x147c   : > { %v4646_v61 = vpop.xlane.xlu0 %4645 }
0x147d   : > { %v4647_v52 = vsub.f32 %v4643_v40, %v4646_v61  ;;  %v2976_v61 = vld [vmem:[%s8165_s18 + $0x18] sm:$0xff] }
0x147f   : > { %v4648_v4 = vmul.f32 1.442695, %v4647_v52  ;;  %v2993_v52 = vld [vmem:[%s8165_s18 + $0xa0] sm:$0xff] }
0x1481   : > { %7676 = vpow2.f32 %v4648_v4  ;;  %v2994_v4 = vld [vmem:[%s8165_s18 + $0xa8] sm:$0xff] }
0x148b   : > { %v7677_v58 = vpop.eup %7676 }
0x148c   : > { %v4650_v38 = vsel %vm3616_vm13, %v7677_v58, 0.0 }
0x148d   : > { %4651 = vadd.xlane.f32.xlu0 %v4650_v38  ;;  %v7207_v38 = vpack.c.bf16 %v2976_v61, %v2975_v47 }
0x14a3   : > { %4731 = vrot.lane.b32.xlu0 %v3197_v12, %s7871_s3  ;;  %v2974_v12 = vld [vmem:[%s8165_s18 + $0x8] sm:$0xff] }
0x14a4   : > { %v7203_v31 = vpack.c.bf16 %v2974_v12, %v2973_v46  ;;  %v2986_v46 = vld [vmem:[%s8165_s18 + $0x68] sm:$0xff]  ;;  %v3003_v12 = vld [vmem:[%s8165_s18 + $0xf0] sm:$0xff] }
0x151a   : > { %v4652_v63 = vpop.xlane.xlu0 %4651 }
0x151b   : > { %7678 = vrcp.f32 %v4652_v63  ;;  %v7209_v63 = vpack.c.bf16 %v2994_v4, %v2993_v52  ;;  %v3021_v52 = vld [vmem:[%s8165_s18 + $0x180] sm:$0xff]  ;;  %v3022_v4 = vld [vmem:[%s8165_s18 + $0x188] sm:$0xff] }
0x151e   : > { %v4732_v42 = vpop.permute.xlu0 %4731 }
0x1525   : > { %v7679_v24 = vpop.eup %7678 }
0x1526   : > { %v8900_v5 = vmul.f32 %v7679_v24, %v7677_v58  ;;  %v2996_v24 = vld [vmem:[%s8165_s18 + $0xb8] sm:$0xff] }
0x1528   : > { %6937 = vmatmul.mubr.msk.f32.vlgmr.msra.gmra.mrb[46].mxu0 %vm3616_vm13, %v8900_v5 }
0x1529   : > { %7196 = vmatpush3.bf16.xpose.msk.msra.mxu0 %vm8607_vm9, %v7194_v39  ;;  %6943 = vmatprep.mubr.msk.f32.mxu0 %vm7870_vm5, %v7868_v8  ;;  %v7211_v39 = vpack.c.bf16 %v2978_v21, %v2977_v1  ;;  %v3023_v1 = vld [vmem:[%s8165_s18 + $0x190] sm:$0xff]  ;;  %vm4928_vm5 = vcmask 162816   ;;  %vm4936_vm9 = vcmask 572416  }
0x1530   : > { %6944 = vmatmul.mubr.msk.f32.vlgmr.msra.gmra.mrb[48].mxu0 %vm1402_vm6, %v4732_v42  ;;  %v7213_v42 = vpack.c.bf16 %v2996_v24, %v2995_v53  ;;  %v3007_v24 = vld [vmem:[%s8165_s18 + $0x110] sm:$0xff] }
0x15fb   : > { %v8909_v26 = vpop.f32.mrb[46].mxu0 }
0x15fc   : > { %v6938_v27 = vpop.f32.mrb[47].mxu0 }
0x15fd   : > { %v2980_v27 = vld [vmem:[%s8165_s18 + $0x38] sm:$0xff] }
0x1603   : > { %v4809_v28 = vpop.f32.mrb[48].mxu0 }
0x1604   : > { %v4813_v29 = vsel %vm818_vm12, -10000.0, %v4809_v28  ;;  %v6945_v60 = vpop.f32.mrb[49].mxu0  ;;  %v2997_v28 = vld [vmem:[%s8165_s18 + $0xc0] sm:$0xff] }
0x1605   : > { %v4814_v14 = vsel %vm3616_vm13, %v4813_v29, -inf }
0x1606   : > { %4815 = vmax.xlane.f32.xlu1 %v4814_v14 }
0x1617   : > { %7604 = vrot.lane.b32.xlu1 %v7603_v56, %s7871_s3  ;;  %v2990_v56 = vld [vmem:[%s8165_s18 + $0x88] sm:$0xff] }
0x1618   : > { %v7201_v51 = vpack.c.bf16 %v2990_v56, %v2989_v30  ;;  %v3002_v30 = vld [vmem:[%s8165_s18 + $0xe8] sm:$0xff] }
0x1693   : > { %v4816_v0 = vpop.xlane.xlu1 %4815 }
0x1694   : > { %v4817_v9 = vsub.f32 %v4813_v29, %v4816_v0  ;;  %v2998_v29 = vld [vmem:[%s8165_s18 + $0xc8] sm:$0xff]  ;;  %v2981_v0 = vld [vmem:[%s8165_s18 + $0x40] sm:$0xff] }
0x1695   : > { %v7217_v14 = vpack.c.bf16 %v2998_v29, %v2997_v28  ;;  %v3009_v28 = vld [vmem:[%s8165_s18 + $0x120] sm:$0xff]  ;;  %v3010_v29 = vld [vmem:[%s8165_s18 + $0x128] sm:$0xff] }
0x1696   : > { %v4818_v54 = vmul.f32 1.442695, %v4817_v9  ;;  %v2982_v9 = vld [vmem:[%s8165_s18 + $0x48] sm:$0xff] }
0x1697   : > { %v7605_v19 = vpop.permute.xlu1 %7604 }
0x1698   : > { %7680 = vpow2.f32 %v4818_v54  ;;  %v7607_v33 = vunpack.i.h.bf16 %v7605_v19  ;;  %v7606_v43 = vunpack.i.l.bf16 %v7605_v19  ;;  %v2999_v54 = vld [vmem:[%s8165_s18 + $0xd0] sm:$0xff]  ;;  %v3000_v19 = vld [vmem:[%s8165_s18 + $0xd8] sm:$0xff] }
0x169a   : > { %v7198_v7 = vpack.c.bf16 %v7607_v33, %v7606_v43  ;;  %v7219_v33 = vpack.c.bf16 %v2982_v9, %v2981_v0  ;;  %v7221_v43 = vpack.c.bf16 %v3000_v19, %v2999_v54  ;;  %v7243_v0 = vpack.c.bf16 %v3010_v29, %v3009_v28  ;;  %v3011_v54 = vld [vmem:[%s8165_s18 + $0x130] sm:$0xff]  ;;  %v3012_v19 = vld [vmem:[%s8165_s18 + $0x138] sm:$0xff] }
0x169c   : > { %7200 = vmatpush3.bf16.msk.msra.mxu1 %vm8672_vm11, %v7198_v7  ;;  %v2983_v7 = vld [vmem:[%s8165_s18 + $0x50] sm:$0xff] }
0x169d   : > { %7202 = vmatprep.subr.bf16.mxu1 %v7201_v51 }
0x16a2   : > { %v7681_v48 = vpop.eup %7680 }
0x16a3   : > { %v4820_v50 = vsel %vm3616_vm13, %v7681_v48, 0.0 }
0x16a4   : > { %4821 = vadd.xlane.f32.xlu0 %v4820_v50  ;;  %v3001_v50 = vld [vmem:[%s8165_s18 + $0xe0] sm:$0xff] }
0x16a5   : > { %v7225_v51 = vpack.c.bf16 %v3002_v30, %v3001_v50  ;;  %v3013_v50 = vld [vmem:[%s8165_s18 + $0x140] sm:$0xff]  ;;  %v3014_v30 = vld [vmem:[%s8165_s18 + $0x148] sm:$0xff] }
0x16ba   : > { %7609 = vrot.lane.b32.xlu0 %v7608_v32, %s7871_s3 }
0x1731   : > { %v4822_v49 = vpop.xlane.xlu0 %4821 }
0x1732   : > { %7682 = vrcp.f32 %v4822_v49  ;;  %v2985_v49 = vld [vmem:[%s8165_s18 + $0x60] sm:$0xff] }
0x1733   : > { %v7227_v36 = vpack.c.bf16 %v2986_v46, %v2985_v49  ;;  %v7251_v49 = vpack.c.bf16 %v3014_v30, %v3013_v50  ;;  %v5138_v30 = vld [vmem:[%s8170_s30 + $0xc8] sm:$0x3f] }
0x1735   : > { %v8927_v22 = vpop.permute.xlu0 %7609 }
0x1736   : > { %v7611_v40 = vunpack.i.l.bf16 %v8927_v22  ;;  %v7612_v47 = vunpack.i.h.bf16 %v8927_v22  ;;  %v3024_v22 = vld [vmem:[%s8165_s18 + $0x198] sm:$0xff] }
0x1737   : > { %v7237_v53 = vpack.c.bf16 %v3024_v22, %v3023_v1 }
0x1738   : > { %v4957_v58 = vsel %vm1402_vm6, %v8800_v15, %v7611_v40  ;;  %v2979_v15 = vld [vmem:[%s8165_s18 + $0x30] sm:$0xff]  ;;  %v7229_v40 = vpack.c.bf16 %v3004_v17, %v3003_v12  ;;  %v4956_v61 = vsel %vm1402_vm6, %v8773_v18, %v7612_v47  ;;  %v3025_v18 = vld [vmem:[%s8165_s18 + $0x1a0] sm:$0xff]  ;;  %v3016_v17 = vld [vmem:[%s8165_s18 + $0x158] sm:$0xff] }
0x1739   : > { %v7215_v60 = vpack.c.bf16 %v2980_v27, %v2979_v15  ;;  %v3015_v12 = vld [vmem:[%s8165_s18 + $0x150] sm:$0xff]  ;;  %v3018_v47 = vld [vmem:[%s8165_s18 + $0x168] sm:$0xff] }
0x173c   : > { %v7683_v23 = vpop.eup %7682 }
0x173d   : > { %v8934_v32 = vmul.f32 %v7683_v23, %v7681_v48  ;;  %v2984_v48 = vld [vmem:[%s8165_s18 + $0x58] sm:$0xff]  ;;  %v2987_v23 = vld [vmem:[%s8165_s18 + $0x70] sm:$0xff] }
0x173e   : > { %v7223_v56 = vpack.c.bf16 %v2984_v48, %v2983_v7  ;;  %v7247_v7 = vpack.c.bf16 %v3012_v19, %v3011_v54 }
0x173f   : > { %6951 = vmatmul.mubr.msk.f32.vlgmr.msra.gmra.mrb[48].mxu1 %vm3616_vm13, %v8934_v32 }
0x1740   : > { %7204 = vmatpush3.bf16.msra.mxu1 %v7203_v31  ;;  %5024 = vmatprep.mubr.f32.mxu1 %v4957_v58  ;;  %v2988_v31 = vld [vmem:[%s8165_s18 + $0x78] sm:$0xff]  ;;  %v3005_v58 = vld [vmem:[%s8165_s18 + $0x100] sm:$0xff] }
0x1741   : > { %7206 = vmatprep.subr.bf16.mxu1 %v7205_v45  ;;  %v7231_v45 = vpack.c.bf16 %v2988_v31, %v2987_v23  ;;  %v7255_v23 = vpack.c.bf16 %v3016_v17, %v3015_v12  ;;  %v5129_v12 = vld [vmem:[%s8170_s30 + $0x80] sm:$0xff] }
0x1742   : > { %v5137_v17 = vld [vmem:[%s8170_s30 + $0xc0] sm:$0x3f] }
0x1744   : > { %7208 = vmatpush3.bf16.msra.mxu1 %v7207_v38  ;;  %v7233_v38 = vpack.c.bf16 %v3022_v4, %v3021_v52  ;;  %v3035_v52 = vld [vmem:[%s8165_s18 + $0x1f0] sm:$0xff]  ;;  %v3036_v4 = vld [vmem:[%s8165_s18 + $0x1f8] sm:$0xff] }
0x1745   : > { %7210 = vmatprep.subr.bf16.mxu1 %v7209_v63  ;;  %v3006_v63 = vld [vmem:[%s8165_s18 + $0x108] sm:$0xff] }
0x1746   : > { %v7235_v21 = vpack.c.bf16 %v3006_v63, %v3005_v58  ;;  %7234 = vmatprep.subr.bf16.mxu0 %v7233_v38  ;;  %v7261_v58 = vpack.c.bf16 %v3036_v4, %v3035_v52  ;;  %v3019_v38 = vld [vmem:[%s8165_s18 + $0x170] sm:$0xff]  ;;  %v3020_v63 = vld [vmem:[%s8165_s18 + $0x178] sm:$0xff] }
0x1747   : > { %v7263_v1 = vpack.c.bf16 %v3020_v63, %v3019_v38  ;;  %v5120_v52 = vld [vmem:[%s8170_s30 + $0x38] sm:$0xff] }
0x1748   : > { %7212 = vmatpush3.bf16.msra.mxu1 %v7211_v39  ;;  %v3008_v39 = vld [vmem:[%s8165_s18 + $0x118] sm:$0xff]  ;;  %7236 = vmatpush3.bf16.msra.mxu0 %v7235_v21 }
0x1749   : > { %7214 = vmatprep.subr.bf16.mxu1 %v7213_v42  ;;  %v3026_v42 = vld [vmem:[%s8165_s18 + $0x1a8] sm:$0xff]  ;;  %v7239_v15 = vpack.c.bf16 %v3008_v39, %v3007_v24  ;;  %7238 = vmatprep.subr.bf16.mxu0 %v7237_v53  ;;  %v5128_v4 = vld [vmem:[%s8170_s30 + $0x78] sm:$0xff] }
0x174a   : > { %v7241_v27 = vpack.c.bf16 %v3026_v42, %v3025_v18 }
0x174c   : > { %7216 = vmatpush3.bf16.msra.mxu1 %v7215_v60  ;;  %v3027_v60 = vld [vmem:[%s8165_s18 + $0x1b0] sm:$0xff]  ;;  %7240 = vmatpush3.bf16.msra.mxu0 %v7239_v15 }
0x174d   : > { %7218 = vmatprep.subr.bf16.mxu1 %v7217_v14  ;;  %v3028_v14 = vld [vmem:[%s8165_s18 + $0x1b8] sm:$0xff]  ;;  %7242 = vmatprep.subr.bf16.mxu0 %v7241_v27 }
0x174e   : > { %v7245_v9 = vpack.c.bf16 %v3028_v14, %v3027_v60 }
0x1750   : > { %7220 = vmatpush3.bf16.msra.mxu1 %v7219_v33  ;;  %v3029_v33 = vld [vmem:[%s8165_s18 + $0x1c0] sm:$0xff]  ;;  %7244 = vmatpush3.bf16.msra.mxu0 %v7243_v0 }
0x1751   : > { %7222 = vmatprep.subr.bf16.mxu1 %v7221_v43  ;;  %v3030_v43 = vld [vmem:[%s8165_s18 + $0x1c8] sm:$0xff]  ;;  %7246 = vmatprep.subr.bf16.mxu0 %v7245_v9 }
0x1752   : > { %v7249_v48 = vpack.c.bf16 %v3030_v43, %v3029_v33  ;;  %v5115_v43 = vld [vmem:[%s8170_s30 + $0x10] sm:$0xff] }
0x1754   : > { %7224 = vmatpush3.bf16.msra.mxu1 %v7223_v56  ;;  %v3031_v56 = vld [vmem:[%s8165_s18 + $0x1d0] sm:$0xff]  ;;  %7248 = vmatpush3.bf16.msra.mxu0 %v7247_v7 }
0x1755   : > { %7226 = vmatprep.subr.bf16.mxu1 %v7225_v51  ;;  %v3032_v51 = vld [vmem:[%s8165_s18 + $0x1d8] sm:$0xff]  ;;  %7250 = vmatprep.subr.bf16.mxu0 %v7249_v48  ;;  %v5123_v7 = vld [vmem:[%s8170_s30 + $0x50] sm:$0xff]  ;;  %v5130_v48 = vld [vmem:[%s8170_s30 + $0x88] sm:$0xff] }
0x1756   : > { %v7253_v46 = vpack.c.bf16 %v3032_v51, %v3031_v56  ;;  %v7277_v50 = vpack.c.bf16 %v5123_v7, %v5115_v43  ;;  %v5132_v56 = vld [vmem:[%s8170_s30 + $0x98] sm:$0xff]  ;;  %v5514_v7 = vld [vmem:[%s8175_s23 + $0x190] sm:$0xff] }
0x1757   : > { %v5140_v51 = vld [vmem:[%s8170_s30 + $0xd8] sm:$0x3f] }
0x1758   : > { %7228 = vmatpush3.bf16.msra.mxu1 %v7227_v36  ;;  %v3033_v36 = vld [vmem:[%s8165_s18 + $0x1e0] sm:$0xff]  ;;  %7252 = vmatpush3.bf16.msra.mxu0 %v7251_v49  ;;  %v7269_v49 = vpack.c.bf16 %v5138_v30, %v5130_v48  ;;  %v5483_v43 = vld [vmem:[%s8175_s23 + $0x98] sm:$0xff] }
0x1759   : > { %7230 = vmatprep.subr.bf16.mxu1 %v7229_v40  ;;  %v3034_v40 = vld [vmem:[%s8165_s18 + $0x1e8] sm:$0xff]  ;;  %7254 = vmatprep.subr.bf16.mxu0 %v7253_v46  ;;  %v7279_v46 = vpack.c.bf16 %v5140_v51, %v5132_v56  ;;  %v5515_v48 = vld [vmem:[%s8175_s23 + $0x198] sm:$0xff]  ;;  %v5466_v56 = vld [vmem:[%s8175_s23 + $0x10] sm:$0xff] }
0x175a   : > { %v7257_v31 = vpack.c.bf16 %v3034_v40, %v3033_v36  ;;  %v5131_v36 = vld [vmem:[%s8170_s30 + $0x90] sm:$0xff]  ;;  %v7272_v40 = vpack.c.bf16 %v5137_v17, %v5129_v12  ;;  %v5467_v51 = vld [vmem:[%s8175_s23 + $0x18] sm:$0xff]  ;;  %v5484_v17 = vld [vmem:[%s8175_s23 + $0xa0] sm:$0xff] }
0x175b   : > { %v5499_v12 = vld [vmem:[%s8175_s23 + $0x118] sm:$0xff] }
0x175c   : > { %7232 = vmatpush3.bf16.msra.mxu1 %v7231_v45  ;;  %v3017_v45 = vld [vmem:[%s8165_s18 + $0x160] sm:$0xff]  ;;  %7256 = vmatpush3.bf16.msra.mxu0 %v7255_v23  ;;  %s7879_s18 = smov 20   ;;  %v5139_v23 = vld [vmem:[%s8170_s30 + $0xd0] sm:$0x3f] }
0x175d   : > { %7258 = vmatprep.subr.bf16.mxu0 %v7257_v31  ;;  %v5118_v31 = vld [vmem:[%s8170_s30 + $0x28] sm:$0xff] }
0x175f   : > { %5025 = vmatmul.mubr.f32.vlgmr.msra.gmra.mrb[50].mxu1 %v4956_v61  ;;  %v7259_v61 = vpack.c.bf16 %v3018_v47, %v3017_v45  ;;  %v5126_v45 = vld [vmem:[%s8170_s30 + $0x68] sm:$0xff]  ;;  %v7282_v47 = vpack.c.bf16 %v5139_v23, %v5131_v36  ;;  %v7311_v23 = vpack.c.bf16 %v5467_v51, %v5466_v56  ;;  %v5524_v56 = vld [vmem:[%s8175_s23 + $0x1e0] sm:$0xff] }
0x1760   : > { %5236 = vmatprep.mubr.f32.mxu1 %v7868_v8  ;;  %v5485_v36 = vld [vmem:[%s8175_s23 + $0xa8] sm:$0xff] }
0x1761   : > { %7260 = vmatpush3.bf16.msra.mxu0 %v7259_v61  ;;  %v7285_v61 = vpack.c.bf16 %v5126_v45, %v5118_v31  ;;  %v5468_v45 = vld [vmem:[%s8175_s23 + $0x20] sm:$0xff]  ;;  %v5525_v51 = vld [vmem:[%s8175_s23 + $0x1e8] sm:$0xff] }
0x1762   : > { %7262 = vmatprep.subr.bf16.mxu0 %v7261_v58  ;;  %v7295_v58 = vpack.c.bf16 %v5128_v4, %v5120_v52  ;;  %v5500_v4 = vld [vmem:[%s8175_s23 + $0x120] sm:$0xff] }
0x1765   : > { %7264 = vmatpush3.bf16.msra.mxu0 %v7263_v1 }
0x1812   : > { %v4902_v22 = vpop.f32.mrb[48].mxu1 }
0x1813   : > { %v7613_v21 = vpack.i.bf16 %v8893_v57, %v4902_v22  ;;  %v6952_v53 = vpop.f32.mrb[49].mxu1  ;;  %v5117_v22 = vld [vmem:[%s8170_s30 + $0x20] sm:$0xff] }
0x1814   : > { %v5119_v53 = vld [vmem:[%s8170_s30 + $0x30] sm:$0xff] }
0x1815   : > { %7614 = vrot.lane.b32.xlu1 %v7613_v21, %s7871_s3  ;;  %v5125_v21 = vld [vmem:[%s8170_s30 + $0x60] sm:$0xff]  ;;  %s9495_s3 = sld [smem:[#allocation18_spill]] }
0x181b   : > { %s9498_s8 = sadd.s32 4294967295, %s9495_s3  }
0x181c   : > { %s9241_s9 = sand.u32 1, %s9498_s8  }
0x1832   : > { %v6583_v24 = vpop.f32.mrb[50].mxu1 }
0x1833   : > { %v6584_v39 = vpop.f32.mrb[51].mxu1 }
0x1834   : > { %v6585_v18 = vadd.f32 %v6584_v39, %v6583_v24  ;;  %v5127_v24 = vld [vmem:[%s8170_s30 + $0x70] sm:$0xff]  ;;  %v5134_v39 = vld [vmem:[%s8170_s30 + $0xa8] sm:$0xff] }
0x1836   : > { %v5027_v14 = vadd.f32 %v6585_v18, %v8550_v35  ;;  %v5122_v35 = vld [vmem:[%s8170_s30 + $0x48] sm:$0xff] }
0x1837   : > { %v5142_v18 = vld [vmem:[%s8170_s30 + $0xe8] sm:$0x3f] }
0x1887   : > { %v7615_v42 = vpop.permute.xlu1 %7614 }
0x1888   : > { %v7617_v15 = vunpack.i.h.bf16 %v7615_v42  ;;  %v7616_v27 = vunpack.i.l.bf16 %v7615_v42  ;;  %v5136_v42 = vld [vmem:[%s8170_s30 + $0xb8] sm:$0xff] }
0x188a   : > { %v4959_v28 = vsel %vm1402_vm6, %v8909_v26, %v7616_v27  ;;  %v4958_v29 = vsel %vm1402_vm6, %v8860_v41, %v7617_v15  ;;  %v5124_v41 = vld [vmem:[%s8170_s30 + $0x58] sm:$0xff]  ;;  %v5113_v26 = vld [vmem:[%s8170_s30] sm:$0xff] }
0x188b   : > { %5094 = vmatprep.mubr.f32.mxu0 %v4959_v28  ;;  %v5144_v15 = vld [vmem:[%s8170_s30 + $0xf8] sm:$0x3f]  ;;  %v7287_v28 = vpack.c.bf16 %v5125_v21, %v5117_v22 }
0x188c   : > { %5095 = vmatmul.mubr.f32.vlgmr.msra.gmra.mrb[50].mxu0 %v4958_v29  ;;  %v7297_v29 = vpack.c.bf16 %v5127_v24, %v5119_v53  ;;  %v5519_v22 = vld [vmem:[%s8175_s23 + $0x1b8] sm:$0xff]  ;;  %v5470_v24 = vld [vmem:[%s8175_s23 + $0x30] sm:$0xff] }
0x188d   : > { %5307 = vmatprep.mubr.f32.mxu0 %v7868_v8 }
0x195f   : > { %v6618_v57 = vpop.f32.mrb[50].mxu0 }
0x1960   : > { %v6619_v60 = vpop.f32.mrb[51].mxu0 }
0x1961   : > { %v6620_v0 = vadd.f32 %v6619_v60, %v6618_v57  ;;  %v5133_v57 = vld [vmem:[%s8170_s30 + $0xa0] sm:$0xff] }
0x1962   : > { %v5141_v60 = vld [vmem:[%s8170_s30 + $0xe0] sm:$0x3f] }
0x1963   : > { %v5097_v9 = vadd.f32 %v6620_v0, %v5027_v14  ;;  %v7289_v0 = vpack.c.bf16 %v5142_v18, %v5134_v39  ;;  %v5471_v39 = vld [vmem:[%s8175_s23 + $0x38] sm:$0xff] }
0x1965   : > { %v5100_v54 = vsel %vm931_vm4, %v5097_v9, 0.0 }
0x1966   : > { %5101 = vadd.xlane.f32.xlu1 %v5100_v54  ;;  %v5135_v54 = vld [vmem:[%s8170_s30 + $0xb0] sm:$0xff] }
0x1977   : > { %2716 = vrot.lane.b32.xlu1 %v8389_v59, %s7873_s17  ;;  %s9499_s17 = sld [smem:[#allocation44_spill]] }
0x197b   : > { %2722 = vrot.lane.b32.xlu1 %v8403_v3, %s7874_s15 }
0x197d   : > { %s5924_s15 = scalar_lea.hbm %s9499_s17, %s6386_s13 }
0x197f   : > { %2725 = vrot.lane.b32.xlu1 %v8411_v6, %s7875_s25  ;;  %s5893_s25 = scalar_lea.sflag [#allocation6], %s9241_s9 }
0x1983   : > { %2728 = vrot.lane.b32.xlu1 %v8418_v10, %s7876_s22 }
0x1987   : > { %2731 = vrot.lane.b32.xlu1 %v8427_v13, %s7877_s14 }
0x198b   : > { %2734 = vrot.lane.b32.xlu1 %v8435_v16, %s7878_s11  ;;  %v5114_v16 = vld [vmem:[%s8170_s30 + $0x8] sm:$0xff] }
0x198f   : > { %4909 = vrot.lane.b32.xlu1 %v8785_v34, %s7879_s18  ;;  %v5116_v34 = vld [vmem:[%s8170_s30 + $0x18] sm:$0xff] }
0x1990   : > { %v7275_v19 = vpack.c.bf16 %v5124_v41, %v5116_v34  ;;  %v5464_v34 = vld [vmem:[%s8175_s23] sm:$0xff] }
0x1992   : > { %7276 = vmatprep.subr.bf16.mxu0 %v7275_v19  ;;  %v5497_v19 = vld [vmem:[%s8175_s23 + $0x108] sm:$0xff] }
0x1993   : > { %4915 = vrot.lane.b32.xlu1 %v8842_v25, %s7876_s22  ;;  %v7265_v25 = vpack.c.bf16 %v5122_v35, %v5114_v16  ;;  %7278 = vmatpush1.bf16.msra.mxu0 %v7277_v50  ;;  %v5513_v16 = vld [vmem:[%s8175_s23 + $0x188] sm:$0xff]  ;;  %s7688_s22 = scalar_lea.vmem %s9249_s26, 128 }
0x1994   : > { %7281 = vmatprep.subr.msk.bf16.mxu0 %vm8190_vm3, %v7279_v46  ;;  %v5498_v46 = vld [vmem:[%s8175_s23 + $0x110] sm:$0xff]  ;;  %p7689_p8 = scmp.ne.s32.totalorder %s9249_s26, %s7688_s22 }
0x1995   : > { %7266 = vmatprep.subr.bf16.mxu1 %v7265_v25  ;;  %v5465_v25 = vld [vmem:[%s8175_s23 + $0x8] sm:$0xff]  ;;  %v7343_v31 = vpack.c.bf16 %v5499_v12, %v5498_v46  ;;  %v5476_v46 = vld [vmem:[%s8175_s23 + $0x60] sm:$0xff] }
0x1996   : > { %v7307_v50 = vpack.c.bf16 %v5465_v25, %v5464_v34  ;;  %v5522_v34 = vld [vmem:[%s8175_s23 + $0x1d0] sm:$0xff]  ;;  %v5523_v25 = vld [vmem:[%s8175_s23 + $0x1d8] sm:$0xff]  ;;  %p7690_p9 = pnand %p7689_p8, %p8078_p12 }
0x1997   : > { %4921 = vrot.lane.b32.xlu1 %v8900_v5, %s7880_s1  ;;  %v5121_v5 = vld [vmem:[%s8170_s30 + $0x40] sm:$0xff]  ;;  %7284 = vmatpush1.bf16.msk.msra.mxu0 %vm8190_vm3, %v7282_v47  ;;  %v5469_v47 = vld [vmem:[%s8175_s23 + $0x28] sm:$0xff] }
0x1998   : > { %v7267_v33 = vpack.c.bf16 %v5121_v5, %v5113_v26  ;;  %7296 = vmatprep.subr.bf16.mxu0 %v7295_v58  ;;  %v5496_v5 = vld [vmem:[%s8175_s23 + $0x100] sm:$0xff]  ;;  %v5501_v58 = vld [vmem:[%s8175_s23 + $0x128] sm:$0xff]  ;;  %v7315_v21 = vpack.c.bf16 %v5469_v47, %v5468_v45  ;;  %v5494_v45 = vld [vmem:[%s8175_s23 + $0xf0] sm:$0xff]  ;;  %p7691_p10 = pneg %p7690_p9 }
0x1999   : > { %v7339_v30 = vpack.c.bf16 %v5497_v19, %v5496_v5  ;;  %v7347_v53 = vpack.c.bf16 %v5501_v58, %v5500_v4  ;;  %v5474_v5 = vld [vmem:[%s8175_s23 + $0x50] sm:$0xff]  ;;  %v5475_v19 = vld [vmem:[%s8175_s23 + $0x58] sm:$0xff] }
0x199a   : > { %7268 = vmatpush1.bf16.msra.mxu1 %v7267_v33  ;;  %v5482_v33 = vld [vmem:[%s8175_s23 + $0x90] sm:$0xff]  ;;  %v5495_v47 = vld [vmem:[%s8175_s23 + $0xf8] sm:$0xff] }
0x199b   : > { %7271 = vmatprep.subr.msk.bf16.mxu1 %vm8190_vm3, %v7269_v49  ;;  %v7341_v49 = vpack.c.bf16 %v5515_v48, %v5514_v7  ;;  %v5506_v7 = vld [vmem:[%s8175_s23 + $0x150] sm:$0xff]  ;;  %v5507_v48 = vld [vmem:[%s8175_s23 + $0x158] sm:$0xff] }
0x199c   : > { %v5527_v4 = vld [vmem:[%s8175_s23 + $0x1f8] sm:$0xff]  ;;  %v5478_v58 = vld [vmem:[%s8175_s23 + $0x70] sm:$0xff] }
0x199e   : > { %7274 = vmatpush1.bf16.msk.msra.mxu1 %vm8190_vm3, %v7272_v40  ;;  %v5516_v40 = vld [vmem:[%s8175_s23 + $0x1a0] sm:$0xff] }
0x199f   : > { %7286 = vmatprep.subr.bf16.mxu1 %v7285_v61  ;;  %v7313_v61 = vpack.c.bf16 %v5485_v36, %v5484_v17  ;;  %v7345_v52 = vpack.c.bf16 %v5517_v11, %v5516_v40  ;;  %v7361_v17 = vpack.c.bf16 %v5525_v51, %v5524_v56  ;;  %v5477_v36 = vld [vmem:[%s8175_s23 + $0x68] sm:$0xff]  ;;  %v5508_v40 = vld [vmem:[%s8175_s23 + $0x160] sm:$0xff] }
0x19a0   : > { %v5509_v11 = vld [vmem:[%s8175_s23 + $0x168] sm:$0xff]  ;;  %v5580_v56 = vld [vmem:[%s8175_s23 + $0x3a0] sm:$0xff] }
0x19a1   : > { %v5581_v51 = vld [vmem:[%s8175_s23 + $0x3a8] sm:$0xff] }
0x19f3   : > { %v5102_v59 = vpop.xlane.xlu1 %5101 }
0x19f4   : > { %v5103_v3 = vmul.f32 0.033333335, %v5102_v59  ;;  %v5143_v59 = vld [vmem:[%s8170_s30 + $0xf0] sm:$0x3f]  ;;  %s7881_s30 = smov 16  }
0x19f5   : > { %v7302_v35 = vpack.c.bf16 %v5143_v59, %v5135_v54  ;;  %v5472_v54 = vld [vmem:[%s8175_s23 + $0x40] sm:$0xff]  ;;  %v5473_v59 = vld [vmem:[%s8175_s23 + $0x48] sm:$0xff] }
0x19f6   : > { %v5104_v6 = vsub.f32 %v5097_v9, %v5103_v3  ;;  %v7299_v9 = vpack.c.bf16 %v5144_v15, %v5136_v42  ;;  %v5480_v3 = vld [vmem:[%s8175_s23 + $0x80] sm:$0xff]  ;;  %v5502_v15 = vld [vmem:[%s8175_s23 + $0x130] sm:$0xff] }
0x19f8   : > { %v5105_v10 = vmul.f32 %v5104_v6, %v5104_v6 }
0x19fa   : > { %v5106_v13 = vsel %vm931_vm4, %v5105_v10, 0.0  ;;  %v5481_v10 = vld [vmem:[%s8175_s23 + $0x88] sm:$0xff] }
0x19fb   : > { %5107 = vadd.xlane.f32.xlu0 %v5106_v13  ;;  %v5512_v13 = vld [vmem:[%s8175_s23 + $0x180] sm:$0xff]  ;;  %v7305_v41 = vpack.c.bf16 %v5481_v10, %v5480_v3 }
0x19fc   : > { %v7337_v26 = vpack.c.bf16 %v5513_v16, %v5512_v13  ;;  %v5504_v13 = vld [vmem:[%s8175_s23 + $0x140] sm:$0xff]  ;;  %v5505_v16 = vld [vmem:[%s8175_s23 + $0x148] sm:$0xff] }
0x1a88   : > { %v5108_v38 = vpop.xlane.xlu0 %5107 }
0x1a89   : > { %v5109_v63 = vmul.f32 0.033333335, %v5108_v38  ;;  %v5486_v38 = vld [vmem:[%s8175_s23 + $0xb0] sm:$0xff] }
0x1a8b   : > { %v5110_v1 = vadd.f32 1e-05, %v5109_v63  ;;  %v5487_v63 = vld [vmem:[%s8175_s23 + $0xb8] sm:$0xff] }
0x1a8c   : > { %v7317_v18 = vpack.c.bf16 %v5487_v63, %v5486_v38  ;;  %v5479_v38 = vld [vmem:[%s8175_s23 + $0x78] sm:$0xff] }
0x1a8d   : > { %7684 = vrsqrt.f32 %v5110_v1  ;;  %v5518_v1 = vld [vmem:[%s8175_s23 + $0x1b0] sm:$0xff] }
0x1a8e   : > { %v7349_v42 = vpack.c.bf16 %v5519_v22, %v5518_v1  ;;  %v7335_v1 = vpack.c.bf16 %v5479_v38, %v5478_v58  ;;  %v5510_v22 = vld [vmem:[%s8175_s23 + $0x170] sm:$0xff] }
0x1a97   : > { %v7685_v27 = vpop.eup %7684 }
0x1a98   : > { %v9059_v14 = vmul.f32 %v7685_v27, %v5104_v6  ;;  %v7292_v6 = vpack.c.bf16 %v5141_v60, %v5133_v57  ;;  %v5503_v27 = vld [vmem:[%s8175_s23 + $0x138] sm:$0xff]  ;;  %v5520_v57 = vld [vmem:[%s8175_s23 + $0x1c0] sm:$0xff]  ;;  %v5521_v60 = vld [vmem:[%s8175_s23 + $0x1c8] sm:$0xff] }
0x1a99   : > { %v7353_v10 = vpack.c.bf16 %v5521_v60, %v5520_v57  ;;  %v5560_v57 = vld [vmem:[%s8175_s23 + $0x300] sm:$0xff]  ;;  %v5561_v60 = vld [vmem:[%s8175_s23 + $0x308] sm:$0xff] }
0x1a9a   : > { %6372 = vmatmul.mubr.msk.f32.vlgmr.msra.gmra.mrb[52].mxu1 %vm931_vm4, %v9059_v14  ;;  %6375 = vmatmul.mubr.msk.f32.vlgmr.msra.gmra.mrb[52].mxu0 %vm931_vm4, %v9059_v14 }
0x1a9b   : > { %7288 = vmatpush1.bf16.msra.mxu1 %v7287_v28  ;;  %7298 = vmatpush1.bf16.msra.mxu0 %v7297_v29  ;;  %v5488_v28 = vld [vmem:[%s8175_s23 + $0xc0] sm:$0xff]  ;;  %v5489_v29 = vld [vmem:[%s8175_s23 + $0xc8] sm:$0xff] }
0x1a9c   : > { %7291 = vmatprep.subr.msk.bf16.mxu1 %vm8190_vm3, %v7289_v0  ;;  %7301 = vmatprep.subr.msk.bf16.mxu0 %vm8190_vm3, %v7299_v9  ;;  %v7319_v0 = vpack.c.bf16 %v5471_v39, %v5470_v24  ;;  %v7351_v9 = vpack.c.bf16 %v5503_v27, %v5502_v15  ;;  %v7321_v3 = vpack.c.bf16 %v5489_v29, %v5488_v28  ;;  %v5544_v24 = vld [vmem:[%s8175_s23 + $0x280] sm:$0xff]  ;;  %v5545_v39 = vld [vmem:[%s8175_s23 + $0x288] sm:$0xff] }
0x1a9d   : > { %5378 = vmatprep.mubr.f32.mxu1 %v7868_v8  ;;  %5449 = vmatprep.mubr.f32.mxu0 %v7868_v8  ;;  %v7309_v8 = vpack.c.bf16 %v5483_v43, %v5482_v33  ;;  %v7357_v43 = vpack.c.bf16 %v5523_v25, %v5522_v34  ;;  %v5577_v15 = vld [vmem:[%s8175_s23 + $0x388] sm:$0xff]  ;;  %v5528_v28 = vld [vmem:[%s8175_s23 + $0x200] sm:$0xff]  ;;  %v7403_v25 = vpack.c.bf16 %v5561_v60, %v5560_v57 }
0x1a9e   : > { %v5529_v29 = vld [vmem:[%s8175_s23 + $0x208] sm:$0xff] }
0x1a9f   : > { %7294 = vmatpush1.bf16.msk.msra.mxu1 %vm8190_vm3, %v7292_v6  ;;  %7304 = vmatpush1.bf16.msk.msra.mxu0 %vm8190_vm3, %v7302_v35  ;;  %v5490_v6 = vld [vmem:[%s8175_s23 + $0xd0] sm:$0xff]  ;;  %v5491_v35 = vld [vmem:[%s8175_s23 + $0xd8] sm:$0xff]  ;;  %v7371_v34 = vpack.c.bf16 %v5529_v29, %v5528_v28  ;;  %v5584_v28 = vld [vmem:[%s8175_s23 + $0x3c0] sm:$0xff]  ;;  %vm2748_vm3 = vcmask 457728  }
0x1aa0   : > { %7306 = vmatprep.subr.bf16.mxu1 %v7305_v41  ;;  %7338 = vmatprep.subr.bf16.mxu0 %v7337_v26  ;;  %v7323_v41 = vpack.c.bf16 %v5473_v59, %v5472_v54  ;;  %v7355_v26 = vpack.c.bf16 %v5505_v16, %v5504_v13  ;;  %v7325_v33 = vpack.c.bf16 %v5491_v35, %v5490_v6  ;;  %v5547_v59 = vld [vmem:[%s8175_s23 + $0x298] sm:$0xff]  ;;  %v5585_v29 = vld [vmem:[%s8175_s23 + $0x3c8] sm:$0xff] }
0x1aa2   : > { %6378 = vmatmul.mubr.msk.f32.vlgmr.msra.gmra.mrb[54].mxu1 %vm931_vm4, %v9059_v14  ;;  %6381 = vmatmul.mubr.msk.f32.vlgmr.msra.gmra.mrb[54].mxu0 %vm931_vm4, %v9059_v14 }
0x1aa3   : > { %7308 = vmatpush3.bf16.msra.mxu1 %v7307_v50  ;;  %7340 = vmatpush3.bf16.msra.mxu0 %v7339_v30  ;;  %v5492_v50 = vld [vmem:[%s8175_s23 + $0xe0] sm:$0xff]  ;;  %v5493_v30 = vld [vmem:[%s8175_s23 + $0xe8] sm:$0xff] }
0x1aa4   : > { %7310 = vmatprep.subr.bf16.mxu1 %v7309_v8  ;;  %7342 = vmatprep.subr.bf16.mxu0 %v7341_v49  ;;  %v7327_v8 = vpack.c.bf16 %v5475_v19, %v5474_v5  ;;  %v7359_v49 = vpack.c.bf16 %v5507_v48, %v5506_v7  ;;  %v7329_v12 = vpack.c.bf16 %v5493_v30, %v5492_v50  ;;  %v5562_v7 = vld [vmem:[%s8175_s23 + $0x310] sm:$0xff]  ;;  %v5563_v48 = vld [vmem:[%s8175_s23 + $0x318] sm:$0xff]  ;;  %v5548_v50 = vld [vmem:[%s8175_s23 + $0x2a0] sm:$0xff] }
0x1aa5   : > { %v5549_v30 = vld [vmem:[%s8175_s23 + $0x2a8] sm:$0xff] }
0x1aa7   : > { %7312 = vmatpush3.bf16.msra.mxu1 %v7311_v23  ;;  %7344 = vmatpush3.bf16.msra.mxu0 %v7343_v31  ;;  %v7331_v23 = vpack.c.bf16 %v5477_v36, %v5476_v46  ;;  %v7363_v31 = vpack.c.bf16 %v5509_v11, %v5508_v40  ;;  %v5532_v46 = vld [vmem:[%s8175_s23 + $0x220] sm:$0xff]  ;;  %v7409_v36 = vpack.c.bf16 %v5581_v51, %v5580_v56  ;;  %v5565_v11 = vld [vmem:[%s8175_s23 + $0x328] sm:$0xff] }
0x1aa8   : > { %7314 = vmatprep.subr.bf16.mxu1 %v7313_v61  ;;  %7346 = vmatprep.subr.bf16.mxu0 %v7345_v52  ;;  %v5526_v61 = vld [vmem:[%s8175_s23 + $0x1f0] sm:$0xff]  ;;  %v7333_v52 = vpack.c.bf16 %v5495_v47, %v5494_v45  ;;  %v5564_v40 = vld [vmem:[%s8175_s23 + $0x320] sm:$0xff]  ;;  %v5551_v47 = vld [vmem:[%s8175_s23 + $0x2b8] sm:$0xff] }
0x1aa9   : > { %v7365_v63 = vpack.c.bf16 %v5527_v4, %v5526_v61  ;;  %v5582_v61 = vld [vmem:[%s8175_s23 + $0x3b0] sm:$0xff] }
0x1aab   : > { %7316 = vmatpush3.bf16.msra.mxu1 %v7315_v21  ;;  %7348 = vmatpush3.bf16.msra.mxu0 %v7347_v53  ;;  %v5511_v21 = vld [vmem:[%s8175_s23 + $0x178] sm:$0xff] }
0x1aac   : > { %7318 = vmatprep.subr.bf16.mxu1 %v7317_v18  ;;  %7350 = vmatprep.subr.bf16.mxu0 %v7349_v42  ;;  %v7367_v53 = vpack.c.bf16 %v5511_v21, %v5510_v22  ;;  %v5576_v18 = vld [vmem:[%s8175_s23 + $0x380] sm:$0xff]  ;;  %v7369_v42 = vpack.c.bf16 %v5545_v39, %v5544_v24  ;;  %v7411_v22 = vpack.c.bf16 %v5565_v11, %v5564_v40  ;;  %v5534_v21 = vld [vmem:[%s8175_s23 + $0x230] sm:$0xff]  ;;  %v5559_v11 = vld [vmem:[%s8175_s23 + $0x2f8] sm:$0xff] }
0x1aad   : > { %v7401_v27 = vpack.c.bf16 %v5577_v15, %v5576_v18  ;;  %v5566_v18 = vld [vmem:[%s8175_s23 + $0x330] sm:$0xff]  ;;  %v5552_v15 = vld [vmem:[%s8175_s23 + $0x2c0] sm:$0xff] }
0x1aae   : > { %v5558_v40 = vld [vmem:[%s8175_s23 + $0x2f0] sm:$0xff] }
0x1aaf   : > { %7320 = vmatpush3.bf16.msra.mxu1 %v7319_v0  ;;  %7352 = vmatpush3.bf16.msra.mxu0 %v7351_v9  ;;  %v5546_v0 = vld [vmem:[%s8175_s23 + $0x290] sm:$0xff] }
0x1ab0   : > { %7322 = vmatprep.subr.bf16.mxu1 %v7321_v3  ;;  %7354 = vmatprep.subr.bf16.mxu0 %v7353_v10  ;;  %v5578_v3 = vld [vmem:[%s8175_s23 + $0x390] sm:$0xff]  ;;  %v5579_v10 = vld [vmem:[%s8175_s23 + $0x398] sm:$0xff] }
0x1ab3   : > { %7324 = vmatpush3.bf16.msra.mxu1 %v7323_v41  ;;  %7356 = vmatpush3.bf16.msra.mxu0 %v7355_v26  ;;  %v5530_v41 = vld [vmem:[%s8175_s23 + $0x210] sm:$0xff]  ;;  %v5531_v26 = vld [vmem:[%s8175_s23 + $0x218] sm:$0xff] }
0x1ab4   : > { %7326 = vmatprep.subr.bf16.mxu1 %v7325_v33  ;;  %7358 = vmatprep.subr.bf16.mxu0 %v7357_v43  ;;  %v7373_v33 = vpack.c.bf16 %v5547_v59, %v5546_v0  ;;  %v7405_v43 = vpack.c.bf16 %v5579_v10, %v5578_v3  ;;  %v5536_v0 = vld [vmem:[%s8175_s23 + $0x240] sm:$0xff]  ;;  %v7417_v59 = vpack.c.bf16 %v5585_v29, %v5584_v28  ;;  %v5569_v10 = vld [vmem:[%s8175_s23 + $0x348] sm:$0xff] }
0x1ab5   : > { %v5568_v3 = vld [vmem:[%s8175_s23 + $0x340] sm:$0xff] }
0x1ab7   : > { %7328 = vmatpush3.bf16.msra.mxu1 %v7327_v8  ;;  %7360 = vmatpush3.bf16.msra.mxu0 %v7359_v49  ;;  %v7375_v8 = vpack.c.bf16 %v5531_v26, %v5530_v41  ;;  %v7407_v49 = vpack.c.bf16 %v5563_v48, %v5562_v7  ;;  %v5538_v41 = vld [vmem:[%s8175_s23 + $0x250] sm:$0xff]  ;;  %v5539_v26 = vld [vmem:[%s8175_s23 + $0x258] sm:$0xff]  ;;  %v5556_v7 = vld [vmem:[%s8175_s23 + $0x2e0] sm:$0xff] }
0x1ab8   : > { %7330 = vmatprep.subr.bf16.mxu1 %v7329_v12  ;;  %7362 = vmatprep.subr.bf16.mxu0 %v7361_v17  ;;  %v5533_v12 = vld [vmem:[%s8175_s23 + $0x228] sm:$0xff]  ;;  %v7377_v17 = vpack.c.bf16 %v5549_v30, %v5548_v50  ;;  %v5588_v50 = vld [vmem:[%s8175_s23 + $0x3e0] sm:$0xff]  ;;  %v7391_v56 = vpack.c.bf16 %v5539_v26, %v5538_v41 }
0x1ab9   : > { %v5557_v48 = vld [vmem:[%s8175_s23 + $0x2e8] sm:$0xff] }
0x1aba   : > { %v5589_v30 = vld [vmem:[%s8175_s23 + $0x3e8] sm:$0xff] }
0x1abb   : > { %7332 = vmatpush3.bf16.msra.mxu1 %v7331_v23  ;;  %7364 = vmatpush3.bf16.msra.mxu0 %v7363_v31  ;;  %v5550_v23 = vld [vmem:[%s8175_s23 + $0x2b0] sm:$0xff] }
0x1abc   : > { %7334 = vmatprep.subr.bf16.mxu1 %v7333_v52  ;;  %7366 = vmatprep.subr.bf16.mxu0 %v7365_v63  ;;  %v5583_v52 = vld [vmem:[%s8175_s23 + $0x3b8] sm:$0xff]  ;;  %v7381_v24 = vpack.c.bf16 %v5551_v47, %v5550_v23  ;;  %v5590_v23 = vld [vmem:[%s8175_s23 + $0x3f0] sm:$0xff] }
0x1abd   : > { %v7413_v39 = vpack.c.bf16 %v5583_v52, %v5582_v61  ;;  %v5591_v47 = vld [vmem:[%s8175_s23 + $0x3f8] sm:$0xff] }
0x1abf   : > { %7336 = vmatpush3.bf16.msra.mxu1 %v7335_v1  ;;  %7368 = vmatpush3.bf16.msra.mxu0 %v7367_v53  ;;  %v7379_v1 = vpack.c.bf16 %v5533_v12, %v5532_v46  ;;  %v5535_v53 = vld [vmem:[%s8175_s23 + $0x238] sm:$0xff]  ;;  %v7393_v46 = vpack.c.bf16 %v5557_v48, %v5556_v7  ;;  %v7425_v12 = vpack.c.bf16 %v5589_v30, %v5588_v50 }
0x1ac0   : > { %7370 = vmatprep.subr.bf16.mxu1 %v7369_v42  ;;  %7402 = vmatprep.subr.bf16.mxu0 %v7401_v27  ;;  %v5567_v42 = vld [vmem:[%s8175_s23 + $0x338] sm:$0xff]  ;;  %v5553_v27 = vld [vmem:[%s8175_s23 + $0x2c8] sm:$0xff]  ;;  %v7383_v57 = vpack.c.bf16 %v5535_v53, %v5534_v21 }
0x1ac1   : > { %v7415_v60 = vpack.c.bf16 %v5567_v42, %v5566_v18 }
0x1b6d   : > { %v5238_v9 = vpop.f32.mrb[52].mxu1  ;;  %v5309_v54 = vpop.f32.mrb[52].mxu0 }
0x1b6e   : > { %v5240_v13 = vpop.f32.mrb[53].mxu1  ;;  %v5311_v16 = vpop.f32.mrb[53].mxu0  ;;  %v5456_v5 = vmax.f32 %v5238_v9, 0.0  ;;  %v5458_v19 = vmax.f32 %v5309_v54, 0.0  ;;  %v5537_v9 = vld [vmem:[%s8175_s23 + $0x248] sm:$0xff]  ;;  %v7385_v54 = vpack.c.bf16 %v5553_v27, %v5552_v15 }
0x1b6f   : > { %v5457_v6 = vmax.f32 %v5240_v13, 0.0  ;;  %v5459_v35 = vmax.f32 %v5311_v16, 0.0  ;;  %v5554_v13 = vld [vmem:[%s8175_s23 + $0x2d0] sm:$0xff]  ;;  %v5555_v16 = vld [vmem:[%s8175_s23 + $0x2d8] sm:$0xff] }
0x1b71   : > { %5656 = vmatprep.mubr.f32.mxu1 %v5457_v6  ;;  %5726 = vmatprep.mubr.f32.mxu0 %v5459_v35  ;;  %v5586_v6 = vld [vmem:[%s8175_s23 + $0x3d0] sm:$0xff]  ;;  %v5587_v35 = vld [vmem:[%s8175_s23 + $0x3d8] sm:$0xff] }
0x1b72   : > { %5657 = vmatmul.mubr.f32.vlgmr.msra.gmra.mrb[56].mxu1 %v5456_v5  ;;  %5727 = vmatmul.mubr.f32.vlgmr.msra.gmra.mrb[56].mxu0 %v5458_v19  ;;  %v7389_v5 = vpack.c.bf16 %v5555_v16, %v5554_v13  ;;  %v7421_v19 = vpack.c.bf16 %v5587_v35, %v5586_v6 }
0x1b73   : > { %7372 = vmatpush3.bf16.msra.mxu1 %v7371_v34  ;;  %7404 = vmatpush3.bf16.msra.mxu0 %v7403_v25  ;;  %v7387_v34 = vpack.c.bf16 %v5537_v9, %v5536_v0  ;;  %v7419_v25 = vpack.c.bf16 %v5569_v10, %v5568_v3 }
0x1b74   : > { %7374 = vmatprep.subr.bf16.mxu1 %v7373_v33  ;;  %7406 = vmatprep.subr.bf16.mxu0 %v7405_v43  ;;  %v5570_v33 = vld [vmem:[%s8175_s23 + $0x350] sm:$0xff]  ;;  %v5571_v43 = vld [vmem:[%s8175_s23 + $0x358] sm:$0xff] }
0x1b75   : > { %v9170_v31 = vpop.f32.mrb[54].mxu1  ;;  %v9172_v45 = vpop.f32.mrb[54].mxu0  ;;  %v7423_v51 = vpack.c.bf16 %v5571_v43, %v5570_v33 }
0x1b76   : > { %v5382_v4 = vpop.f32.mrb[55].mxu1  ;;  %v5453_v58 = vpop.f32.mrb[55].mxu0 }
0x1b77   : > { %v5461_v38 = vmax.f32 %v5382_v4, 0.0  ;;  %v5463_v63 = vmax.f32 %v5453_v58, 0.0  ;;  %7376 = vmatpush3.bf16.msra.mxu1 %v7375_v8  ;;  %7408 = vmatpush3.bf16.msra.mxu0 %v7407_v49  ;;  %v5540_v8 = vld [vmem:[%s8175_s23 + $0x260] sm:$0xff]  ;;  %v5541_v49 = vld [vmem:[%s8175_s23 + $0x268] sm:$0xff]  ;;  %v5542_v4 = vld [vmem:[%s8175_s23 + $0x270] sm:$0xff]  ;;  %v7397_v58 = vpack.c.bf16 %v5559_v11, %v5558_v40 }
0x1b78   : > { %7378 = vmatprep.subr.bf16.mxu1 %v7377_v17  ;;  %7410 = vmatprep.subr.bf16.mxu0 %v7409_v36  ;;  %v5572_v17 = vld [vmem:[%s8175_s23 + $0x360] sm:$0xff]  ;;  %v5573_v36 = vld [vmem:[%s8175_s23 + $0x368] sm:$0xff]  ;;  %v7395_v61 = vpack.c.bf16 %v5541_v49, %v5540_v8 }
0x1b79   : > { %5796 = vmatprep.mubr.f32.mxu1 %v5461_v38  ;;  %5866 = vmatprep.mubr.f32.mxu0 %v5463_v63  ;;  %v7427_v52 = vpack.c.bf16 %v5573_v36, %v5572_v17  ;;  %v7429_v38 = vpack.c.bf16 %v5591_v47, %v5590_v23  ;;  %v5543_v63 = vld [vmem:[%s8175_s23 + $0x278] sm:$0xff] }
0x1b7a   : > { %v7399_v21 = vpack.c.bf16 %v5543_v63, %v5542_v4 }
0x1b7b   : > { %7380 = vmatpush3.bf16.msra.mxu1 %v7379_v1  ;;  %7412 = vmatpush3.bf16.msra.mxu0 %v7411_v22  ;;  %v5574_v1 = vld [vmem:[%s8175_s23 + $0x370] sm:$0xff]  ;;  %v5575_v22 = vld [vmem:[%s8175_s23 + $0x378] sm:$0xff]  ;;  %s7882_s23 = smov 10  }
0x1b7c   : > { %7382 = vmatprep.subr.bf16.mxu1 %v7381_v24  ;;  %7414 = vmatprep.subr.bf16.mxu0 %v7413_v39  ;;  %v7431_v53 = vpack.c.bf16 %v5575_v22, %v5574_v1  ;;  %v5460_v24 = vmax.f32 %v9170_v31, 0.0  ;;  %v5462_v39 = vmax.f32 %v9172_v45, 0.0 }
0x1b7f   : > { %7384 = vmatpush3.bf16.msra.mxu1 %v7383_v57  ;;  %7416 = vmatpush3.bf16.msra.mxu0 %v7415_v60 }
0x1b80   : > { %7386 = vmatprep.subr.bf16.mxu1 %v7385_v54  ;;  %7418 = vmatprep.subr.bf16.mxu0 %v7417_v59 }
0x1b83   : > { %7388 = vmatpush3.bf16.msra.mxu1 %v7387_v34  ;;  %7420 = vmatpush3.bf16.msra.mxu0 %v7419_v25 }
0x1b84   : > { %7390 = vmatprep.subr.bf16.mxu1 %v7389_v5  ;;  %7422 = vmatprep.subr.bf16.mxu0 %v7421_v19 }
0x1b87   : > { %7392 = vmatpush3.bf16.msra.mxu1 %v7391_v56  ;;  %7424 = vmatpush3.bf16.msra.mxu0 %v7423_v51 }
0x1b88   : > { %7394 = vmatprep.subr.bf16.mxu1 %v7393_v46  ;;  %7426 = vmatprep.subr.bf16.mxu0 %v7425_v12 }
0x1b8b   : > { %7396 = vmatpush3.bf16.msra.mxu1 %v7395_v61  ;;  %7428 = vmatpush3.bf16.msra.mxu0 %v7427_v52 }
0x1b8c   : > { %7398 = vmatprep.subr.bf16.mxu1 %v7397_v58  ;;  %7430 = vmatprep.subr.bf16.mxu0 %v7429_v38 }
0x1b8f   : > { %7400 = vmatpush3.bf16.msra.mxu1 %v7399_v21  ;;  %7432 = vmatpush3.bf16.msra.mxu0 %v7431_v53 }
0x1b92   : > { %5797 = vmatmul.mubr.f32.vlgmr.msra.gmra.mrb[58].mxu1 %v5460_v24  ;;  %5867 = vmatmul.mubr.f32.vlgmr.msra.gmra.mrb[58].mxu0 %v5462_v39 }
0x1c45   : > { %v6653_v18 = vpop.f32.mrb[56].mxu1  ;;  %v6688_v42 = vpop.f32.mrb[56].mxu0 }
0x1c46   : > { %v6654_v15 = vpop.f32.mrb[57].mxu1  ;;  %v6689_v27 = vpop.f32.mrb[57].mxu0 }
0x1c47   : > { %v6655_v28 = vadd.f32 %v6654_v15, %v6653_v18  ;;  %v6690_v29 = vadd.f32 %v6689_v27, %v6688_v42 }
0x1c49   : > { %v5659_v57 = vadd.f32 %v6655_v28, %v9059_v14  ;;  %v2717_v14 = vpop.permute.xlu1 %2716 }
0x1c4b   : > { %v5729_v60 = vadd.f32 %v6690_v29, %v5659_v57 }
0x1c4d   : > { %v2723_v16 = vpop.permute.xlu1 %2722 }
0x1c51   : > { %v2726_v6 = vpop.permute.xlu1 %2725 }
0x1c55   : > { %v2729_v35 = vpop.permute.xlu1 %2728 }
0x1c59   : > { %v2732_v34 = vpop.permute.xlu1 %2731 }
0x1c5d   : > { %v2735_v41 = vpop.permute.xlu1 %2734 }
0x1c61   : > { %v4910_v19 = vpop.permute.xlu1 %4909 }
0x1c65   : > { %v6723_v0 = vpop.f32.mrb[58].mxu1  ;;  %v6758_v9 = vpop.f32.mrb[58].mxu0 }
0x1c66   : > { %v6724_v54 = vpop.f32.mrb[59].mxu1  ;;  %v6759_v59 = vpop.f32.mrb[59].mxu0 }
0x1c67   : > { %v6725_v3 = vadd.f32 %v6724_v54, %v6723_v0  ;;  %v6760_v10 = vadd.f32 %v6759_v59, %v6758_v9  ;;  %v4916_v8 = vpop.permute.xlu1 %4915 }
0x1c69   : > { %v5799_v31 = vadd.f32 %v6725_v3, %v5729_v60 }
0x1c6b   : > { %v5869_v13 = vadd.f32 %v6760_v10, %v5799_v31  ;;  %v4922_v17 = vpop.permute.xlu1 %4921 }
0x1c6d   : > { %v5872_v45 = vsel %vm931_vm4, %v5869_v13, 0.0 }
0x1c6e   : > { %5873 = vadd.xlane.f32.xlu0 %v5872_v45 }
0x1c84   : > { %2719 = vrot.lane.b32.xlu0 %v8396_v62, %s7881_s30 }
0x1c88   : > { %4906 = vrot.lane.b32.xlu0 %v8758_v2, %s7882_s23  ;;  %v2737_v2 = vsel %vm1480_vm8, %v8382_v55, %v2717_v14  ;;  %vm4934_vm8 = vcmask 490496  }
0x1c8c   : > { %4912 = vrot.lane.b32.xlu0 %v8815_v20, %s7883_s0 }
0x1c90   : > { %4918 = vrot.lane.b32.xlu0 %v8877_v44, %s7884_s4 }
0x1c94   : > { %4924 = vrot.lane.b32.xlu0 %v8934_v32, %s7885_s19 }
0x1cfb   : > { %v5874_v25 = vpop.xlane.xlu0 %5873 }
0x1cfc   : > { %v5875_v62 = vmul.f32 0.033333335, %v5874_v25 }
0x1cfe   : > { %v9222_v26 = vsub.f32 %v5869_v13, %v5875_v62 }
0x1cff   : > { %v2720_v20 = vpop.permute.xlu0 %2719 }
0x1d00   : > { %v2739_v44 = vsel %vm2738_vm14, %v2737_v2, %v2720_v20  ;;  %v5877_v32 = vmul.f32 %v9222_v26, %v9222_v26 }
0x1d01   : > { %v2741_v5 = vsel %vm2740_vm15, %v2739_v44, %v2723_v16 }
0x1d02   : > { %v2743_v33 = vsel %vm2742_vm0, %v2741_v5, %v2726_v6  ;;  %v5878_v43 = vsel %vm931_vm4, %v5877_v32, 0.0 }
0x1d03   : > { %5879 = vadd.xlane.f32.xlu1 %v5878_v43  ;;  %v4907_v7 = vpop.permute.xlu0 %4906  ;;  %v2745_v48 = vsel %vm2744_vm1, %v2743_v33, %v2729_v35 }
0x1d04   : > { %v4927_v55 = vsel %vm3616_vm13, %v8717_v37, %v4907_v7  ;;  %v2747_v50 = vsel %vm2746_vm2, %v2745_v48, %v2732_v34 }
0x1d05   : > { %v2749_v30 = vsel %vm2748_vm3, %v2747_v50, %v2735_v41  ;;  %v4929_v51 = vsel %vm4928_vm5, %v4927_v55, %v4910_v19 }
0x1d06   : > { %2750 = vst.msk [vmem:[%s730_s21] sm:$0xff] %vm1402_vm6, %v2749_v30  ;;  %vm4938_vm6 = vcmask 654336   ;;  %s7692_s21 = sshll.u32 %s7886_s27, 4  ;;  %s7693_s21 = int_to_ptr.vmem [resolvable:$false] %s7692_s21 }
0x1d07   : > { %v4913_v56 = vpop.permute.xlu0 %4912  ;;  %s7694_s14 = scalar_lea.vmem %s7693_s21, 256  ;;  %p7695_p11 = scmp.lt.s32.totalorder %s9249_s26, %s7693_s21 }
0x1d08   : > { %v4930_v49 = vsel %vm931_vm4, %v4929_v51, %v4913_v56  ;;  %p7696_p0 = scmp.lt.s32.totalorder %s7694_s14, %s7688_s22 }
0x1d09   : > { %v4931_v37 = vsel %vm2744_vm1, %v4930_v49, %v4916_v8 }
0x1d0a   : > { %p7697_p1 = por %p7696_p0, %p7695_p11 }
0x1d0b   : > { %v4919_v46 = vpop.permute.xlu0 %4918 }
0x1d0c   : > { %v4933_v12 = vsel %vm4932_vm7, %v4931_v37, %v4919_v46  ;;  %p7698_p4 = pnand %p7697_p1, %p7691_p10 }
0x1d0d   : > { %v4935_v40 = vsel %vm4934_vm8, %v4933_v12, %v4922_v17 }
0x1d0f   : > { %v4925_v36 = vpop.permute.xlu0 %4924 }
0x1d10   : > { %v4937_v11 = vsel %vm4936_vm9, %v4935_v40, %v4925_v36 }
0x1d11   : > { %4939 = vst.msk [vmem:[%s737_s29] sm:$0xff] %vm4938_vm6, %v4937_v11 }
0x1d12   : > { %7701 = shalt.err (!%p7698_p4)
}
0x1d13   : > { %s7702_s11 = scalar_lea.hbm %s5924_s15, 128  ;;  %s7706_s30 = scalar_lea.hbm %s9499_s17, 1536 }
0x1d14   : > { %p7703_p2 = scmp.ne.s32.totalorder %s5924_s15, %s7702_s11  ;;  %p7707_p8 = scmp.lt.u32.totalorder %s5924_s15, %s9499_s17 }
0x1d15   : > { %p7708_p9 = scmp.lt.u32.totalorder %s7706_s30, %s7702_s11  ;;  %p7710_p7 = scmp.lt.u32.totalorder %s7702_s11, %s5924_s15 }
0x1d16   : > { %p7704_p5 = pnand %p7703_p2, %p8078_p12 }
0x1d17   : > { %p7709_p13 = por %p7708_p9, %p7707_p8 }
0x1d18   : > { %p7705_p6 = pneg %p7704_p5 }
0x1d19   : > { %p7711_p11 = por %p7710_p7, %p7709_p13 }
0x1d1b   : > { %p7712_p10 = pnand %p7711_p11, %p7705_p6 }
0x1d1d   : > { %7715 = shalt.err (!%p7712_p10)
}
0x1d1e   : > { %7436 = dma.vmem_to_hbm [thread:$0]  (%p8078_p12), %s9249_s26, 128, %s5924_s15, %s5893_s25  }
0x1d1f   : > { %s9500_s3 = sld [smem:[#allocation45_spill]]  ;;  %s5941_s10 = sshll.u32 %s737_s29, 4  ;;  %s5942_s10 = int_to_ptr.vmem [resolvable:$true] %s5941_s10 }
0x1d20   : > { %s7716_s24 = scalar_lea.vmem %s5942_s10, 128  ;;  %s7887_s20 = smov [#allocation7]  }
0x1d21   : > { %p7717_p7 = scmp.ne.s32.totalorder %s5942_s10, %s7716_s24  ;;  %s7720_s22 = sshll.u32 %s7887_s20, 4  ;;  %s7721_s22 = int_to_ptr.vmem [resolvable:$false] %s7720_s22 }
0x1d22   : > { %s7722_s27 = scalar_lea.vmem %s7721_s22, 256  ;;  %p7723_p1 = scmp.lt.s32.totalorder %s5942_s10, %s7721_s22 }
0x1d23   : > { %p7718_p13 = pnand %p7717_p7, %p8078_p12  ;;  %p7724_p4 = scmp.lt.s32.totalorder %s7722_s27, %s7716_s24 }
0x1d25   : > { %s9281_s8 = scalar_lea.hbm %s9500_s3, %s6386_s13  ;;  %p7719_p0 = pneg %p7718_p13 }
0x1d26   : > { %p7725_p2 = por %p7724_p4, %p7723_p1 }
0x1d28   : > { %p7726_p5 = pnand %p7725_p2, %p7719_p0 }
0x1d2a   : > { %7729 = shalt.err (!%p7726_p5)
}
0x1d2b   : > { %s7730_s16 = scalar_lea.hbm %s9281_s8, 128  ;;  %s7734_s28 = scalar_lea.hbm %s9500_s3, 1536 }
0x1d2c   : > { %p7731_p6 = scmp.ne.s32.totalorder %s9281_s8, %s7730_s16  ;;  %p7735_p11 = scmp.lt.u32.totalorder %s9281_s8, %s9500_s3 }
0x1d2d   : > { %p7736_p10 = scmp.lt.u32.totalorder %s7734_s28, %s7730_s16  ;;  %p7738_p13 = scmp.lt.u32.totalorder %s7730_s16, %s9281_s8 }
0x1d2e   : > { %p7732_p8 = pnand %p7731_p6, %p8078_p12 }
0x1d2f   : > { %p7737_p7 = por %p7736_p10, %p7735_p11 }
0x1d30   : > { %p7733_p9 = pneg %p7732_p8 }
0x1d31   : > { %p7739_p0 = por %p7738_p13, %p7737_p7 }
0x1d33   : > { %p7740_p1 = pnand %p7739_p0, %p7733_p9 }
0x1d35   : > { %7743 = shalt.err (!%p7740_p1)
}
0x1d36   : > { %s9501_s21 = sld [smem:[#allocation13_spill]]  ;;  %s6385_s11 = sshll.u32 %s9496_s6, 7 }
0x1d37   : > { %7437 = dma.vmem_to_hbm [thread:$0]  (%p8078_p12), %s5942_s10, 128, %s9281_s8, %s5893_s25  }
0x1d38   : > { %s5911_s18 = sshll.u32 %s723_s5, 4  ;;  %s9503_s9 = sld [smem:[#allocation43_spill]]  ;;  %s9313_s18 = int_to_ptr.vmem [resolvable:$true] %s5911_s18 }
0x1d39   : > { %s7744_s23 = scalar_lea.vmem %s9313_s18, 128  ;;  %s7888_s0 = smov [#allocation3]  }
0x1d3a   : > { %p7745_p12 = scmp.ne.s32.totalorder %s9313_s18, %s7744_s23  ;;  %s7748_s4 = sshll.u32 %s7888_s0, 4  ;;  %s7749_s4 = int_to_ptr.vmem [resolvable:$false] %s7748_s4 }
0x1d3b   : > { %s7750_s19 = scalar_lea.vmem %s7749_s4, 256  ;;  %p7751_p5 = scmp.lt.s32.totalorder %s9313_s18, %s7749_s4 }
0x1d3c   : > { %s9504_s6 = sand.u32 1, %s9501_s21   ;;  %p7746_p4 = pnand %p7745_p12, %p8047_p3 }
0x1d3d   : > { %s5888_s25 = scalar_lea.sflag [#allocation4], %s9504_s6  ;;  %p7752_p6 = scmp.lt.s32.totalorder %s7750_s19, %s7744_s23 }
0x1d3e   : > { %s9311_s30 = scalar_lea.hbm %s9503_s9, %s6385_s11  ;;  %p7747_p2 = pneg %p7746_p4 }
0x1d3f   : > { %p7753_p8 = por %p7752_p6, %p7751_p5 }
0x1d41   : > { %p7754_p9 = pnand %p7753_p8, %p7747_p2 }
0x1d90   : > { %v5880_v23 = vpop.xlane.xlu1 %5879 }
0x1d91   : > { %v5881_v47 = vmul.f32 0.033333335, %v5880_v23 }
0x1d93   : > { %v5882_v61 = vadd.f32 1e-05, %v5881_v47 }
0x1d95   : > { %7686 = vrsqrt.f32 %v5882_v61 }
0x1d9f   : > { %v7687_v52 = vpop.eup %7686 }
0x1da0   : > { %v5884_v4 = vmul.f32 %v7687_v52, %v9222_v26 }
0x1da2   : > { %5885 = vst.msk [vmem:[#allocation2] sm:$0xff] %vm931_vm4, %v5884_v4  ;;  %5886 = vst.msk [vmem:[%s723_s5] sm:$0xff] %vm931_vm4, %v5884_v4 }
0x1da3   : > { %7757 = shalt.err (!%p7754_p9)
}
0x1da4   : > { %s7758_s12 = scalar_lea.hbm %s9311_s30, 128  ;;  %s7762_s10 = scalar_lea.hbm %s9503_s9, 256 }
0x1da5   : > { %p7759_p11 = scmp.ne.s32.totalorder %s9311_s30, %s7758_s12  ;;  %p7763_p13 = scmp.lt.u32.totalorder %s9311_s30, %s9503_s9 }
0x1da6   : > { %p7764_p0 = scmp.lt.u32.totalorder %s7762_s10, %s7758_s12  ;;  %p7766_p12 = scmp.lt.u32.totalorder %s7758_s12, %s9311_s30 }
0x1da7   : > { %p7760_p10 = pnand %p7759_p11, %p8047_p3 }
0x1da8   : > { %p7765_p1 = por %p7764_p0, %p7763_p13 }
0x1da9   : > { %p7761_p7 = pneg %p7760_p10 }
0x1daa   : > { %p7767_p4 = por %p7766_p12, %p7765_p1 }
0x1dac   : > { %p7768_p2 = pnand %p7767_p4, %p7761_p7 }
0x1dae   : > { %7771 = shalt.err (!%p7768_p2)
}
0x1daf   : > { %7435 = dma.vmem_to_hbm [thread:$0]  (%p8047_p3), %s9313_s18, 128, %s9311_s30, %s5888_s25  }
0x1db0 PF: > { %s9505_s22 = sld [smem:[#allocation18_spill]]  ;;  %s9506_s27 = sld [smem:[#allocation12_spill]] }
0x1db1   : > { %s9507_s16 = sld [smem:[#allocation22_spill]] }
0x1db6   : > { %p7451_p5 = scmp.ge.s32.totalorder %s9505_s22, 2  ;;  %s5953_s29 = sand.u32 1, %s9506_s27  }
0x1db7   : > { %p9508_p6 = scmp.ne.s32.totalorder %s9507_s16, 0  ;;  %s5954_s26 = scalar_lea.sflag [#allocation4], %s5953_s29 }
0x1db9   : > { %p7442_p8 = pnand %p7451_p5, %p9508_p6 }
0x1dbb   : > { %7817 = dma.done.wait (!%p7442_p8), %s5954_s26, 128  }
0x1dbc   : > { %7819 = vsyncadd (!%p7442_p8), %s5954_s26, 4294967168  ;;  %s9509_s28 = sadd.s32 4294967294, %s9505_s22   ;;  %s9510_s13 = sld [smem:[#allocation26_spill]] }
0x1dbd   : > { %s5962_s15 = sand.u32 1, %s9509_s28  }
0x1dbe   : > { %s5963_s21 = scalar_lea.sflag [#allocation6], %s5962_s15 }
0x1dc2   : > { %p9511_p9 = scmp.ne.s32.totalorder %s9510_s13, 0 }
0x1dc4   : > { %p7445_p11 = pnand %p7451_p5, %p9511_p9 }
0x1dc6   : > { %7821 = dma.done.wait (!%p7445_p11), %s5963_s21, 256  }
0x1dc7   : > { %7823 = vsyncadd (!%p7445_p11), %s5963_s21, 4294967040  ;;  %s33_s0 = sadd.s32 1, %s9505_s22   ;;  %s9512_s21 = sld [smem:[#allocation10_spill]] }
0x1dc8   : > { %p30_p3 = scmp.ge.s32.totalorder %s33_s0, 14   ;;  %s9513_s22 = sld [smem:[#allocation11_spill]] }
0x1dc9   : > { %s9514_s23 = sld [smem:[#allocation25_spill]]  ;;  %s9515_s24 = sld [smem:[#allocation13_spill]] }
0x1dca   : > { %s9516_s25 = sld [smem:[#allocation14_spill]]  ;;  %s9517_s26 = sld [smem:[#allocation24_spill]] }
0x1dcb   : > { %s9518_s27 = sld [smem:[#allocation16_spill]]  ;;  %s9519_s28 = sld [smem:[#allocation17_spill]] }
0x1dcc   : > { %s9520_s29 = sld [smem:[#allocation19_spill]]  ;;  %s9521_s30 = sld [smem:[#allocation21_spill]] }
0x1dcd   :  { %32 = sbr.rel (!%p30_p3) target bundleno = 26 (0x1a), region = 186 }
0x1dd4   :  { %5977 = vsyncpa [#allocation4], 1 }
0x1dd5   :  { %5979 = vsyncpa [#allocation4 + $0x1], 1 }
0x1dd6   :  { %5980 = vsyncpa [#allocation6], 1 }
0x1dd7   :  { %5982 = vsyncpa [#allocation6 + $0x1], 1 }

</bundles_post_ra>
